<compile_context>
chip_gen: v7x
topology: tpu7x:2x2x1
jax: 0.10.0
libtpu: 0.0.40
codegen_flags: <defaults>
</compile_context>

<pallas_src>
import numpy as np

import jax
import jax.numpy as jnp
from jax.experimental import pallas as pl
from jax.experimental.pallas import tpu as pltpu


# ---------------------------------------------------------------------------
# Host-side constant-matrix builders (run once at init; all tiny).
# ---------------------------------------------------------------------------

def _conv_tap_mats(w_pt, width):
    """PyTorch conv weight (Cout, Cin, 3, 3) -> (3, width*Cin, width*Cout).

    One banded matrix per ky tap; the kx taps and the zero padding along W are
    folded into the band structure, so the kernel only needs 3 matmuls + 2
    row-shift matmuls per conv."""
    cout, cin, _, _ = w_pt.shape
    w = np.transpose(np.asarray(w_pt, np.float32), (2, 3, 1, 0))  # (ky,kx,Cin,Cout)
    mats = np.zeros((3, width * cin, width * cout), np.float32)
    for ky in range(3):
        for kx in range(3):
            for wo in range(width):
                wi = wo + kx - 1
                if 0 <= wi < width:
                    mats[ky, wi * cin:(wi + 1) * cin,
                         wo * cout:(wo + 1) * cout] = w[ky, kx]
    return jnp.asarray(mats)


def _conv_bias_wide(b_pt, width):
    """(Cout,) -> (1, width*Cout), tiled so lane w*Cout + c holds b[c]."""
    b = np.asarray(b_pt, np.float32)
    return jnp.asarray(np.tile(b, width)[None, :])


def _shift_mats(n, h):
    """(2, R, R) with R = n*h.  [0]: row r <- row r-1 (zero at top of each
    image), [1]: row r <- row r+1 (zero at bottom).  Implements the ky shifts
    and H zero-padding of a 3x3 conv as matmuls (no cross-image leakage)."""
    r_tot = n * h
    dn = np.zeros((r_tot, r_tot), np.float32)
    up = np.zeros((r_tot, r_tot), np.float32)
    for i in range(n):
        for hh in range(h):
            r = i * h + hh
            if hh > 0:
                dn[r, r - 1] = 1.0
            if hh < h - 1:
                up[r, r + 1] = 1.0
    return jnp.asarray(np.stack([dn, up]))


def _hpool_mats(rows):
    """(2, rows//2, rows): even/odd row selectors for 2x pooling along H."""
    pe = np.zeros((rows // 2, rows), np.float32)
    po = np.zeros((rows // 2, rows), np.float32)
    for i in range(rows // 2):
        pe[i, 2 * i] = 1.0
        po[i, 2 * i + 1] = 1.0
    return jnp.asarray(np.stack([pe, po]))


def _wpool_mats(width, ch):
    """(2, width*ch, (width//2)*ch): even/odd lane-group selectors for 2x
    pooling along W (channel groups stay contiguous on the lane axis)."""
    se = np.zeros((width * ch, (width // 2) * ch), np.float32)
    so = np.zeros((width * ch, (width // 2) * ch), np.float32)
    for w2 in range(width // 2):
        for c in range(ch):
            se[(2 * w2) * ch + c, w2 * ch + c] = 1.0
            so[(2 * w2 + 1) * ch + c, w2 * ch + c] = 1.0
    return jnp.asarray(np.stack([se, so]))


def _rowsel_mats(n, h):
    """(h, n, n*h): Rsel[k][i, i*h + k] = 1 -- gathers row k of every image
    (used to fold the flatten into the fc1 contraction)."""
    m = np.zeros((h, n, n * h), np.float32)
    for k in range(h):
        for i in range(n):
            m[k, i, i * h + k] = 1.0
    return jnp.asarray(m)


# ---------------------------------------------------------------------------
# Parameter init: PyTorch-shaped weights (deterministic), re-laid-out for the
# fused kernel.
# ---------------------------------------------------------------------------

def init_resnet_params(key, batch, n_in, n_features, height, width, num_blocks=3):
    F = n_features
    C2 = 2 * F
    H, W = height, width
    H1, W1 = H // 2, W // 2
    H2, W2 = H // 4, W // 4

    n_keys = 2 * (1 + 2 * num_blocks + 1 + 3)
    keys = jax.random.split(key, n_keys)
    ki = iter(range(n_keys))

    def conv_pt(cout, cin):
        w = 0.05 * jax.random.normal(keys[next(ki)], (cout, cin, 3, 3), jnp.float32)
        b = 0.05 * jax.random.normal(keys[next(ki)], (cout,), jnp.float32)
        return w, b

    def linear_pt(fout, fin):
        w = 0.05 * jax.random.normal(keys[next(ki)], (fout, fin), jnp.float32)
        b = 0.05 * jax.random.normal(keys[next(ki)], (fout,), jnp.float32)
        return w, b

    c0_w, c0_b = conv_pt(F, n_in)
    blk = [conv_pt(F, F) for _ in range(2 * num_blocks)]
    cl_w, cl_b = conv_pt(C2, F)
    flat = H2 * W2 * C2
    f1_w, f1_b = linear_pt(1024, flat)
    f2_w, f2_b = linear_pt(512, 1024)
    f3_w, f3_b = linear_pt(5, 512)

    # fc1: permute rows once so the kernel's (h, w, c) flatten order matches
    # PyTorch's x.view(N, -1) on an NCHW tensor (c, h, w order).  Makes the
    # flatten transpose free.
    f1k = np.asarray(f1_w, np.float32).T.reshape(C2, H2, W2, 1024)  # (c,h,w,out)
    f1k = np.transpose(f1k, (1, 2, 0, 3)).reshape(H2, W2 * C2, 1024)  # (h, w*c, out)

    return dict(
        sd0=_shift_mats(batch, H),
        c0_w=_conv_tap_mats(c0_w, W),
        c0_b=_conv_bias_wide(c0_b, W),
        ph0=_hpool_mats(batch * H),
        sw0=_wpool_mats(W, F),
        sd1=_shift_mats(batch, H1),
        blk_w=jnp.stack([_conv_tap_mats(w, W1) for w, _ in blk]),
        blk_b=jnp.stack([_conv_bias_wide(b, W1) for _, b in blk]),
        ph1=_hpool_mats(batch * H1),
        sw1=_wpool_mats(W1, F),
        sd2=_shift_mats(batch, H2),
        cl_w=_conv_tap_mats(cl_w, W2),
        cl_b=_conv_bias_wide(cl_b, W2),
        rsel=_rowsel_mats(batch, H2),
        f1_w=jnp.asarray(f1k),
        f1_b=jnp.asarray(np.asarray(f1_b, np.float32)[None, :]),
        f2_w=jnp.asarray(np.asarray(f2_w, np.float32).T),
        f2_b=jnp.asarray(np.asarray(f2_b, np.float32)[None, :]),
        f3_w=jnp.asarray(np.asarray(f3_w, np.float32).T),
        f3_b=jnp.asarray(np.asarray(f3_b, np.float32)[None, :]),
    )


# ---------------------------------------------------------------------------
# The single fused Pallas kernel
# ---------------------------------------------------------------------------

def _fused_resnet_kernel(x_ref, sd0, c0w, c0b, ph0, sw0,
                         sd1, bw, bb, ph1, sw1,
                         sd2, clw, clb,
                         rsel, f1w, f1b, f2w, f2b, f3w, f3b,
                         out_ref):
    f32 = jnp.float32

    def mm(a, b):
        return jnp.dot(a, b, preferred_element_type=f32)

    def conv3x3(x, sd_dn, sd_up, w0, w1, w2, bias, residual=None):
        # x: (rows, W*Cin).  Row-shift matmuls supply the ky taps (+H zero pad);
        # banded tap matrices supply the kx taps (+W zero pad).
        acc = mm(mm(sd_dn, x), w0) + bias
        acc = acc + mm(x, w1)
        acc = acc + mm(mm(sd_up, x), w2)
        if residual is not None:
            acc = acc + residual
        # Dropout is identity in eval mode; ReLU fused here.
        return jnp.maximum(acc, 0.0)

    def maxpool2x2(x, phe, pho, swe, swo):
        xh = jnp.maximum(mm(phe, x), mm(pho, x))          # pool along H (rows)
        return jnp.maximum(mm(xh, swe), mm(xh, swo))      # pool along W (lanes)

    # Conv -> (Dropout) -> ReLU -> MaxPool(2,2)
    a = conv3x3(x_ref[...], sd0[0], sd0[1], c0w[0], c0w[1], c0w[2], c0b[...])
    a = maxpool2x2(a, ph0[0], ph0[1], sw0[0], sw0[1])

    # num_blocks x ResNetBlock: a = ReLU(a + conv(ReLU(conv(a))))
    num_blocks = bw.shape[0] // 2
    s1d, s1u = sd1[0], sd1[1]
    for i in range(num_blocks):
        h = conv3x3(a, s1d, s1u,
                    bw[2 * i, 0], bw[2 * i, 1], bw[2 * i, 2], bb[2 * i])
        a = conv3x3(h, s1d, s1u,
                    bw[2 * i + 1, 0], bw[2 * i + 1, 1], bw[2 * i + 1, 2],
                    bb[2 * i + 1], residual=a)

    # MaxPool(2,2) -> Conv -> (Dropout) -> ReLU
    a = maxpool2x2(a, ph1[0], ph1[1], sw1[0], sw1[1])
    a = conv3x3(a, sd2[0], sd2[1], clw[0], clw[1], clw[2], clb[...])

    # FC head.  The NCHW flatten order is baked into f1w's row permutation;
    # rsel gathers row h of every image so the flatten itself is a matmul.
    y = f1b[...]
    for k in range(rsel.shape[0]):
        y = y + mm(mm(rsel[k], a), f1w[k])
    y = jnp.maximum(y, 0.0)                                # fc1 + ReLU
    y = jnp.maximum(mm(y, f2w[...]) + f2b[...], 0.0)       # fc2 + ReLU
    out_ref[...] = mm(y, f3w[...]) + f3b[...]              # fc3


# ---------------------------------------------------------------------------
# Forward wrapper (eval mode: Dropout = identity)
# ---------------------------------------------------------------------------

@jax.jit
def resnet_forward(params, x_nchw):
    n, c_in, h, w = x_nchw.shape
    # NCHW -> lane-dense kernel layout: rows = (n, h), lanes = (w, c).
    x_flat = jnp.transpose(x_nchw.astype(jnp.float32), (0, 2, 3, 1)).reshape(
        n * h, w * c_in)

    order = ("sd0", "c0_w", "c0_b", "ph0", "sw0",
             "sd1", "blk_w", "blk_b", "ph1", "sw1",
             "sd2", "cl_w", "cl_b",
             "rsel", "f1_w", "f1_b", "f2_w", "f2_b", "f3_w", "f3_b")
    args = (x_flat,) + tuple(params[k] for k in order)

    return pl.pallas_call(
        _fused_resnet_kernel,
        out_shape=jax.ShapeDtypeStruct((n, 5), jnp.float32),
        in_specs=[pl.BlockSpec(memory_space=pltpu.MemorySpace.VMEM)
                  for _ in args],
        out_specs=pl.BlockSpec(memory_space=pltpu.MemorySpace.VMEM),
    )(*args)


# ---------------------------------------------------------------------------
# Main
# ---------------------------------------------------------------------------

if __name__ == "__main__":
    key = jax.random.PRNGKey(0)
    k_param, k_x = jax.random.split(key)

    # Small config consistent with the module: n_in=4, n_features=8, 16x16.
    N, n_in, n_features, H, W = 2, 4, 8, 16, 16
    params = init_resnet_params(k_param, N, n_in, n_features, H, W, num_blocks=3)

    x = jax.random.normal(k_x, (N, n_in, H, W), jnp.float32)   # NCHW input

    out = resnet_forward(params, x)
    out = jax.block_until_ready(out)
    assert out.shape == (N, 5), out.shape
    print("KERNEL_OK")
</pallas_src>

<mosaic_0001>
module attributes {stable_mosaic.version = 11 : i64} {
  func.func @_fused_resnet_kernel(%arg0: memref<32x64xf32, #tpu.memory_space<vmem>>, %arg1: memref<2x32x32xf32, #tpu.memory_space<vmem>>, %arg2: memref<3x64x128xf32, #tpu.memory_space<vmem>>, %arg3: memref<1x128xf32, #tpu.memory_space<vmem>>, %arg4: memref<2x16x32xf32, #tpu.memory_space<vmem>>, %arg5: memref<2x128x64xf32, #tpu.memory_space<vmem>>, %arg6: memref<2x16x16xf32, #tpu.memory_space<vmem>>, %arg7: memref<6x3x64x64xf32, #tpu.memory_space<vmem>>, %arg8: memref<6x1x64xf32, #tpu.memory_space<vmem>>, %arg9: memref<2x8x16xf32, #tpu.memory_space<vmem>>, %arg10: memref<2x64x32xf32, #tpu.memory_space<vmem>>, %arg11: memref<2x8x8xf32, #tpu.memory_space<vmem>>, %arg12: memref<3x32x64xf32, #tpu.memory_space<vmem>>, %arg13: memref<1x64xf32, #tpu.memory_space<vmem>>, %arg14: memref<4x2x8xf32, #tpu.memory_space<vmem>>, %arg15: memref<4x64x1024xf32, #tpu.memory_space<vmem>>, %arg16: memref<1x1024xf32, #tpu.memory_space<vmem>>, %arg17: memref<1024x512xf32, #tpu.memory_space<vmem>>, %arg18: memref<1x512xf32, #tpu.memory_space<vmem>>, %arg19: memref<512x5xf32, #tpu.memory_space<vmem>>, %arg20: memref<1x5xf32, #tpu.memory_space<vmem>>, %arg21: memref<2x5xf32, #tpu.memory_space<vmem>>) attributes {dimension_semantics = [], scalar_prefetch = 0 : i64, scratch_operands = 0 : i64, tpu.core_type = #tpu.core_type<tc>} {
    %c0 = arith.constant 0 : index
    %c0_0 = arith.constant 0 : index
    %0 = vector.load %arg0[%c0, %c0_0] : memref<32x64xf32, #tpu.memory_space<vmem>>, vector<32x64xf32>
    %c0_1 = arith.constant 0 : index
    %c0_2 = arith.constant 0 : index
    %c0_3 = arith.constant 0 : index
    %1 = vector.load %arg1[%c0_1, %c0_2, %c0_3] : memref<2x32x32xf32, #tpu.memory_space<vmem>>, vector<1x32x32xf32>
    %2 = vector.shape_cast %1 : vector<1x32x32xf32> to vector<32x32xf32>
    %c1 = arith.constant 1 : index
    %c0_4 = arith.constant 0 : index
    %c0_5 = arith.constant 0 : index
    %3 = vector.load %arg1[%c1, %c0_4, %c0_5] : memref<2x32x32xf32, #tpu.memory_space<vmem>>, vector<1x32x32xf32>
    %4 = vector.shape_cast %3 : vector<1x32x32xf32> to vector<32x32xf32>
    %c0_6 = arith.constant 0 : index
    %c0_7 = arith.constant 0 : index
    %c0_8 = arith.constant 0 : index
    %5 = vector.load %arg2[%c0_6, %c0_7, %c0_8] : memref<3x64x128xf32, #tpu.memory_space<vmem>>, vector<1x64x128xf32>
    %6 = vector.shape_cast %5 : vector<1x64x128xf32> to vector<64x128xf32>
    %c1_9 = arith.constant 1 : index
    %c0_10 = arith.constant 0 : index
    %c0_11 = arith.constant 0 : index
    %7 = vector.load %arg2[%c1_9, %c0_10, %c0_11] : memref<3x64x128xf32, #tpu.memory_space<vmem>>, vector<1x64x128xf32>
    %8 = vector.shape_cast %7 : vector<1x64x128xf32> to vector<64x128xf32>
    %c2 = arith.constant 2 : index
    %c0_12 = arith.constant 0 : index
    %c0_13 = arith.constant 0 : index
    %9 = vector.load %arg2[%c2, %c0_12, %c0_13] : memref<3x64x128xf32, #tpu.memory_space<vmem>>, vector<1x64x128xf32>
    %10 = vector.shape_cast %9 : vector<1x64x128xf32> to vector<64x128xf32>
    %c0_14 = arith.constant 0 : index
    %c0_15 = arith.constant 0 : index
    %11 = vector.load %arg3[%c0_14, %c0_15] : memref<1x128xf32, #tpu.memory_space<vmem>>, vector<1x128xf32>
    %cst = arith.constant dense<0.000000e+00> : vector<32x64xf32>
    %12 = tpu.matmul %2, %0, %cst {dimension_numbers = #tpu.dot_dimension_numbers<[1], [0], [0], [1], [0, 0, 1, 1], [], []>} : vector<32x32xf32>, vector<32x64xf32>, vector<32x64xf32> -> vector<32x64xf32>
    %cst_16 = arith.constant dense<0.000000e+00> : vector<32x128xf32>
    %13 = tpu.matmul %12, %6, %cst_16 {dimension_numbers = #tpu.dot_dimension_numbers<[1], [0], [0], [1], [0, 0, 1, 1], [], []>} : vector<32x64xf32>, vector<64x128xf32>, vector<32x128xf32> -> vector<32x128xf32>
    %14 = vector.broadcast %11 : vector<1x128xf32> to vector<32x128xf32>
    %15 = arith.addf %13, %14 : vector<32x128xf32>
    %cst_17 = arith.constant dense<0.000000e+00> : vector<32x128xf32>
    %16 = tpu.matmul %0, %8, %cst_17 {dimension_numbers = #tpu.dot_dimension_numbers<[1], [0], [0], [1], [0, 0, 1, 1], [], []>} : vector<32x64xf32>, vector<64x128xf32>, vector<32x128xf32> -> vector<32x128xf32>
    %17 = arith.addf %15, %16 : vector<32x128xf32>
    %cst_18 = arith.constant dense<0.000000e+00> : vector<32x64xf32>
    %18 = tpu.matmul %4, %0, %cst_18 {dimension_numbers = #tpu.dot_dimension_numbers<[1], [0], [0], [1], [0, 0, 1, 1], [], []>} : vector<32x32xf32>, vector<32x64xf32>, vector<32x64xf32> -> vector<32x64xf32>
    %cst_19 = arith.constant dense<0.000000e+00> : vector<32x128xf32>
    %19 = tpu.matmul %18, %10, %cst_19 {dimension_numbers = #tpu.dot_dimension_numbers<[1], [0], [0], [1], [0, 0, 1, 1], [], []>} : vector<32x64xf32>, vector<64x128xf32>, vector<32x128xf32> -> vector<32x128xf32>
    %20 = arith.addf %17, %19 : vector<32x128xf32>
    %cst_20 = arith.constant 0.000000e+00 : f32
    %21 = vector.broadcast %cst_20 : f32 to vector<32x128xf32>
    %22 = arith.maximumf %20, %21 : vector<32x128xf32>
    %c0_21 = arith.constant 0 : index
    %c0_22 = arith.constant 0 : index
    %c0_23 = arith.constant 0 : index
    %23 = vector.load %arg4[%c0_21, %c0_22, %c0_23] : memref<2x16x32xf32, #tpu.memory_space<vmem>>, vector<1x16x32xf32>
    %24 = vector.shape_cast %23 : vector<1x16x32xf32> to vector<16x32xf32>
    %c1_24 = arith.constant 1 : index
    %c0_25 = arith.constant 0 : index
    %c0_26 = arith.constant 0 : index
    %25 = vector.load %arg4[%c1_24, %c0_25, %c0_26] : memref<2x16x32xf32, #tpu.memory_space<vmem>>, vector<1x16x32xf32>
    %26 = vector.shape_cast %25 : vector<1x16x32xf32> to vector<16x32xf32>
    %c0_27 = arith.constant 0 : index
    %c0_28 = arith.constant 0 : index
    %c0_29 = arith.constant 0 : index
    %27 = vector.load %arg5[%c0_27, %c0_28, %c0_29] : memref<2x128x64xf32, #tpu.memory_space<vmem>>, vector<1x128x64xf32>
    %28 = vector.shape_cast %27 : vector<1x128x64xf32> to vector<128x64xf32>
    %c1_30 = arith.constant 1 : index
    %c0_31 = arith.constant 0 : index
    %c0_32 = arith.constant 0 : index
    %29 = vector.load %arg5[%c1_30, %c0_31, %c0_32] : memref<2x128x64xf32, #tpu.memory_space<vmem>>, vector<1x128x64xf32>
    %30 = vector.shape_cast %29 : vector<1x128x64xf32> to vector<128x64xf32>
    %cst_33 = arith.constant dense<0.000000e+00> : vector<16x128xf32>
    %31 = tpu.matmul %24, %22, %cst_33 {dimension_numbers = #tpu.dot_dimension_numbers<[1], [0], [0], [1], [0, 0, 1, 1], [], []>} : vector<16x32xf32>, vector<32x128xf32>, vector<16x128xf32> -> vector<16x128xf32>
    %cst_34 = arith.constant dense<0.000000e+00> : vector<16x128xf32>
    %32 = tpu.matmul %26, %22, %cst_34 {dimension_numbers = #tpu.dot_dimension_numbers<[1], [0], [0], [1], [0, 0, 1, 1], [], []>} : vector<16x32xf32>, vector<32x128xf32>, vector<16x128xf32> -> vector<16x128xf32>
    %33 = arith.maximumf %31, %32 : vector<16x128xf32>
    %cst_35 = arith.constant dense<0.000000e+00> : vector<16x64xf32>
    %34 = tpu.matmul %33, %28, %cst_35 {dimension_numbers = #tpu.dot_dimension_numbers<[1], [0], [0], [1], [0, 0, 1, 1], [], []>} : vector<16x128xf32>, vector<128x64xf32>, vector<16x64xf32> -> vector<16x64xf32>
    %cst_36 = arith.constant dense<0.000000e+00> : vector<16x64xf32>
    %35 = tpu.matmul %33, %30, %cst_36 {dimension_numbers = #tpu.dot_dimension_numbers<[1], [0], [0], [1], [0, 0, 1, 1], [], []>} : vector<16x128xf32>, vector<128x64xf32>, vector<16x64xf32> -> vector<16x64xf32>
    %36 = arith.maximumf %34, %35 : vector<16x64xf32>
    %c0_37 = arith.constant 0 : index
    %c0_38 = arith.constant 0 : index
    %c0_39 = arith.constant 0 : index
    %37 = vector.load %arg6[%c0_37, %c0_38, %c0_39] : memref<2x16x16xf32, #tpu.memory_space<vmem>>, vector<1x16x16xf32>
    %38 = vector.shape_cast %37 : vector<1x16x16xf32> to vector<16x16xf32>
    %c1_40 = arith.constant 1 : index
    %c0_41 = arith.constant 0 : index
    %c0_42 = arith.constant 0 : index
    %39 = vector.load %arg6[%c1_40, %c0_41, %c0_42] : memref<2x16x16xf32, #tpu.memory_space<vmem>>, vector<1x16x16xf32>
    %40 = vector.shape_cast %39 : vector<1x16x16xf32> to vector<16x16xf32>
    %c0_43 = arith.constant 0 : index
    %c0_44 = arith.constant 0 : index
    %c0_45 = arith.constant 0 : index
    %c0_46 = arith.constant 0 : index
    %41 = vector.load %arg7[%c0_43, %c0_44, %c0_45, %c0_46] : memref<6x3x64x64xf32, #tpu.memory_space<vmem>>, vector<1x1x64x64xf32>
    %42 = vector.shape_cast %41 : vector<1x1x64x64xf32> to vector<64x64xf32>
    %c0_47 = arith.constant 0 : index
    %c1_48 = arith.constant 1 : index
    %c0_49 = arith.constant 0 : index
    %c0_50 = arith.constant 0 : index
    %43 = vector.load %arg7[%c0_47, %c1_48, %c0_49, %c0_50] : memref<6x3x64x64xf32, #tpu.memory_space<vmem>>, vector<1x1x64x64xf32>
    %44 = vector.shape_cast %43 : vector<1x1x64x64xf32> to vector<64x64xf32>
    %c0_51 = arith.constant 0 : index
    %c2_52 = arith.constant 2 : index
    %c0_53 = arith.constant 0 : index
    %c0_54 = arith.constant 0 : index
    %45 = vector.load %arg7[%c0_51, %c2_52, %c0_53, %c0_54] : memref<6x3x64x64xf32, #tpu.memory_space<vmem>>, vector<1x1x64x64xf32>
    %46 = vector.shape_cast %45 : vector<1x1x64x64xf32> to vector<64x64xf32>
    %c0_55 = arith.constant 0 : index
    %c0_56 = arith.constant 0 : index
    %c0_57 = arith.constant 0 : index
    %47 = vector.load %arg8[%c0_55, %c0_56, %c0_57] : memref<6x1x64xf32, #tpu.memory_space<vmem>>, vector<1x1x64xf32>
    %48 = vector.shape_cast %47 : vector<1x1x64xf32> to vector<1x64xf32>
    %cst_58 = arith.constant dense<0.000000e+00> : vector<16x64xf32>
    %49 = tpu.matmul %38, %36, %cst_58 {dimension_numbers = #tpu.dot_dimension_numbers<[1], [0], [0], [1], [0, 0, 1, 1], [], []>} : vector<16x16xf32>, vector<16x64xf32>, vector<16x64xf32> -> vector<16x64xf32>
    %cst_59 = arith.constant dense<0.000000e+00> : vector<16x64xf32>
    %50 = tpu.matmul %49, %42, %cst_59 {dimension_numbers = #tpu.dot_dimension_numbers<[1], [0], [0], [1], [0, 0, 1, 1], [], []>} : vector<16x64xf32>, vector<64x64xf32>, vector<16x64xf32> -> vector<16x64xf32>
    %51 = vector.broadcast %48 : vector<1x64xf32> to vector<16x64xf32>
    %52 = arith.addf %50, %51 : vector<16x64xf32>
    %cst_60 = arith.constant dense<0.000000e+00> : vector<16x64xf32>
    %53 = tpu.matmul %36, %44, %cst_60 {dimension_numbers = #tpu.dot_dimension_numbers<[1], [0], [0], [1], [0, 0, 1, 1], [], []>} : vector<16x64xf32>, vector<64x64xf32>, vector<16x64xf32> -> vector<16x64xf32>
    %54 = arith.addf %52, %53 : vector<16x64xf32>
    %cst_61 = arith.constant dense<0.000000e+00> : vector<16x64xf32>
    %55 = tpu.matmul %40, %36, %cst_61 {dimension_numbers = #tpu.dot_dimension_numbers<[1], [0], [0], [1], [0, 0, 1, 1], [], []>} : vector<16x16xf32>, vector<16x64xf32>, vector<16x64xf32> -> vector<16x64xf32>
    %cst_62 = arith.constant dense<0.000000e+00> : vector<16x64xf32>
    %56 = tpu.matmul %55, %46, %cst_62 {dimension_numbers = #tpu.dot_dimension_numbers<[1], [0], [0], [1], [0, 0, 1, 1], [], []>} : vector<16x64xf32>, vector<64x64xf32>, vector<16x64xf32> -> vector<16x64xf32>
    %57 = arith.addf %54, %56 : vector<16x64xf32>
    %cst_63 = arith.constant 0.000000e+00 : f32
    %58 = vector.broadcast %cst_63 : f32 to vector<16x64xf32>
    %59 = arith.maximumf %57, %58 : vector<16x64xf32>
    %c1_64 = arith.constant 1 : index
    %c0_65 = arith.constant 0 : index
    %c0_66 = arith.constant 0 : index
    %c0_67 = arith.constant 0 : index
    %60 = vector.load %arg7[%c1_64, %c0_65, %c0_66, %c0_67] : memref<6x3x64x64xf32, #tpu.memory_space<vmem>>, vector<1x1x64x64xf32>
    %61 = vector.shape_cast %60 : vector<1x1x64x64xf32> to vector<64x64xf32>
    %c1_68 = arith.constant 1 : index
    %c1_69 = arith.constant 1 : index
    %c0_70 = arith.constant 0 : index
    %c0_71 = arith.constant 0 : index
    %62 = vector.load %arg7[%c1_68, %c1_69, %c0_70, %c0_71] : memref<6x3x64x64xf32, #tpu.memory_space<vmem>>, vector<1x1x64x64xf32>
    %63 = vector.shape_cast %62 : vector<1x1x64x64xf32> to vector<64x64xf32>
    %c1_72 = arith.constant 1 : index
    %c2_73 = arith.constant 2 : index
    %c0_74 = arith.constant 0 : index
    %c0_75 = arith.constant 0 : index
    %64 = vector.load %arg7[%c1_72, %c2_73, %c0_74, %c0_75] : memref<6x3x64x64xf32, #tpu.memory_space<vmem>>, vector<1x1x64x64xf32>
    %65 = vector.shape_cast %64 : vector<1x1x64x64xf32> to vector<64x64xf32>
    %c1_76 = arith.constant 1 : index
    %c0_77 = arith.constant 0 : index
    %c0_78 = arith.constant 0 : index
    %66 = vector.load %arg8[%c1_76, %c0_77, %c0_78] : memref<6x1x64xf32, #tpu.memory_space<vmem>>, vector<1x1x64xf32>
    %67 = vector.shape_cast %66 : vector<1x1x64xf32> to vector<1x64xf32>
    %cst_79 = arith.constant dense<0.000000e+00> : vector<16x64xf32>
    %68 = tpu.matmul %38, %59, %cst_79 {dimension_numbers = #tpu.dot_dimension_numbers<[1], [0], [0], [1], [0, 0, 1, 1], [], []>} : vector<16x16xf32>, vector<16x64xf32>, vector<16x64xf32> -> vector<16x64xf32>
    %cst_80 = arith.constant dense<0.000000e+00> : vector<16x64xf32>
    %69 = tpu.matmul %68, %61, %cst_80 {dimension_numbers = #tpu.dot_dimension_numbers<[1], [0], [0], [1], [0, 0, 1, 1], [], []>} : vector<16x64xf32>, vector<64x64xf32>, vector<16x64xf32> -> vector<16x64xf32>
    %70 = vector.broadcast %67 : vector<1x64xf32> to vector<16x64xf32>
    %71 = arith.addf %69, %70 : vector<16x64xf32>
    %cst_81 = arith.constant dense<0.000000e+00> : vector<16x64xf32>
    %72 = tpu.matmul %59, %63, %cst_81 {dimension_numbers = #tpu.dot_dimension_numbers<[1], [0], [0], [1], [0, 0, 1, 1], [], []>} : vector<16x64xf32>, vector<64x64xf32>, vector<16x64xf32> -> vector<16x64xf32>
    %73 = arith.addf %71, %72 : vector<16x64xf32>
    %cst_82 = arith.constant dense<0.000000e+00> : vector<16x64xf32>
    %74 = tpu.matmul %40, %59, %cst_82 {dimension_numbers = #tpu.dot_dimension_numbers<[1], [0], [0], [1], [0, 0, 1, 1], [], []>} : vector<16x16xf32>, vector<16x64xf32>, vector<16x64xf32> -> vector<16x64xf32>
    %cst_83 = arith.constant dense<0.000000e+00> : vector<16x64xf32>
    %75 = tpu.matmul %74, %65, %cst_83 {dimension_numbers = #tpu.dot_dimension_numbers<[1], [0], [0], [1], [0, 0, 1, 1], [], []>} : vector<16x64xf32>, vector<64x64xf32>, vector<16x64xf32> -> vector<16x64xf32>
    %76 = arith.addf %73, %75 : vector<16x64xf32>
    %77 = arith.addf %76, %36 : vector<16x64xf32>
    %cst_84 = arith.constant 0.000000e+00 : f32
    %78 = vector.broadcast %cst_84 : f32 to vector<16x64xf32>
    %79 = arith.maximumf %77, %78 : vector<16x64xf32>
    %c2_85 = arith.constant 2 : index
    %c0_86 = arith.constant 0 : index
    %c0_87 = arith.constant 0 : index
    %c0_88 = arith.constant 0 : index
    %80 = vector.load %arg7[%c2_85, %c0_86, %c0_87, %c0_88] : memref<6x3x64x64xf32, #tpu.memory_space<vmem>>, vector<1x1x64x64xf32>
    %81 = vector.shape_cast %80 : vector<1x1x64x64xf32> to vector<64x64xf32>
    %c2_89 = arith.constant 2 : index
    %c1_90 = arith.constant 1 : index
    %c0_91 = arith.constant 0 : index
    %c0_92 = arith.constant 0 : index
    %82 = vector.load %arg7[%c2_89, %c1_90, %c0_91, %c0_92] : memref<6x3x64x64xf32, #tpu.memory_space<vmem>>, vector<1x1x64x64xf32>
    %83 = vector.shape_cast %82 : vector<1x1x64x64xf32> to vector<64x64xf32>
    %c2_93 = arith.constant 2 : index
    %c2_94 = arith.constant 2 : index
    %c0_95 = arith.constant 0 : index
    %c0_96 = arith.constant 0 : index
    %84 = vector.load %arg7[%c2_93, %c2_94, %c0_95, %c0_96] : memref<6x3x64x64xf32, #tpu.memory_space<vmem>>, vector<1x1x64x64xf32>
    %85 = vector.shape_cast %84 : vector<1x1x64x64xf32> to vector<64x64xf32>
    %c2_97 = arith.constant 2 : index
    %c0_98 = arith.constant 0 : index
    %c0_99 = arith.constant 0 : index
    %86 = vector.load %arg8[%c2_97, %c0_98, %c0_99] : memref<6x1x64xf32, #tpu.memory_space<vmem>>, vector<1x1x64xf32>
    %87 = vector.shape_cast %86 : vector<1x1x64xf32> to vector<1x64xf32>
    %cst_100 = arith.constant dense<0.000000e+00> : vector<16x64xf32>
    %88 = tpu.matmul %38, %79, %cst_100 {dimension_numbers = #tpu.dot_dimension_numbers<[1], [0], [0], [1], [0, 0, 1, 1], [], []>} : vector<16x16xf32>, vector<16x64xf32>, vector<16x64xf32> -> vector<16x64xf32>
    %cst_101 = arith.constant dense<0.000000e+00> : vector<16x64xf32>
    %89 = tpu.matmul %88, %81, %cst_101 {dimension_numbers = #tpu.dot_dimension_numbers<[1], [0], [0], [1], [0, 0, 1, 1], [], []>} : vector<16x64xf32>, vector<64x64xf32>, vector<16x64xf32> -> vector<16x64xf32>
    %90 = vector.broadcast %87 : vector<1x64xf32> to vector<16x64xf32>
    %91 = arith.addf %89, %90 : vector<16x64xf32>
    %cst_102 = arith.constant dense<0.000000e+00> : vector<16x64xf32>
    %92 = tpu.matmul %79, %83, %cst_102 {dimension_numbers = #tpu.dot_dimension_numbers<[1], [0], [0], [1], [0, 0, 1, 1], [], []>} : vector<16x64xf32>, vector<64x64xf32>, vector<16x64xf32> -> vector<16x64xf32>
    %93 = arith.addf %91, %92 : vector<16x64xf32>
    %cst_103 = arith.constant dense<0.000000e+00> : vector<16x64xf32>
    %94 = tpu.matmul %40, %79, %cst_103 {dimension_numbers = #tpu.dot_dimension_numbers<[1], [0], [0], [1], [0, 0, 1, 1], [], []>} : vector<16x16xf32>, vector<16x64xf32>, vector<16x64xf32> -> vector<16x64xf32>
    %cst_104 = arith.constant dense<0.000000e+00> : vector<16x64xf32>
    %95 = tpu.matmul %94, %85, %cst_104 {dimension_numbers = #tpu.dot_dimension_numbers<[1], [0], [0], [1], [0, 0, 1, 1], [], []>} : vector<16x64xf32>, vector<64x64xf32>, vector<16x64xf32> -> vector<16x64xf32>
    %96 = arith.addf %93, %95 : vector<16x64xf32>
    %cst_105 = arith.constant 0.000000e+00 : f32
    %97 = vector.broadcast %cst_105 : f32 to vector<16x64xf32>
    %98 = arith.maximumf %96, %97 : vector<16x64xf32>
    %c3 = arith.constant 3 : index
    %c0_106 = arith.constant 0 : index
    %c0_107 = arith.constant 0 : index
    %c0_108 = arith.constant 0 : index
    %99 = vector.load %arg7[%c3, %c0_106, %c0_107, %c0_108] : memref<6x3x64x64xf32, #tpu.memory_space<vmem>>, vector<1x1x64x64xf32>
    %100 = vector.shape_cast %99 : vector<1x1x64x64xf32> to vector<64x64xf32>
    %c3_109 = arith.constant 3 : index
    %c1_110 = arith.constant 1 : index
    %c0_111 = arith.constant 0 : index
    %c0_112 = arith.constant 0 : index
    %101 = vector.load %arg7[%c3_109, %c1_110, %c0_111, %c0_112] : memref<6x3x64x64xf32, #tpu.memory_space<vmem>>, vector<1x1x64x64xf32>
    %102 = vector.shape_cast %101 : vector<1x1x64x64xf32> to vector<64x64xf32>
    %c3_113 = arith.constant 3 : index
    %c2_114 = arith.constant 2 : index
    %c0_115 = arith.constant 0 : index
    %c0_116 = arith.constant 0 : index
    %103 = vector.load %arg7[%c3_113, %c2_114, %c0_115, %c0_116] : memref<6x3x64x64xf32, #tpu.memory_space<vmem>>, vector<1x1x64x64xf32>
    %104 = vector.shape_cast %103 : vector<1x1x64x64xf32> to vector<64x64xf32>
    %c3_117 = arith.constant 3 : index
    %c0_118 = arith.constant 0 : index
    %c0_119 = arith.constant 0 : index
    %105 = vector.load %arg8[%c3_117, %c0_118, %c0_119] : memref<6x1x64xf32, #tpu.memory_space<vmem>>, vector<1x1x64xf32>
    %106 = vector.shape_cast %105 : vector<1x1x64xf32> to vector<1x64xf32>
    %cst_120 = arith.constant dense<0.000000e+00> : vector<16x64xf32>
    %107 = tpu.matmul %38, %98, %cst_120 {dimension_numbers = #tpu.dot_dimension_numbers<[1], [0], [0], [1], [0, 0, 1, 1], [], []>} : vector<16x16xf32>, vector<16x64xf32>, vector<16x64xf32> -> vector<16x64xf32>
    %cst_121 = arith.constant dense<0.000000e+00> : vector<16x64xf32>
    %108 = tpu.matmul %107, %100, %cst_121 {dimension_numbers = #tpu.dot_dimension_numbers<[1], [0], [0], [1], [0, 0, 1, 1], [], []>} : vector<16x64xf32>, vector<64x64xf32>, vector<16x64xf32> -> vector<16x64xf32>
    %109 = vector.broadcast %106 : vector<1x64xf32> to vector<16x64xf32>
    %110 = arith.addf %108, %109 : vector<16x64xf32>
    %cst_122 = arith.constant dense<0.000000e+00> : vector<16x64xf32>
    %111 = tpu.matmul %98, %102, %cst_122 {dimension_numbers = #tpu.dot_dimension_numbers<[1], [0], [0], [1], [0, 0, 1, 1], [], []>} : vector<16x64xf32>, vector<64x64xf32>, vector<16x64xf32> -> vector<16x64xf32>
    %112 = arith.addf %110, %111 : vector<16x64xf32>
    %cst_123 = arith.constant dense<0.000000e+00> : vector<16x64xf32>
    %113 = tpu.matmul %40, %98, %cst_123 {dimension_numbers = #tpu.dot_dimension_numbers<[1], [0], [0], [1], [0, 0, 1, 1], [], []>} : vector<16x16xf32>, vector<16x64xf32>, vector<16x64xf32> -> vector<16x64xf32>
    %cst_124 = arith.constant dense<0.000000e+00> : vector<16x64xf32>
    %114 = tpu.matmul %113, %104, %cst_124 {dimension_numbers = #tpu.dot_dimension_numbers<[1], [0], [0], [1], [0, 0, 1, 1], [], []>} : vector<16x64xf32>, vector<64x64xf32>, vector<16x64xf32> -> vector<16x64xf32>
    %115 = arith.addf %112, %114 : vector<16x64xf32>
    %116 = arith.addf %115, %79 : vector<16x64xf32>
    %cst_125 = arith.constant 0.000000e+00 : f32
    %117 = vector.broadcast %cst_125 : f32 to vector<16x64xf32>
    %118 = arith.maximumf %116, %117 : vector<16x64xf32>
    %c4 = arith.constant 4 : index
    %c0_126 = arith.constant 0 : index
    %c0_127 = arith.constant 0 : index
    %c0_128 = arith.constant 0 : index
    %119 = vector.load %arg7[%c4, %c0_126, %c0_127, %c0_128] : memref<6x3x64x64xf32, #tpu.memory_space<vmem>>, vector<1x1x64x64xf32>
    %120 = vector.shape_cast %119 : vector<1x1x64x64xf32> to vector<64x64xf32>
    %c4_129 = arith.constant 4 : index
    %c1_130 = arith.constant 1 : index
    %c0_131 = arith.constant 0 : index
    %c0_132 = arith.constant 0 : index
    %121 = vector.load %arg7[%c4_129, %c1_130, %c0_131, %c0_132] : memref<6x3x64x64xf32, #tpu.memory_space<vmem>>, vector<1x1x64x64xf32>
    %122 = vector.shape_cast %121 : vector<1x1x64x64xf32> to vector<64x64xf32>
    %c4_133 = arith.constant 4 : index
    %c2_134 = arith.constant 2 : index
    %c0_135 = arith.constant 0 : index
    %c0_136 = arith.constant 0 : index
    %123 = vector.load %arg7[%c4_133, %c2_134, %c0_135, %c0_136] : memref<6x3x64x64xf32, #tpu.memory_space<vmem>>, vector<1x1x64x64xf32>
    %124 = vector.shape_cast %123 : vector<1x1x64x64xf32> to vector<64x64xf32>
    %c4_137 = arith.constant 4 : index
    %c0_138 = arith.constant 0 : index
    %c0_139 = arith.constant 0 : index
    %125 = vector.load %arg8[%c4_137, %c0_138, %c0_139] : memref<6x1x64xf32, #tpu.memory_space<vmem>>, vector<1x1x64xf32>
    %126 = vector.shape_cast %125 : vector<1x1x64xf32> to vector<1x64xf32>
    %cst_140 = arith.constant dense<0.000000e+00> : vector<16x64xf32>
    %127 = tpu.matmul %38, %118, %cst_140 {dimension_numbers = #tpu.dot_dimension_numbers<[1], [0], [0], [1], [0, 0, 1, 1], [], []>} : vector<16x16xf32>, vector<16x64xf32>, vector<16x64xf32> -> vector<16x64xf32>
    %cst_141 = arith.constant dense<0.000000e+00> : vector<16x64xf32>
    %128 = tpu.matmul %127, %120, %cst_141 {dimension_numbers = #tpu.dot_dimension_numbers<[1], [0], [0], [1], [0, 0, 1, 1], [], []>} : vector<16x64xf32>, vector<64x64xf32>, vector<16x64xf32> -> vector<16x64xf32>
    %129 = vector.broadcast %126 : vector<1x64xf32> to vector<16x64xf32>
    %130 = arith.addf %128, %129 : vector<16x64xf32>
    %cst_142 = arith.constant dense<0.000000e+00> : vector<16x64xf32>
    %131 = tpu.matmul %118, %122, %cst_142 {dimension_numbers = #tpu.dot_dimension_numbers<[1], [0], [0], [1], [0, 0, 1, 1], [], []>} : vector<16x64xf32>, vector<64x64xf32>, vector<16x64xf32> -> vector<16x64xf32>
    %132 = arith.addf %130, %131 : vector<16x64xf32>
    %cst_143 = arith.constant dense<0.000000e+00> : vector<16x64xf32>
    %133 = tpu.matmul %40, %118, %cst_143 {dimension_numbers = #tpu.dot_dimension_numbers<[1], [0], [0], [1], [0, 0, 1, 1], [], []>} : vector<16x16xf32>, vector<16x64xf32>, vector<16x64xf32> -> vector<16x64xf32>
    %cst_144 = arith.constant dense<0.000000e+00> : vector<16x64xf32>
    %134 = tpu.matmul %133, %124, %cst_144 {dimension_numbers = #tpu.dot_dimension_numbers<[1], [0], [0], [1], [0, 0, 1, 1], [], []>} : vector<16x64xf32>, vector<64x64xf32>, vector<16x64xf32> -> vector<16x64xf32>
    %135 = arith.addf %132, %134 : vector<16x64xf32>
    %cst_145 = arith.constant 0.000000e+00 : f32
    %136 = vector.broadcast %cst_145 : f32 to vector<16x64xf32>
    %137 = arith.maximumf %135, %136 : vector<16x64xf32>
    %c5 = arith.constant 5 : index
    %c0_146 = arith.constant 0 : index
    %c0_147 = arith.constant 0 : index
    %c0_148 = arith.constant 0 : index
    %138 = vector.load %arg7[%c5, %c0_146, %c0_147, %c0_148] : memref<6x3x64x64xf32, #tpu.memory_space<vmem>>, vector<1x1x64x64xf32>
    %139 = vector.shape_cast %138 : vector<1x1x64x64xf32> to vector<64x64xf32>
    %c5_149 = arith.constant 5 : index
    %c1_150 = arith.constant 1 : index
    %c0_151 = arith.constant 0 : index
    %c0_152 = arith.constant 0 : index
    %140 = vector.load %arg7[%c5_149, %c1_150, %c0_151, %c0_152] : memref<6x3x64x64xf32, #tpu.memory_space<vmem>>, vector<1x1x64x64xf32>
    %141 = vector.shape_cast %140 : vector<1x1x64x64xf32> to vector<64x64xf32>
    %c5_153 = arith.constant 5 : index
    %c2_154 = arith.constant 2 : index
    %c0_155 = arith.constant 0 : index
    %c0_156 = arith.constant 0 : index
    %142 = vector.load %arg7[%c5_153, %c2_154, %c0_155, %c0_156] : memref<6x3x64x64xf32, #tpu.memory_space<vmem>>, vector<1x1x64x64xf32>
    %143 = vector.shape_cast %142 : vector<1x1x64x64xf32> to vector<64x64xf32>
    %c5_157 = arith.constant 5 : index
    %c0_158 = arith.constant 0 : index
    %c0_159 = arith.constant 0 : index
    %144 = vector.load %arg8[%c5_157, %c0_158, %c0_159] : memref<6x1x64xf32, #tpu.memory_space<vmem>>, vector<1x1x64xf32>
    %145 = vector.shape_cast %144 : vector<1x1x64xf32> to vector<1x64xf32>
    %cst_160 = arith.constant dense<0.000000e+00> : vector<16x64xf32>
    %146 = tpu.matmul %38, %137, %cst_160 {dimension_numbers = #tpu.dot_dimension_numbers<[1], [0], [0], [1], [0, 0, 1, 1], [], []>} : vector<16x16xf32>, vector<16x64xf32>, vector<16x64xf32> -> vector<16x64xf32>
    %cst_161 = arith.constant dense<0.000000e+00> : vector<16x64xf32>
    %147 = tpu.matmul %146, %139, %cst_161 {dimension_numbers = #tpu.dot_dimension_numbers<[1], [0], [0], [1], [0, 0, 1, 1], [], []>} : vector<16x64xf32>, vector<64x64xf32>, vector<16x64xf32> -> vector<16x64xf32>
    %148 = vector.broadcast %145 : vector<1x64xf32> to vector<16x64xf32>
    %149 = arith.addf %147, %148 : vector<16x64xf32>
    %cst_162 = arith.constant dense<0.000000e+00> : vector<16x64xf32>
    %150 = tpu.matmul %137, %141, %cst_162 {dimension_numbers = #tpu.dot_dimension_numbers<[1], [0], [0], [1], [0, 0, 1, 1], [], []>} : vector<16x64xf32>, vector<64x64xf32>, vector<16x64xf32> -> vector<16x64xf32>
    %151 = arith.addf %149, %150 : vector<16x64xf32>
    %cst_163 = arith.constant dense<0.000000e+00> : vector<16x64xf32>
    %152 = tpu.matmul %40, %137, %cst_163 {dimension_numbers = #tpu.dot_dimension_numbers<[1], [0], [0], [1], [0, 0, 1, 1], [], []>} : vector<16x16xf32>, vector<16x64xf32>, vector<16x64xf32> -> vector<16x64xf32>
    %cst_164 = arith.constant dense<0.000000e+00> : vector<16x64xf32>
    %153 = tpu.matmul %152, %143, %cst_164 {dimension_numbers = #tpu.dot_dimension_numbers<[1], [0], [0], [1], [0, 0, 1, 1], [], []>} : vector<16x64xf32>, vector<64x64xf32>, vector<16x64xf32> -> vector<16x64xf32>
    %154 = arith.addf %151, %153 : vector<16x64xf32>
    %155 = arith.addf %154, %118 : vector<16x64xf32>
    %cst_165 = arith.constant 0.000000e+00 : f32
    %156 = vector.broadcast %cst_165 : f32 to vector<16x64xf32>
    %157 = arith.maximumf %155, %156 : vector<16x64xf32>
    %c0_166 = arith.constant 0 : index
    %c0_167 = arith.constant 0 : index
    %c0_168 = arith.constant 0 : index
    %158 = vector.load %arg9[%c0_166, %c0_167, %c0_168] : memref<2x8x16xf32, #tpu.memory_space<vmem>>, vector<1x8x16xf32>
    %159 = vector.shape_cast %158 : vector<1x8x16xf32> to vector<8x16xf32>
    %c1_169 = arith.constant 1 : index
    %c0_170 = arith.constant 0 : index
    %c0_171 = arith.constant 0 : index
    %160 = vector.load %arg9[%c1_169, %c0_170, %c0_171] : memref<2x8x16xf32, #tpu.memory_space<vmem>>, vector<1x8x16xf32>
    %161 = vector.shape_cast %160 : vector<1x8x16xf32> to vector<8x16xf32>
    %c0_172 = arith.constant 0 : index
    %c0_173 = arith.constant 0 : index
    %c0_174 = arith.constant 0 : index
    %162 = vector.load %arg10[%c0_172, %c0_173, %c0_174] : memref<2x64x32xf32, #tpu.memory_space<vmem>>, vector<1x64x32xf32>
    %163 = vector.shape_cast %162 : vector<1x64x32xf32> to vector<64x32xf32>
    %c1_175 = arith.constant 1 : index
    %c0_176 = arith.constant 0 : index
    %c0_177 = arith.constant 0 : index
    %164 = vector.load %arg10[%c1_175, %c0_176, %c0_177] : memref<2x64x32xf32, #tpu.memory_space<vmem>>, vector<1x64x32xf32>
    %165 = vector.shape_cast %164 : vector<1x64x32xf32> to vector<64x32xf32>
    %cst_178 = arith.constant dense<0.000000e+00> : vector<8x64xf32>
    %166 = tpu.matmul %159, %157, %cst_178 {dimension_numbers = #tpu.dot_dimension_numbers<[1], [0], [0], [1], [0, 0, 1, 1], [], []>} : vector<8x16xf32>, vector<16x64xf32>, vector<8x64xf32> -> vector<8x64xf32>
    %cst_179 = arith.constant dense<0.000000e+00> : vector<8x64xf32>
    %167 = tpu.matmul %161, %157, %cst_179 {dimension_numbers = #tpu.dot_dimension_numbers<[1], [0], [0], [1], [0, 0, 1, 1], [], []>} : vector<8x16xf32>, vector<16x64xf32>, vector<8x64xf32> -> vector<8x64xf32>
    %168 = arith.maximumf %166, %167 : vector<8x64xf32>
    %cst_180 = arith.constant dense<0.000000e+00> : vector<8x32xf32>
    %169 = tpu.matmul %168, %163, %cst_180 {dimension_numbers = #tpu.dot_dimension_numbers<[1], [0], [0], [1], [0, 0, 1, 1], [], []>} : vector<8x64xf32>, vector<64x32xf32>, vector<8x32xf32> -> vector<8x32xf32>
    %cst_181 = arith.constant dense<0.000000e+00> : vector<8x32xf32>
    %170 = tpu.matmul %168, %165, %cst_181 {dimension_numbers = #tpu.dot_dimension_numbers<[1], [0], [0], [1], [0, 0, 1, 1], [], []>} : vector<8x64xf32>, vector<64x32xf32>, vector<8x32xf32> -> vector<8x32xf32>
    %171 = arith.maximumf %169, %170 : vector<8x32xf32>
    %c0_182 = arith.constant 0 : index
    %c0_183 = arith.constant 0 : index
    %c0_184 = arith.constant 0 : index
    %172 = vector.load %arg11[%c0_182, %c0_183, %c0_184] : memref<2x8x8xf32, #tpu.memory_space<vmem>>, vector<1x8x8xf32>
    %173 = vector.shape_cast %172 : vector<1x8x8xf32> to vector<8x8xf32>
    %c1_185 = arith.constant 1 : index
    %c0_186 = arith.constant 0 : index
    %c0_187 = arith.constant 0 : index
    %174 = vector.load %arg11[%c1_185, %c0_186, %c0_187] : memref<2x8x8xf32, #tpu.memory_space<vmem>>, vector<1x8x8xf32>
    %175 = vector.shape_cast %174 : vector<1x8x8xf32> to vector<8x8xf32>
    %c0_188 = arith.constant 0 : index
    %c0_189 = arith.constant 0 : index
    %c0_190 = arith.constant 0 : index
    %176 = vector.load %arg12[%c0_188, %c0_189, %c0_190] : memref<3x32x64xf32, #tpu.memory_space<vmem>>, vector<1x32x64xf32>
    %177 = vector.shape_cast %176 : vector<1x32x64xf32> to vector<32x64xf32>
    %c1_191 = arith.constant 1 : index
    %c0_192 = arith.constant 0 : index
    %c0_193 = arith.constant 0 : index
    %178 = vector.load %arg12[%c1_191, %c0_192, %c0_193] : memref<3x32x64xf32, #tpu.memory_space<vmem>>, vector<1x32x64xf32>
    %179 = vector.shape_cast %178 : vector<1x32x64xf32> to vector<32x64xf32>
    %c2_194 = arith.constant 2 : index
    %c0_195 = arith.constant 0 : index
    %c0_196 = arith.constant 0 : index
    %180 = vector.load %arg12[%c2_194, %c0_195, %c0_196] : memref<3x32x64xf32, #tpu.memory_space<vmem>>, vector<1x32x64xf32>
    %181 = vector.shape_cast %180 : vector<1x32x64xf32> to vector<32x64xf32>
    %c0_197 = arith.constant 0 : index
    %c0_198 = arith.constant 0 : index
    %182 = vector.load %arg13[%c0_197, %c0_198] : memref<1x64xf32, #tpu.memory_space<vmem>>, vector<1x64xf32>
    %cst_199 = arith.constant dense<0.000000e+00> : vector<8x32xf32>
    %183 = tpu.matmul %173, %171, %cst_199 {dimension_numbers = #tpu.dot_dimension_numbers<[1], [0], [0], [1], [0, 0, 1, 1], [], []>} : vector<8x8xf32>, vector<8x32xf32>, vector<8x32xf32> -> vector<8x32xf32>
    %cst_200 = arith.constant dense<0.000000e+00> : vector<8x64xf32>
    %184 = tpu.matmul %183, %177, %cst_200 {dimension_numbers = #tpu.dot_dimension_numbers<[1], [0], [0], [1], [0, 0, 1, 1], [], []>} : vector<8x32xf32>, vector<32x64xf32>, vector<8x64xf32> -> vector<8x64xf32>
    %185 = vector.broadcast %182 : vector<1x64xf32> to vector<8x64xf32>
    %186 = arith.addf %184, %185 : vector<8x64xf32>
    %cst_201 = arith.constant dense<0.000000e+00> : vector<8x64xf32>
    %187 = tpu.matmul %171, %179, %cst_201 {dimension_numbers = #tpu.dot_dimension_numbers<[1], [0], [0], [1], [0, 0, 1, 1], [], []>} : vector<8x32xf32>, vector<32x64xf32>, vector<8x64xf32> -> vector<8x64xf32>
    %188 = arith.addf %186, %187 : vector<8x64xf32>
    %cst_202 = arith.constant dense<0.000000e+00> : vector<8x32xf32>
    %189 = tpu.matmul %175, %171, %cst_202 {dimension_numbers = #tpu.dot_dimension_numbers<[1], [0], [0], [1], [0, 0, 1, 1], [], []>} : vector<8x8xf32>, vector<8x32xf32>, vector<8x32xf32> -> vector<8x32xf32>
    %cst_203 = arith.constant dense<0.000000e+00> : vector<8x64xf32>
    %190 = tpu.matmul %189, %181, %cst_203 {dimension_numbers = #tpu.dot_dimension_numbers<[1], [0], [0], [1], [0, 0, 1, 1], [], []>} : vector<8x32xf32>, vector<32x64xf32>, vector<8x64xf32> -> vector<8x64xf32>
    %191 = arith.addf %188, %190 : vector<8x64xf32>
    %cst_204 = arith.constant 0.000000e+00 : f32
    %192 = vector.broadcast %cst_204 : f32 to vector<8x64xf32>
    %193 = arith.maximumf %191, %192 : vector<8x64xf32>
    %c0_205 = arith.constant 0 : index
    %c0_206 = arith.constant 0 : index
    %194 = vector.load %arg16[%c0_205, %c0_206] : memref<1x1024xf32, #tpu.memory_space<vmem>>, vector<1x1024xf32>
    %c0_207 = arith.constant 0 : index
    %c0_208 = arith.constant 0 : index
    %c0_209 = arith.constant 0 : index
    %195 = vector.load %arg14[%c0_207, %c0_208, %c0_209] : memref<4x2x8xf32, #tpu.memory_space<vmem>>, vector<1x2x8xf32>
    %196 = vector.shape_cast %195 : vector<1x2x8xf32> to vector<2x8xf32>
    %cst_210 = arith.constant dense<0.000000e+00> : vector<2x64xf32>
    %197 = tpu.matmul %196, %193, %cst_210 {dimension_numbers = #tpu.dot_dimension_numbers<[1], [0], [0], [1], [0, 0, 1, 1], [], []>} : vector<2x8xf32>, vector<8x64xf32>, vector<2x64xf32> -> vector<2x64xf32>
    %c0_211 = arith.constant 0 : index
    %c0_212 = arith.constant 0 : index
    %c0_213 = arith.constant 0 : index
    %198 = vector.load %arg15[%c0_211, %c0_212, %c0_213] : memref<4x64x1024xf32, #tpu.memory_space<vmem>>, vector<1x64x1024xf32>
    %199 = vector.shape_cast %198 : vector<1x64x1024xf32> to vector<64x1024xf32>
    %cst_214 = arith.constant dense<0.000000e+00> : vector<2x1024xf32>
    %200 = tpu.matmul %197, %199, %cst_214 {dimension_numbers = #tpu.dot_dimension_numbers<[1], [0], [0], [1], [0, 0, 1, 1], [], []>} : vector<2x64xf32>, vector<64x1024xf32>, vector<2x1024xf32> -> vector<2x1024xf32>
    %201 = vector.broadcast %194 : vector<1x1024xf32> to vector<2x1024xf32>
    %202 = arith.addf %201, %200 : vector<2x1024xf32>
    %c1_215 = arith.constant 1 : index
    %c0_216 = arith.constant 0 : index
    %c0_217 = arith.constant 0 : index
    %203 = vector.load %arg14[%c1_215, %c0_216, %c0_217] : memref<4x2x8xf32, #tpu.memory_space<vmem>>, vector<1x2x8xf32>
    %204 = vector.shape_cast %203 : vector<1x2x8xf32> to vector<2x8xf32>
    %cst_218 = arith.constant dense<0.000000e+00> : vector<2x64xf32>
    %205 = tpu.matmul %204, %193, %cst_218 {dimension_numbers = #tpu.dot_dimension_numbers<[1], [0], [0], [1], [0, 0, 1, 1], [], []>} : vector<2x8xf32>, vector<8x64xf32>, vector<2x64xf32> -> vector<2x64xf32>
    %c1_219 = arith.constant 1 : index
    %c0_220 = arith.constant 0 : index
    %c0_221 = arith.constant 0 : index
    %206 = vector.load %arg15[%c1_219, %c0_220, %c0_221] : memref<4x64x1024xf32, #tpu.memory_space<vmem>>, vector<1x64x1024xf32>
    %207 = vector.shape_cast %206 : vector<1x64x1024xf32> to vector<64x1024xf32>
    %cst_222 = arith.constant dense<0.000000e+00> : vector<2x1024xf32>
    %208 = tpu.matmul %205, %207, %cst_222 {dimension_numbers = #tpu.dot_dimension_numbers<[1], [0], [0], [1], [0, 0, 1, 1], [], []>} : vector<2x64xf32>, vector<64x1024xf32>, vector<2x1024xf32> -> vector<2x1024xf32>
    %209 = arith.addf %202, %208 : vector<2x1024xf32>
    %c2_223 = arith.constant 2 : index
    %c0_224 = arith.constant 0 : index
    %c0_225 = arith.constant 0 : index
    %210 = vector.load %arg14[%c2_223, %c0_224, %c0_225] : memref<4x2x8xf32, #tpu.memory_space<vmem>>, vector<1x2x8xf32>
    %211 = vector.shape_cast %210 : vector<1x2x8xf32> to vector<2x8xf32>
    %cst_226 = arith.constant dense<0.000000e+00> : vector<2x64xf32>
    %212 = tpu.matmul %211, %193, %cst_226 {dimension_numbers = #tpu.dot_dimension_numbers<[1], [0], [0], [1], [0, 0, 1, 1], [], []>} : vector<2x8xf32>, vector<8x64xf32>, vector<2x64xf32> -> vector<2x64xf32>
    %c2_227 = arith.constant 2 : index
    %c0_228 = arith.constant 0 : index
    %c0_229 = arith.constant 0 : index
    %213 = vector.load %arg15[%c2_227, %c0_228, %c0_229] : memref<4x64x1024xf32, #tpu.memory_space<vmem>>, vector<1x64x1024xf32>
    %214 = vector.shape_cast %213 : vector<1x64x1024xf32> to vector<64x1024xf32>
    %cst_230 = arith.constant dense<0.000000e+00> : vector<2x1024xf32>
    %215 = tpu.matmul %212, %214, %cst_230 {dimension_numbers = #tpu.dot_dimension_numbers<[1], [0], [0], [1], [0, 0, 1, 1], [], []>} : vector<2x64xf32>, vector<64x1024xf32>, vector<2x1024xf32> -> vector<2x1024xf32>
    %216 = arith.addf %209, %215 : vector<2x1024xf32>
    %c3_231 = arith.constant 3 : index
    %c0_232 = arith.constant 0 : index
    %c0_233 = arith.constant 0 : index
    %217 = vector.load %arg14[%c3_231, %c0_232, %c0_233] : memref<4x2x8xf32, #tpu.memory_space<vmem>>, vector<1x2x8xf32>
    %218 = vector.shape_cast %217 : vector<1x2x8xf32> to vector<2x8xf32>
    %cst_234 = arith.constant dense<0.000000e+00> : vector<2x64xf32>
    %219 = tpu.matmul %218, %193, %cst_234 {dimension_numbers = #tpu.dot_dimension_numbers<[1], [0], [0], [1], [0, 0, 1, 1], [], []>} : vector<2x8xf32>, vector<8x64xf32>, vector<2x64xf32> -> vector<2x64xf32>
    %c3_235 = arith.constant 3 : index
    %c0_236 = arith.constant 0 : index
    %c0_237 = arith.constant 0 : index
    %220 = vector.load %arg15[%c3_235, %c0_236, %c0_237] : memref<4x64x1024xf32, #tpu.memory_space<vmem>>, vector<1x64x1024xf32>
    %221 = vector.shape_cast %220 : vector<1x64x1024xf32> to vector<64x1024xf32>
    %cst_238 = arith.constant dense<0.000000e+00> : vector<2x1024xf32>
    %222 = tpu.matmul %219, %221, %cst_238 {dimension_numbers = #tpu.dot_dimension_numbers<[1], [0], [0], [1], [0, 0, 1, 1], [], []>} : vector<2x64xf32>, vector<64x1024xf32>, vector<2x1024xf32> -> vector<2x1024xf32>
    %223 = arith.addf %216, %222 : vector<2x1024xf32>
    %cst_239 = arith.constant 0.000000e+00 : f32
    %224 = vector.broadcast %cst_239 : f32 to vector<2x1024xf32>
    %225 = arith.maximumf %223, %224 : vector<2x1024xf32>
    %c0_240 = arith.constant 0 : index
    %c0_241 = arith.constant 0 : index
    %226 = vector.load %arg17[%c0_240, %c0_241] : memref<1024x512xf32, #tpu.memory_space<vmem>>, vector<1024x512xf32>
    %cst_242 = arith.constant dense<0.000000e+00> : vector<2x512xf32>
    %227 = tpu.matmul %225, %226, %cst_242 {dimension_numbers = #tpu.dot_dimension_numbers<[1], [0], [0], [1], [0, 0, 1, 1], [], []>} : vector<2x1024xf32>, vector<1024x512xf32>, vector<2x512xf32> -> vector<2x512xf32>
    %c0_243 = arith.constant 0 : index
    %c0_244 = arith.constant 0 : index
    %228 = vector.load %arg18[%c0_243, %c0_244] : memref<1x512xf32, #tpu.memory_space<vmem>>, vector<1x512xf32>
    %229 = vector.broadcast %228 : vector<1x512xf32> to vector<2x512xf32>
    %230 = arith.addf %227, %229 : vector<2x512xf32>
    %cst_245 = arith.constant 0.000000e+00 : f32
    %231 = vector.broadcast %cst_245 : f32 to vector<2x512xf32>
    %232 = arith.maximumf %230, %231 : vector<2x512xf32>
    %c0_246 = arith.constant 0 : index
    %c0_247 = arith.constant 0 : index
    %233 = vector.load %arg19[%c0_246, %c0_247] : memref<512x5xf32, #tpu.memory_space<vmem>>, vector<512x5xf32>
    %cst_248 = arith.constant dense<0.000000e+00> : vector<2x5xf32>
    %234 = tpu.matmul %232, %233, %cst_248 {dimension_numbers = #tpu.dot_dimension_numbers<[1], [0], [0], [1], [0, 0, 1, 1], [], []>} : vector<2x512xf32>, vector<512x5xf32>, vector<2x5xf32> -> vector<2x5xf32>
    %c0_249 = arith.constant 0 : index
    %c0_250 = arith.constant 0 : index
    %235 = vector.load %arg20[%c0_249, %c0_250] : memref<1x5xf32, #tpu.memory_space<vmem>>, vector<1x5xf32>
    %236 = vector.broadcast %235 : vector<1x5xf32> to vector<2x5xf32>
    %237 = arith.addf %234, %236 : vector<2x5xf32>
    %c0_251 = arith.constant 0 : index
    %c0_252 = arith.constant 0 : index
    %238 = vector.load %arg21[%c0_251, %c0_252] : memref<2x5xf32, #tpu.memory_space<vmem>>, vector<2x5xf32>
    tpu.vector_store %arg21[%c0_251, %c0_252], %237 {strides = array<i32>} : memref<2x5xf32, #tpu.memory_space<vmem>>, vector<2x5xf32>,
    return
  }
}

</mosaic_0001>

<bundles_post_ra>
// kernel: resnet_forward.1
= control target key start
LH: loop header
LB: loop body
LE: loop exit
PB: predicated region body
PF: predicated region fallthrough
CT: control target
= control target key end

     0   :  { %s11996_s0 = inlined_call_operand.vmem [shape: f32[32,64], index: 0, kind: input, shape index: {}]   ;;  %s11997_s1 = inlined_call_operand.hbm [shape: f32[2,32,32], index: 1, kind: input, shape index: {}]   ;;  %s11998_s2 = inlined_call_operand.hbm [shape: f32[3,64,128], index: 2, kind: input, shape index: {}]   ;;  %s11999_s3 = inlined_call_operand.hbm [shape: f32[1,128], index: 3, kind: input, shape index: {}]   ;;  %s12000_s4 = inlined_call_operand.hbm [shape: f32[2,16,32], index: 4, kind: input, shape index: {}]   ;;  %s12001_s5 = inlined_call_operand.vmem [shape: f32[2,128,64], index: 5, kind: input, shape index: {}]   ;;  %s12002_s6 = inlined_call_operand.hbm [shape: f32[2,16,16], index: 6, kind: input, shape index: {}]   ;;  %s12003_s7 = inlined_call_operand.hbm [shape: f32[6,3,64,64], index: 7, kind: input, shape index: {}]   ;;  %s12004_s8 = inlined_call_operand.hbm [shape: f32[6,1,64], index: 8, kind: input, shape index: {}]   ;;  %s12005_s9 = inlined_call_operand.hbm [shape: f32[2,8,16], index: 9, kind: input, shape index: {}]   ;;  %s12006_s10 = inlined_call_operand.vmem [shape: f32[2,64,32], index: 10, kind: input, shape index: {}]   ;;  %s12007_s11 = inlined_call_operand.hbm [shape: f32[2,8,8], index: 11, kind: input, shape index: {}]   ;;  %s12008_s12 = inlined_call_operand.hbm [shape: f32[3,32,64], index: 12, kind: input, shape index: {}]   ;;  %s12009_s13 = inlined_call_operand.hbm [shape: f32[1,64], index: 13, kind: input, shape index: {}]   ;;  %s12010_s14 = inlined_call_operand.hbm [shape: f32[4,2,8], index: 14, kind: input, shape index: {}]   ;;  %s12011_s15 = inlined_call_operand.hbm [shape: f32[4,64,1024], index: 15, kind: input, shape index: {}]   ;;  %s12012_s16 = inlined_call_operand.hbm [shape: f32[1,1024], index: 16, kind: input, shape index: {}]   ;;  %s12013_s17 = inlined_call_operand.hbm [shape: f32[1024,512], index: 17, kind: input, shape index: {}]   ;;  %s12014_s18 = inlined_call_operand.hbm [shape: f32[1,512], index: 18, kind: input, shape index: {}]   ;;  %s12015_s19 = inlined_call_operand.vmem [shape: f32[512,5], index: 19, kind: input, shape index: {}]   ;;  %s12016_s20 = inlined_call_operand.hbm [shape: f32[1,5], index: 20, kind: input, shape index: {}]   ;;  %s12017_s21 = inlined_call_operand.hbm [shape: f32[2,5], index: 21, kind: output, shape index: {}]  }
   0x1   :  { %12026 = sst [smem:[#allocation40_spill]] %s11996_s0 }
   0x2   :  { %12027 = sst [smem:[#allocation41_spill]] %s11997_s1 }
   0x3   :  { %12028 = sst [smem:[#allocation42_spill]] %s11998_s2 }
   0x4   :  { %12029 = sst [smem:[#allocation43_spill]] %s11999_s3 }
   0x5   :  { %12030 = sst [smem:[#allocation44_spill]] %s12000_s4 }
   0x6   :  { %12031 = sst [smem:[#allocation45_spill]] %s12001_s5 }
   0x7   :  { %12032 = sst [smem:[#allocation46_spill]] %s12015_s19 }
   0x8   :  { %12033 = sst [smem:[#allocation47_spill]] %s12017_s21 }
   0x9   :  { %26 = vsyncpa [#allocation3], 0 }
   0xa   :  { %27 = vsyncpa [#allocation6], 0 }
   0xb   :  { %28 = vsyncpa [#allocation9], 0 }
   0xc   :  { %29 = vsyncpa [#allocation12], 0 }
   0xd   :  { %30 = vsyncpa [#allocation15], 0 }
   0xe   :  { %31 = vsyncpa [#allocation18], 0 }
   0xf   :  { %32 = vsyncpa [#allocation21], 0 }
  0x10   :  { %33 = vsyncpa [#allocation24], 0 }
  0x11   :  { %34 = vsyncpa [#allocation27], 0 }
  0x12   :  { %35 = vsyncpa [#allocation4], 0  ;;  %s10878_s2 = smov [#allocation5]   ;;  %s10879_s26 = smov [#allocation8]  }
  0x13   :  { %s55_s25 = sshll.u32 %s10878_s2, 4  ;;  %s77_s27 = sshll.u32 %s10879_s26, 4  ;;  %s56_s25 = int_to_ptr.vmem [resolvable:$true] %s55_s25  ;;  %s11018_s27 = int_to_ptr.vmem [resolvable:$true] %s77_s27 }
  0x14   :  { %s12034_s29 = sld [smem:[#allocation42_spill]] }
  0x1a   :  { %s10462_s0 = scalar_lea.hbm %s12034_s29, 3072 }
  0x1b   :  { %p10463_p0 = scmp.ne.s32.totalorder %s12034_s29, %s10462_s0  ;;  %p10466_p1 = scmp.lt.u32.totalorder %s10462_s0, %s12034_s29 }
  0x1d   :  { %p10468_p2 = pnand %p10466_p1, %p10463_p0 }
  0x1f   :  { %10471 = shalt.err (!%p10468_p2)
}
  0x20   :  { %s10472_s23 = scalar_lea.vmem %s56_s25, 3072  ;;  %p10477_p4 = scmp.lt.s32.totalorder %s56_s25, %s56_s25 }
  0x21   :  { %p10473_p3 = scmp.ne.s32.totalorder %s56_s25, %s10472_s23  ;;  %p10478_p5 = scmp.lt.s32.totalorder %s10472_s23, %s10472_s23 }
  0x23   :  { %p10479_p6 = por %p10478_p5, %p10477_p4 }
  0x25   :  { %p10480_p7 = pnand %p10479_p6, %p10473_p3 }
  0x27   :  { %10483 = shalt.err (!%p10480_p7)
}
  0x28   :  { %s10880_s1 = smov 128   ;;  %s10881_s24 = smov 8  }
  0x29   :  { %61 = dma.hbm_to_vmem [thread:$0]  %s12034_s29, 3072, %s56_s25, [#allocation6], %s10880_s1, %s10880_s1, %s10881_s24  }
  0x2a   :  { %s12035_s0 = sld [smem:[#allocation44_spill]] }
  0x30   :  { %s10484_s4 = scalar_lea.hbm %s12035_s0, 512 }
  0x31   :  { %p10485_p8 = scmp.ne.s32.totalorder %s12035_s0, %s10484_s4  ;;  %p10488_p9 = scmp.lt.u32.totalorder %s10484_s4, %s12035_s0 }
  0x33   :  { %p10490_p10 = pnand %p10488_p9, %p10485_p8 }
  0x35   :  { %10493 = shalt.err (!%p10490_p10)
}
  0x36   :  { %s10494_s21 = scalar_lea.vmem %s11018_s27, 512  ;;  %p10499_p12 = scmp.lt.s32.totalorder %s11018_s27, %s11018_s27 }
  0x37   :  { %p10495_p11 = scmp.ne.s32.totalorder %s11018_s27, %s10494_s21  ;;  %p10500_p13 = scmp.lt.s32.totalorder %s10494_s21, %s10494_s21 }
  0x39   :  { %p10501_p0 = por %p10500_p13, %p10499_p12 }
  0x3b   :  { %p10502_p1 = pnand %p10501_p0, %p10495_p11 }
  0x3d   :  { %10505 = shalt.err (!%p10502_p1)
}
  0x3e   :  { %83 = dma.hbm_to_vmem [thread:$0]  %s12035_s0, 512, %s11018_s27, [#allocation9], %s10880_s1, %s10880_s1, %s10881_s24  }
  0x3f   :  { %s10882_s2 = smov [#allocation11]   ;;  %s10883_s3 = smov [#allocation14]  }
  0x40   :  { %s103_s26 = sshll.u32 %s10882_s2, 4  ;;  %s127_s28 = sshll.u32 %s10883_s3, 4  ;;  %s104_s26 = int_to_ptr.vmem [resolvable:$true] %s103_s26  ;;  %s11055_s28 = int_to_ptr.vmem [resolvable:$true] %s127_s28 }
  0x41   :  { %s10506_s30 = scalar_lea.hbm %s12003_s7, 18432 }
  0x42   :  { %p10507_p2 = scmp.ne.s32.totalorder %s12003_s7, %s10506_s30  ;;  %p10510_p3 = scmp.lt.u32.totalorder %s10506_s30, %s12003_s7 }
  0x44   :  { %p10512_p4 = pnand %p10510_p3, %p10507_p2 }
  0x46   :  { %10515 = shalt.err (!%p10512_p4)
}
  0x47   :  { %s10516_s27 = scalar_lea.vmem %s104_s26, 18432  ;;  %p10521_p6 = scmp.lt.s32.totalorder %s104_s26, %s104_s26 }
  0x48   :  { %p10517_p5 = scmp.ne.s32.totalorder %s104_s26, %s10516_s27  ;;  %p10522_p7 = scmp.lt.s32.totalorder %s10516_s27, %s10516_s27 }
  0x4a   :  { %p10523_p8 = por %p10522_p7, %p10521_p6 }
  0x4c   :  { %p10524_p9 = pnand %p10523_p8, %p10517_p5 }
  0x4e   :  { %10527 = shalt.err (!%p10524_p9)
}
  0x4f   :  { %109 = dma.hbm_to_vmem [thread:$0]  %s12003_s7, 18432, %s104_s26, [#allocation12], %s10880_s1, %s10880_s1, %s10881_s24  }
  0x50   :  { %s10528_s19 = scalar_lea.hbm %s12005_s9, 256 }
  0x51   :  { %p10529_p10 = scmp.ne.s32.totalorder %s12005_s9, %s10528_s19  ;;  %p10532_p11 = scmp.lt.u32.totalorder %s10528_s19, %s12005_s9 }
  0x53   :  { %p10534_p12 = pnand %p10532_p11, %p10529_p10 }
  0x55   :  { %10537 = shalt.err (!%p10534_p12)
}
  0x56   :  { %s10538_s5 = scalar_lea.vmem %s11055_s28, 256  ;;  %p10543_p0 = scmp.lt.s32.totalorder %s11055_s28, %s11055_s28 }
  0x57   :  { %p10539_p13 = scmp.ne.s32.totalorder %s11055_s28, %s10538_s5  ;;  %p10544_p1 = scmp.lt.s32.totalorder %s10538_s5, %s10538_s5 }
  0x59   :  { %p10545_p2 = por %p10544_p1, %p10543_p0 }
  0x5b   :  { %p10546_p3 = pnand %p10545_p2, %p10539_p13 }
  0x5d   :  { %10549 = shalt.err (!%p10546_p3)
}
  0x5e   :  { %133 = dma.hbm_to_vmem [thread:$0]  %s12005_s9, 256, %s11055_s28, [#allocation15], %s10880_s1, %s10880_s1, %s10881_s24  }
  0x5f   :  { %s10884_s22 = smov [#allocation17]   ;;  %s10885_s27 = smov [#allocation20]  }
  0x60   :  { %s153_s23 = sshll.u32 %s10884_s22, 4  ;;  %s175_s0 = sshll.u32 %s10885_s27, 4  ;;  %s154_s23 = int_to_ptr.vmem [resolvable:$true] %s153_s23  ;;  %s11092_s0 = int_to_ptr.vmem [resolvable:$true] %s175_s0 }
  0x61   :  { %s10550_s2 = scalar_lea.hbm %s12008_s12, 1536 }
  0x62   :  { %p10551_p4 = scmp.ne.s32.totalorder %s12008_s12, %s10550_s2  ;;  %p10554_p5 = scmp.lt.u32.totalorder %s10550_s2, %s12008_s12 }
  0x64   :  { %p10556_p6 = pnand %p10554_p5, %p10551_p4 }
  0x66   :  { %10559 = shalt.err (!%p10556_p6)
}
  0x67   :  { %s10560_s9 = scalar_lea.vmem %s154_s23, 1536  ;;  %p10565_p8 = scmp.lt.s32.totalorder %s154_s23, %s154_s23 }
  0x68   :  { %p10561_p7 = scmp.ne.s32.totalorder %s154_s23, %s10560_s9  ;;  %p10566_p9 = scmp.lt.s32.totalorder %s10560_s9, %s10560_s9 }
  0x6a   :  { %p10567_p10 = por %p10566_p9, %p10565_p8 }
  0x6c   :  { %p10568_p11 = pnand %p10567_p10, %p10561_p7 }
  0x6e   :  { %10571 = shalt.err (!%p10568_p11)
}
  0x6f   :  { %159 = dma.hbm_to_vmem [thread:$0]  %s12008_s12, 1536, %s154_s23, [#allocation18], %s10880_s1, %s10880_s1, %s10881_s24  }
  0x70   :  { %s10572_s26 = scalar_lea.hbm %s12010_s14, 128 }
  0x71   :  { %p10573_p12 = scmp.ne.s32.totalorder %s12010_s14, %s10572_s26  ;;  %p10576_p13 = scmp.lt.u32.totalorder %s10572_s26, %s12010_s14 }
  0x73   :  { %p10578_p0 = pnand %p10576_p13, %p10573_p12 }
  0x75   :  { %10581 = shalt.err (!%p10578_p0)
}
  0x76   :  { %s10582_s2 = scalar_lea.vmem %s11092_s0, 128  ;;  %p10587_p2 = scmp.lt.s32.totalorder %s11092_s0, %s11092_s0 }
  0x77   :  { %p10583_p1 = scmp.ne.s32.totalorder %s11092_s0, %s10582_s2  ;;  %p10588_p3 = scmp.lt.s32.totalorder %s10582_s2, %s10582_s2 }
  0x79   :  { %p10589_p4 = por %p10588_p3, %p10587_p2 }
  0x7b   :  { %p10590_p5 = pnand %p10589_p4, %p10583_p1 }
  0x7d   :  { %10593 = shalt.err (!%p10590_p5)
}
  0x7e   :  { %s10886_s12 = smov 32   ;;  %s10887_s23 = smov 2  }
  0x7f   :  { %181 = dma.hbm_to_vmem [thread:$0]  %s12010_s14, 128, %s11092_s0, [#allocation21], %s10886_s12, %s10886_s12, %s10887_s23  }
  0x80   :  { %s10888_s4 = smov [#allocation23]   ;;  %s10889_s9 = smov [#allocation26]  }
  0x81   :  { %s200_s21 = sshll.u32 %s10888_s4, 4  ;;  %s222_s28 = sshll.u32 %s10889_s9, 4  ;;  %s201_s21 = int_to_ptr.vmem [resolvable:$true] %s200_s21  ;;  %s223_s28 = int_to_ptr.vmem [resolvable:$true] %s222_s28 }
  0x82   :  { %s10594_s7 = scalar_lea.hbm %s12012_s16, 128 }
  0x83   :  { %p10595_p6 = scmp.ne.s32.totalorder %s12012_s16, %s10594_s7  ;;  %p10598_p7 = scmp.lt.u32.totalorder %s10594_s7, %s12012_s16 }
  0x85   :  { %p10600_p8 = pnand %p10598_p7, %p10595_p6 }
  0x87   :  { %10603 = shalt.err (!%p10600_p8)
}
  0x88   :  { %s10604_s14 = scalar_lea.vmem %s201_s21, 128  ;;  %p10609_p10 = scmp.lt.s32.totalorder %s201_s21, %s201_s21 }
  0x89   :  { %p10605_p9 = scmp.ne.s32.totalorder %s201_s21, %s10604_s14  ;;  %p10610_p11 = scmp.lt.s32.totalorder %s10604_s14, %s10604_s14 }
  0x8b   :  { %p10611_p12 = por %p10610_p11, %p10609_p10 }
  0x8d   :  { %p10612_p13 = pnand %p10611_p12, %p10605_p9 }
  0x8f   :  { %10615 = shalt.err (!%p10612_p13)
}
  0x90   :  { %203 = dma.hbm_to_vmem [thread:$0]  %s12012_s16, 128, %s201_s21, [#allocation24]  }
  0x91   :  { %s10616_s19 = scalar_lea.hbm %s12014_s18, 64 }
  0x92   :  { %p10617_p0 = scmp.ne.s32.totalorder %s12014_s18, %s10616_s19  ;;  %p10620_p1 = scmp.lt.u32.totalorder %s10616_s19, %s12014_s18 }
  0x94   :  { %p10622_p2 = pnand %p10620_p1, %p10617_p0 }
  0x96   :  { %10625 = shalt.err (!%p10622_p2)
}
  0x97   :  { %s10626_s5 = scalar_lea.vmem %s223_s28, 64  ;;  %p10631_p4 = scmp.lt.s32.totalorder %s223_s28, %s223_s28 }
  0x98   :  { %p10627_p3 = scmp.ne.s32.totalorder %s223_s28, %s10626_s5  ;;  %p10632_p5 = scmp.lt.s32.totalorder %s10626_s5, %s10626_s5 }
  0x9a   :  { %p10633_p6 = por %p10632_p5, %p10631_p4 }
  0x9c   :  { %p10634_p7 = pnand %p10633_p6, %p10627_p3 }
  0x9e   :  { %10637 = shalt.err (!%p10634_p7)
}
  0x9f   :  { %225 = dma.hbm_to_vmem [thread:$0]  %s12014_s18, 64, %s223_s28, [#allocation27]  }
  0xa0   :  { %s10890_s7 = smov [#allocation2]   ;;  %s10891_s22 = smov [#allocation7]  }
  0xa1   :  { %s43_s26 = sshll.u32 %s10890_s7, 4  ;;  %s68_s27 = sshll.u32 %s10891_s22, 4  ;;  %s44_s26 = int_to_ptr.vmem [resolvable:$true] %s43_s26  ;;  %s69_s27 = int_to_ptr.vmem [resolvable:$true] %s68_s27 }
  0xa2   :  { %s12036_s0 = sld [smem:[#allocation41_spill]] }
  0xa8   :  { %s10638_s29 = scalar_lea.hbm %s12036_s0, 1024 }
  0xa9   :  { %p10639_p8 = scmp.ne.s32.totalorder %s12036_s0, %s10638_s29  ;;  %p10642_p9 = scmp.lt.u32.totalorder %s10638_s29, %s12036_s0 }
  0xab   :  { %p10644_p10 = pnand %p10642_p9, %p10639_p8 }
  0xad   :  { %10647 = shalt.err (!%p10644_p10)
}
  0xae   :  { %s10648_s18 = scalar_lea.vmem %s44_s26, 1024  ;;  %p10653_p12 = scmp.lt.s32.totalorder %s44_s26, %s44_s26 }
  0xaf   :  { %p10649_p11 = scmp.ne.s32.totalorder %s44_s26, %s10648_s18  ;;  %p10654_p13 = scmp.lt.s32.totalorder %s10648_s18, %s10648_s18 }
  0xb1   :  { %p10655_p0 = por %p10654_p13, %p10653_p12 }
  0xb3   :  { %p10656_p1 = pnand %p10655_p0, %p10649_p11 }
  0xb5   :  { %10659 = shalt.err (!%p10656_p1)
}
  0xb6   :  { %49 = dma.hbm_to_vmem [thread:$0]  %s12036_s0, 1024, %s44_s26, [#allocation3], %s10880_s1, %s10880_s1, %s10881_s24  }
  0xb7   :  { %s12037_s5 = sld [smem:[#allocation43_spill]] }
  0xbd   :  { %s10660_s16 = scalar_lea.hbm %s12037_s5, 16 }
  0xbe   :  { %p10661_p2 = scmp.ne.s32.totalorder %s12037_s5, %s10660_s16  ;;  %p10664_p3 = scmp.lt.u32.totalorder %s10660_s16, %s12037_s5 }
  0xc0   :  { %p10666_p4 = pnand %p10664_p3, %p10661_p2 }
  0xc2   :  { %10669 = shalt.err (!%p10666_p4)
}
  0xc3   :  { %s10670_s14 = scalar_lea.vmem %s69_s27, 16  ;;  %s10674_s29 = scalar_lea.vmem %s69_s27, 32 }
  0xc4   :  { %p10671_p5 = scmp.ne.s32.totalorder %s69_s27, %s10670_s14  ;;  %p10675_p6 = scmp.lt.s32.totalorder %s69_s27, %s69_s27 }
  0xc5   :  { %p10676_p7 = scmp.lt.s32.totalorder %s10674_s29, %s10670_s14 }
  0xc7   :  { %p10677_p8 = por %p10676_p7, %p10675_p6 }
  0xc9   :  { %p10678_p9 = pnand %p10677_p8, %p10671_p5 }
  0xcb   :  { %10681 = shalt.err (!%p10678_p9)
}
  0xcc   :  { %71 = dma.hbm_to_vmem [thread:$0]  %s12037_s5, 16, %s69_s27, [#allocation6]  }
  0xcd   :  { %s10892_s2 = smov [#allocation10]   ;;  %s10893_s19 = smov [#allocation13]  }
  0xce   :  { %s91_s23 = sshll.u32 %s10892_s2, 4  ;;  %s115_s3 = sshll.u32 %s10893_s19, 4  ;;  %s92_s23 = int_to_ptr.vmem [resolvable:$true] %s91_s23  ;;  %s11179_s3 = int_to_ptr.vmem [resolvable:$true] %s115_s3 }
  0xcf   :  { %s10682_s4 = scalar_lea.hbm %s12002_s6, 512 }
  0xd0   :  { %p10683_p10 = scmp.ne.s32.totalorder %s12002_s6, %s10682_s4  ;;  %p10686_p11 = scmp.lt.u32.totalorder %s10682_s4, %s12002_s6 }
  0xd2   :  { %p10688_p12 = pnand %p10686_p11, %p10683_p10 }
  0xd4   :  { %10691 = shalt.err (!%p10688_p12)
}
  0xd5   :  { %s10692_s27 = scalar_lea.vmem %s92_s23, 512  ;;  %p10697_p0 = scmp.lt.s32.totalorder %s92_s23, %s92_s23 }
  0xd6   :  { %p10693_p13 = scmp.ne.s32.totalorder %s92_s23, %s10692_s27  ;;  %p10698_p1 = scmp.lt.s32.totalorder %s10692_s27, %s10692_s27 }
  0xd8   :  { %p10699_p2 = por %p10698_p1, %p10697_p0 }
  0xda   :  { %p10700_p3 = pnand %p10699_p2, %p10693_p13 }
  0xdc   :  { %10703 = shalt.err (!%p10700_p3)
}
  0xdd   :  { %97 = dma.hbm_to_vmem [thread:$0]  %s12002_s6, 512, %s92_s23, [#allocation9], %s10880_s1, %s10880_s1, %s10881_s24  }
  0xde   :  { %s10704_s14 = scalar_lea.hbm %s12004_s8, 96 }
  0xdf   :  { %p10705_p4 = scmp.ne.s32.totalorder %s12004_s8, %s10704_s14  ;;  %p10708_p5 = scmp.lt.u32.totalorder %s10704_s14, %s12004_s8 }
  0xe1   :  { %p10710_p6 = pnand %p10708_p5, %p10705_p4 }
  0xe3   :  { %10713 = shalt.err (!%p10710_p6)
}
  0xe4   :  { %s10714_s19 = scalar_lea.vmem %s11179_s3, 96  ;;  %p10719_p8 = scmp.lt.s32.totalorder %s11179_s3, %s11179_s3 }
  0xe5   :  { %p10715_p7 = scmp.ne.s32.totalorder %s11179_s3, %s10714_s19  ;;  %p10720_p9 = scmp.lt.s32.totalorder %s10714_s19, %s10714_s19 }
  0xe7   :  { %p10721_p10 = por %p10720_p9, %p10719_p8 }
  0xe9   :  { %p10722_p11 = pnand %p10721_p10, %p10715_p7 }
  0xeb   :  { %10725 = shalt.err (!%p10722_p11)
}
  0xec   :  { %s10894_s6 = smov 16   ;;  %s10895_s23 = smov 1  }
  0xed   :  { %121 = dma.hbm_to_vmem [thread:$0]  %s12004_s8, 96, %s11179_s3, [#allocation12], %s10894_s6, %s10894_s6, %s10895_s23  }
  0xee   :  { %s10896_s4 = smov [#allocation16]   ;;  %s10897_s30 = smov [#allocation19]  }
  0xef   :  { %s141_s9 = sshll.u32 %s10896_s4, 4  ;;  %s166_s16 = sshll.u32 %s10897_s30, 4  ;;  %s142_s9 = int_to_ptr.vmem [resolvable:$true] %s141_s9  ;;  %s167_s16 = int_to_ptr.vmem [resolvable:$true] %s166_s16 }
  0xf0   :  { %s10726_s5 = scalar_lea.hbm %s12007_s11, 256 }
  0xf1   :  { %p10727_p12 = scmp.ne.s32.totalorder %s12007_s11, %s10726_s5  ;;  %p10730_p13 = scmp.lt.u32.totalorder %s10726_s5, %s12007_s11 }
  0xf3   :  { %p10732_p0 = pnand %p10730_p13, %p10727_p12 }
  0xf5   :  { %10735 = shalt.err (!%p10732_p0)
}
  0xf6   :  { %s10736_s8 = scalar_lea.vmem %s142_s9, 256  ;;  %p10741_p2 = scmp.lt.s32.totalorder %s142_s9, %s142_s9 }
  0xf7   :  { %p10737_p1 = scmp.ne.s32.totalorder %s142_s9, %s10736_s8  ;;  %p10742_p3 = scmp.lt.s32.totalorder %s10736_s8, %s10736_s8 }
  0xf9   :  { %p10743_p4 = por %p10742_p3, %p10741_p2 }
  0xfb   :  { %p10744_p5 = pnand %p10743_p4, %p10737_p1 }
  0xfd   :  { %10747 = shalt.err (!%p10744_p5)
}
  0xfe   :  { %147 = dma.hbm_to_vmem [thread:$0]  %s12007_s11, 256, %s142_s9, [#allocation15], %s10880_s1, %s10880_s1, %s10881_s24  }
  0xff   :  { %s10748_s2 = scalar_lea.hbm %s12009_s13, 16 }
 0x100   :  { %p10749_p6 = scmp.ne.s32.totalorder %s12009_s13, %s10748_s2  ;;  %p10752_p7 = scmp.lt.u32.totalorder %s10748_s2, %s12009_s13 }
 0x102   :  { %p10754_p8 = pnand %p10752_p7, %p10749_p6 }
 0x104   :  { %10757 = shalt.err (!%p10754_p8)
}
 0x105   :  { %s10758_s28 = scalar_lea.vmem %s167_s16, 16  ;;  %s10762_s4 = scalar_lea.vmem %s167_s16, 32 }
 0x106   :  { %p10759_p9 = scmp.ne.s32.totalorder %s167_s16, %s10758_s28  ;;  %p10763_p10 = scmp.lt.s32.totalorder %s167_s16, %s167_s16 }
 0x107   :  { %p10764_p11 = scmp.lt.s32.totalorder %s10762_s4, %s10758_s28 }
 0x109   :  { %p10765_p12 = por %p10764_p11, %p10763_p10 }
 0x10b   :  { %p10766_p13 = pnand %p10765_p12, %p10759_p9 }
 0x10d   :  { %10769 = shalt.err (!%p10766_p13)
}
 0x10e   :  { %169 = dma.hbm_to_vmem [thread:$0]  %s12009_s13, 16, %s167_s16, [#allocation18]  }
 0x10f   :  { %s10898_s24 = smov [#allocation22]   ;;  %s10770_s27 = scalar_lea.hbm %s12011_s15, 32768 }
 0x110   :  { %s187_s9 = sshll.u32 %s10898_s24, 4  ;;  %p10771_p0 = scmp.ne.s32.totalorder %s12011_s15, %s10770_s27  ;;  %s188_s9 = int_to_ptr.vmem [resolvable:$true] %s187_s9 }
 0x111   :  { %p10774_p1 = scmp.lt.u32.totalorder %s10770_s27, %s12011_s15 }
 0x113   :  { %p10776_p2 = pnand %p10774_p1, %p10771_p0 }
 0x115   :  { %10779 = shalt.err (!%p10776_p2)
}
 0x116   :  { %s10780_s14 = scalar_lea.vmem %s188_s9, 32768  ;;  %p10785_p4 = scmp.lt.s32.totalorder %s188_s9, %s188_s9 }
 0x117   :  { %p10781_p3 = scmp.ne.s32.totalorder %s188_s9, %s10780_s14  ;;  %p10786_p5 = scmp.lt.s32.totalorder %s10780_s14, %s10780_s14 }
 0x119   :  { %p10787_p6 = por %p10786_p5, %p10785_p4 }
 0x11b   :  { %p10788_p7 = pnand %p10787_p6, %p10781_p3 }
 0x11d   :  { %10791 = shalt.err (!%p10788_p7)
}
 0x11e   :  { %s10899_s13 = smov 1024   ;;  %s10900_s16 = smov 64  }
 0x11f   :  { %193 = dma.hbm_to_vmem [thread:$0]  %s12011_s15, 32768, %s188_s9, [#allocation21], %s10899_s13, %s10899_s13, %s10900_s16  }
 0x120   :  { %s10901_s29 = smov [#allocation25]   ;;  %s10792_s19 = scalar_lea.hbm %s12013_s17, 65536 }
 0x121   :  { %s209_s26 = sshll.u32 %s10901_s29, 4  ;;  %p10793_p8 = scmp.ne.s32.totalorder %s12013_s17, %s10792_s19  ;;  %s210_s26 = int_to_ptr.vmem [resolvable:$true] %s209_s26 }
 0x122   :  { %p10796_p9 = scmp.lt.u32.totalorder %s10792_s19, %s12013_s17 }
 0x124   :  { %p10798_p10 = pnand %p10796_p9, %p10793_p8 }
 0x126   :  { %10801 = shalt.err (!%p10798_p10)
}
 0x127   :  { %s10802_s4 = scalar_lea.vmem %s210_s26, 65536  ;;  %p10807_p12 = scmp.lt.s32.totalorder %s210_s26, %s210_s26 }
 0x128   :  { %p10803_p11 = scmp.ne.s32.totalorder %s210_s26, %s10802_s4  ;;  %p10808_p13 = scmp.lt.s32.totalorder %s10802_s4, %s10802_s4 }
 0x12a   :  { %p10809_p0 = por %p10808_p13, %p10807_p12 }
 0x12c   :  { %p10810_p1 = pnand %p10809_p0, %p10803_p11 }
 0x12e   :  { %10813 = shalt.err (!%p10810_p1)
}
 0x12f   :  { %s10902_s15 = smov 512   ;;  %s10903_s24 = smov [#allocation28]  }
 0x130   :  { %215 = dma.hbm_to_vmem [thread:$0]  %s12013_s17, 65536, %s210_s26, [#allocation24], %s10902_s15, %s10902_s15, %s10886_s12  }
 0x131   :  { %s234_s9 = sshll.u32 %s10903_s24, 4  ;;  %s10814_s27 = scalar_lea.hbm %s12016_s20, 16  ;;  %s235_s9 = int_to_ptr.vmem [resolvable:$true] %s234_s9 }
 0x132   :  { %p10815_p2 = scmp.ne.s32.totalorder %s12016_s20, %s10814_s27  ;;  %p10818_p3 = scmp.lt.u32.totalorder %s10814_s27, %s12016_s20 }
 0x134   :  { %p10820_p4 = pnand %p10818_p3, %p10815_p2 }
 0x136   :  { %10823 = shalt.err (!%p10820_p4)
}
 0x137   :  { %s10824_s14 = scalar_lea.vmem %s235_s9, 16  ;;  %s10828_s17 = scalar_lea.vmem %s235_s9, 32 }
 0x138   :  { %p10825_p5 = scmp.ne.s32.totalorder %s235_s9, %s10824_s14  ;;  %p10829_p6 = scmp.lt.s32.totalorder %s235_s9, %s235_s9 }
 0x139   :  { %p10830_p7 = scmp.lt.s32.totalorder %s10828_s17, %s10824_s14 }
 0x13b   :  { %p10831_p8 = por %p10830_p7, %p10829_p6 }
 0x13d   :  { %p10832_p9 = pnand %p10831_p8, %p10825_p5 }
 0x13f   :  { %10835 = shalt.err (!%p10832_p9)
}
 0x140   :  { %237 = dma.hbm_to_vmem [thread:$0]  %s12016_s20, 16, %s235_s9, [#allocation27]  }
 0x141   :  { %10858 = dma.done.wait [#allocation3], 1024  }
 0x142   :  { %10859 = vsyncadd [#allocation3], 4294966272 }
 0x143   :  { %10860 = dma.done.wait [#allocation6], 3088  }
 0x144   :  { %10861 = vsyncadd [#allocation6], 4294964208 }
 0x145   :  { %10862 = dma.done.wait [#allocation9], 1024  }
 0x146   :  { %10863 = vsyncadd [#allocation9], 4294966272 }
 0x147   :  { %10864 = dma.done.wait [#allocation12], 18528  }
 0x148   :  { %10865 = vsyncadd [#allocation12], 4294948768 }
 0x149   :  { %10866 = dma.done.wait [#allocation15], 512  }
 0x14a   :  { %10867 = vsyncadd [#allocation15], 4294966784 }
 0x14b   :  { %10868 = dma.done.wait [#allocation18], 1552  }
 0x14c   :  { %10869 = vsyncadd [#allocation18], 4294965744 }
 0x14d   :  { %10870 = dma.done.wait [#allocation21], 32896  }
 0x14e   :  { %10871 = vsyncadd [#allocation21], 4294934400 }
 0x14f   :  { %10872 = dma.done.wait [#allocation24], 65664  }
 0x150   :  { %10873 = vsyncadd [#allocation24], 4294901632 }
 0x151   :  { %10874 = dma.done.wait [#allocation27], 80  }
 0x152   :  { %10875 = vsyncadd [#allocation27], 4294967216  ;;  %vm329_vm0 = vcmask 261120   ;;  %s12038_s8 = sld [smem:[#allocation40_spill]]  ;;  %v293_v5 = vld [vmem:[#allocation2] sm:$0xff]  ;;  %v303_v8 = vld [vmem:[#allocation5 + $0x8] sm:$0xff] }
 0x153   :  { %8251 = vmatprep.mubr.msk.f32.mxu0 %vm329_vm0, %v293_v5  ;;  %v302_v7 = vld [vmem:[#allocation5] sm:$0xff]  ;;  %v304_v9 = vld [vmem:[#allocation5 + $0x10] sm:$0xff]  ;;  %v305_v11 = vld [vmem:[#allocation5 + $0x18] sm:$0xff]  ;;  %vm433_vm1 = vcmask 523264   ;;  %s12039_s18 = sld [smem:[#allocation45_spill]]  ;;  %vm1220_vm2 = vcmask 130048  }
 0x154   :  { %v8978_v10 = vpack.c.bf16 %v303_v8, %v302_v7  ;;  %v8982_v12 = vpack.c.bf16 %v305_v11, %v304_v9  ;;  %v306_v13 = vld [vmem:[#allocation5 + $0x20] sm:$0xff]  ;;  %v307_v14 = vld [vmem:[#allocation5 + $0x28] sm:$0xff]  ;;  %v295_v16 = vld [vmem:[#allocation2 + $0x10] sm:$0xff]  ;;  %vm10905_vm3 = vmmov 0   ;;  %vm4143_vm4 = vcmask 64512   ;;  %s12040_s9 = sld [smem:[#allocation46_spill]] }
 0x155   :  { %v294_v15 = vld [vmem:[#allocation2 + $0x8] sm:$0xff]  ;;  %v8986_v17 = vpack.c.bf16 %v307_v14, %v306_v13  ;;  %v308_v18 = vld [vmem:[#allocation5 + $0x30] sm:$0xff]  ;;  %v309_v19 = vld [vmem:[#allocation5 + $0x38] sm:$0xff]  ;;  %vm7623_vm5 = vcmask 33792  }
 0x156   :  { %8979 = vmatprep.subr.bf16.mxu1 %v8978_v10  ;;  %v296_v20 = vld [vmem:[#allocation2 + $0x18] sm:$0xff]  ;;  %v298_v21 = vld [vmem:[#allocation2 + $0x20] sm:$0xff]  ;;  %v8990_v22 = vpack.c.bf16 %v309_v19, %v308_v18  ;;  %v299_v23 = vld [vmem:[#allocation2 + $0x28] sm:$0xff] }
 0x157   :  { %8981 = vmatpush3.bf16.msra.mxu1 %v8978_v10  ;;  %v300_v24 = vld [vmem:[#allocation2 + $0x30] sm:$0xff]  ;;  %v301_v25 = vld [vmem:[#allocation2 + $0x38] sm:$0xff]  ;;  %v311_v26 = vld [vmem:[#allocation5 + $0x40] sm:$0xff] }
 0x158   :  { %v11280_v0 = vld [vmem:[%s12038_s8] sm:$0xff]  ;;  %v11285_v1 = vld [vmem:[%s12038_s8 + $0x8] sm:$0xff]  ;;  %v11290_v2 = vld [vmem:[%s12038_s8 + $0x10] sm:$0xff]  ;;  %8983 = vmatprep.subr.bf16.mxu1 %v8982_v12 }
 0x159   :  { %v8970_v3 = vpack.c.bf16 %v11285_v1, %v11280_v0  ;;  %v11297_v4 = vld [vmem:[%s12038_s8 + $0x18] sm:$0xff]  ;;  %v312_v27 = vld [vmem:[#allocation5 + $0x48] sm:$0xff]  ;;  %v313_v29 = vld [vmem:[#allocation5 + $0x50] sm:$0xff] }
 0x15a   :  { %v8974_v6 = vpack.c.bf16 %v11297_v4, %v11290_v2  ;;  %v8994_v28 = vpack.c.bf16 %v312_v27, %v311_v26  ;;  %v314_v30 = vld [vmem:[#allocation5 + $0x58] sm:$0xff]  ;;  %v315_v34 = vld [vmem:[#allocation5 + $0x60] sm:$0xff]  ;;  %v316_v35 = vld [vmem:[#allocation5 + $0x68] sm:$0xff] }
 0x15b   :  { %8971 = vmatprep.subr.bf16.mxu0 %v8970_v3  ;;  %8985 = vmatpush3.bf16.msra.mxu1 %v8982_v12  ;;  %v8998_v33 = vpack.c.bf16 %v314_v30, %v313_v29  ;;  %v9002_v37 = vpack.c.bf16 %v316_v35, %v315_v34  ;;  %v317_v39 = vld [vmem:[#allocation5 + $0x70] sm:$0xff]  ;;  %v318_v40 = vld [vmem:[#allocation5 + $0x78] sm:$0xff]  ;;  %v320_v44 = vld [vmem:[#allocation5 + $0x80] sm:$0xff] }
 0x15c   :  { %8973 = vmatpush3.bf16.msra.mxu0 %v8970_v3  ;;  %8987 = vmatprep.subr.bf16.mxu1 %v8986_v17  ;;  %v9006_v42 = vpack.c.bf16 %v318_v40, %v317_v39  ;;  %v321_v45 = vld [vmem:[#allocation5 + $0x88] sm:$0xff]  ;;  %v322_v49 = vld [vmem:[#allocation5 + $0x90] sm:$0xff]  ;;  %v323_v50 = vld [vmem:[#allocation5 + $0x98] sm:$0xff] }
 0x15d   :  { %8975 = vmatprep.subr.bf16.mxu0 %v8974_v6  ;;  %v9018_v47 = vpack.c.bf16 %v321_v45, %v320_v44  ;;  %v9022_v51 = vpack.c.bf16 %v323_v50, %v322_v49  ;;  %v324_v52 = vld [vmem:[#allocation5 + $0xa0] sm:$0xff]  ;;  %v325_v53 = vld [vmem:[#allocation5 + $0xa8] sm:$0xff]  ;;  %v326_v55 = vld [vmem:[#allocation5 + $0xb0] sm:$0xff] }
 0x15e   :  { %v9026_v54 = vpack.c.bf16 %v325_v53, %v324_v52  ;;  %v327_v56 = vld [vmem:[#allocation5 + $0xb8] sm:$0xff]  ;;  %v834_v58 = vld [vmem:[#allocation8] sm:$0xff]  ;;  %v7671_v62 = vld [vmem:[%s12039_s18 + $0x90] sm:$0xff] }
 0x15f   :  { %8989 = vmatpush3.bf16.msra.mxu1 %v8986_v17  ;;  %v9030_v57 = vpack.c.bf16 %v327_v56, %v326_v55  ;;  %v7669_v59 = vld [vmem:[%s12039_s18 + $0x80] sm:$0xff]  ;;  %v7670_v60 = vld [vmem:[%s12039_s18 + $0x88] sm:$0xff]  ;;  %v7672_v63 = vld [vmem:[%s12039_s18 + $0x98] sm:$0xff] }
 0x160   :  { %8977 = vmatpush3.bf16.msra.mxu0 %v8974_v6  ;;  %8991 = vmatprep.subr.bf16.mxu1 %v8990_v22  ;;  %v9082_v61 = vpack.c.bf16 %v7670_v60, %v7669_v59  ;;  %v7676_v5 = vld [vmem:[%s12039_s18 + $0xb8] sm:$0xff]  ;;  %v7677_v7 = vld [vmem:[%s12039_s18 + $0xc0] sm:$0xff]  ;;  %v7678_v8 = vld [vmem:[%s12039_s18 + $0xc8] sm:$0xff] }
 0x161   :  { %9011 = vmatprep.subr.bf16.mxu0 %v8970_v3  ;;  %v9098_v9 = vpack.c.bf16 %v7678_v8, %v7677_v7  ;;  %v7652_v10 = vld [vmem:[#allocation7] ss:$0 sm:$0xff]  ;;  %v837_v26 = vld [vmem:[#allocation8 + $0x10] sm:$0xff]  ;;  %v844_v35 = vld [vmem:[%s12039_s18 + $0x28] sm:$0xff] }
 0x162   :  { %v839_v27 = vld [vmem:[%s12039_s18] sm:$0xff]  ;;  %v841_v30 = vld [vmem:[%s12039_s18 + $0x10] sm:$0xff]  ;;  %v850_v44 = vld [vmem:[%s12039_s18 + $0x58] sm:$0xff] }
 0x163   :  { %8252 = vmatmul.mubr.msk.f32.vlgmr.msra.gmra.mrb[0].mxu0 %vm329_vm0, %v294_v15  ;;  %8993 = vmatpush3.bf16.msra.mxu1 %v8990_v22  ;;  %v843_v34 = vld [vmem:[%s12039_s18 + $0x20] sm:$0xff]  ;;  %v7679_v45 = vld [vmem:[%s12039_s18 + $0xd0] sm:$0xff]  ;;  %v852_v50 = vld [vmem:[%s12039_s18 + $0x68] sm:$0xff] }
 0x164   :  { %8254 = vmatprep.mubr.msk.f32.mxu0 %vm329_vm0, %v295_v16  ;;  %9013 = vmatpush3.bf16.msra.mxu0 %v8970_v3  ;;  %v847_v40 = vld [vmem:[%s12039_s18 + $0x40] sm:$0xff]  ;;  %v7682_v53 = vld [vmem:[%s12039_s18 + $0xe8] sm:$0xff]  ;;  %v853_v55 = vld [vmem:[%s12039_s18 + $0x70] sm:$0xff] }
 0x165   :  { %9015 = vmatprep.subr.bf16.mxu0 %v8974_v6  ;;  %8995 = vmatprep.subr.bf16.mxu1 %v8994_v28  ;;  %v851_v49 = vld [vmem:[%s12039_s18 + $0x60] sm:$0xff]  ;;  %v854_v56 = vld [vmem:[%s12039_s18 + $0x78] sm:$0xff] }
 0x166   :  { %v9074_v52 = vpack.c.bf16 %v852_v50, %v851_v49  ;;  %v7684_v59 = vld [vmem:[%s12039_s18 + $0xf8] sm:$0xff]  ;;  %v1216_v49 = vld [vmem:[#allocation11 + $0xa8] sm:$0xff] }
 0x167   :  { %8255 = vmatmul.mubr.msk.f32.gmra.mrb[2].mxu0 %vm329_vm0, %v296_v20 }
 0x168   :  { %9017 = vmatpush3.bf16.msra.mxu0 %v8974_v6  ;;  %8309 = vmatprep.mubr.msk.f32.mxu0 %vm329_vm0, %v298_v21 }
 0x16b   :  { %8310 = vmatmul.mubr.msk.f32.vlgmr.msra.gmra.mrb[4].mxu0 %vm329_vm0, %v299_v23 }
 0x16c   :  { %8312 = vmatprep.mubr.msk.f32.mxu0 %vm329_vm0, %v300_v24 }
 0x16f   :  { %8313 = vmatmul.mubr.msk.f32.gmra.mrb[6].mxu0 %vm329_vm0, %v301_v25  ;;  %v835_v25 = vld [vmem:[#allocation8 + $0x8] sm:$0xff] }
 0x170   :  { %8345 = vmatprep.mubr.msk.f32.mxu0 %vm329_vm0, %v834_v58  ;;  %v9078_v58 = vpack.c.bf16 %v854_v56, %v853_v55 }
 0x236   :  { %v8253_v31 = vpop.f32.mrb[0].mxu0 }
 0x237   :  { %v408_v32 = vpop.f32.mrb[1].mxu0 }
 0x238   :  { %8273 = vmatprep.mubr.msk.f32.mxu1 %vm433_vm1, %v408_v32  ;;  %v838_v32 = vld [vmem:[#allocation8 + $0x18] sm:$0xff] }
 0x239   :  { %8274 = vmatmul.mubr.msk.f32.vlgmr.msra.gmra.mrb[0].mxu1 %vm433_vm1, %v8253_v31  ;;  %v842_v31 = vld [vmem:[%s12039_s18 + $0x18] sm:$0xff] }
 0x23a   :  { %8997 = vmatpush3.bf16.msra.mxu1 %v8994_v28  ;;  %v8256_v36 = vpop.f32.mrb[2].mxu0  ;;  %v840_v28 = vld [vmem:[%s12039_s18 + $0x8] sm:$0xff] }
 0x23b   :  { %8999 = vmatprep.subr.bf16.mxu1 %v8998_v33  ;;  %v418_v38 = vpop.f32.mrb[3].mxu0  ;;  %v9050_v29 = vpack.c.bf16 %v840_v28, %v839_v27  ;;  %v1203_v27 = vld [vmem:[#allocation11 + $0x48] sm:$0xff] }
 0x23c   :  { %8276 = vmatprep.mubr.msk.f32.mxu1 %vm433_vm1, %v418_v38  ;;  %v846_v38 = vld [vmem:[%s12039_s18 + $0x38] sm:$0xff] }
 0x23d   :  { %8277 = vmatmul.mubr.msk.f32.gmra.mrb[2].mxu1 %vm433_vm1, %v8256_v36  ;;  %v9058_v36 = vpack.c.bf16 %v844_v35, %v843_v34 }
 0x23e   :  { %9001 = vmatpush3.bf16.msra.mxu1 %v8998_v33  ;;  %8295 = vmatprep.mubr.msk.f32.mxu1 %vm433_vm1, %v11280_v0  ;;  %v8311_v41 = vpop.f32.mrb[4].mxu0  ;;  %v9086_v0 = vpack.c.bf16 %v7672_v63, %v7671_v62  ;;  %v9054_v33 = vpack.c.bf16 %v842_v31, %v841_v30  ;;  %v1205_v30 = vld [vmem:[#allocation11 + $0x58] sm:$0xff] }
 0x23f   :  { %9003 = vmatprep.subr.bf16.mxu1 %v9002_v37  ;;  %v710_v43 = vpop.f32.mrb[5].mxu0 }
 0x242   :  { %9005 = vmatpush3.bf16.msra.mxu1 %v9002_v37  ;;  %v8314_v46 = vpop.f32.mrb[6].mxu0  ;;  %v845_v37 = vld [vmem:[%s12039_s18 + $0x30] sm:$0xff] }
 0x243   :  { %9007 = vmatprep.subr.bf16.mxu1 %v9006_v42  ;;  %v720_v48 = vpop.f32.mrb[7].mxu0  ;;  %v9062_v39 = vpack.c.bf16 %v846_v38, %v845_v37  ;;  %v1207_v37 = vld [vmem:[#allocation11 + $0x68] sm:$0xff] }
 0x246   :  { %9009 = vmatpush3.bf16.msra.mxu1 %v9006_v42 }
 0x247   :  { %9019 = vmatprep.subr.bf16.mxu1 %v9018_v47 }
 0x249   :  { %8296 = vmatmul.mubr.msk.f32.vlgmr.msra.gmra.mrb[0].mxu1 %vm433_vm1, %v11285_v1  ;;  %v7673_v1 = vld [vmem:[%s12039_s18 + $0xa0] sm:$0xff] }
 0x24a   :  { %9021 = vmatpush3.bf16.msra.mxu1 %v9018_v47  ;;  %8298 = vmatprep.mubr.msk.f32.mxu1 %vm433_vm1, %v11290_v2  ;;  %v7674_v2 = vld [vmem:[%s12039_s18 + $0xa8] sm:$0xff]  ;;  %v7680_v47 = vld [vmem:[%s12039_s18 + $0xd8] sm:$0xff] }
 0x24b   :  { %9023 = vmatprep.subr.bf16.mxu1 %v9022_v51  ;;  %v9090_v3 = vpack.c.bf16 %v7674_v2, %v7673_v1 }
 0x24d   :  { %8299 = vmatmul.mubr.msk.f32.gmra.mrb[2].mxu1 %vm433_vm1, %v11297_v4  ;;  %v7675_v4 = vld [vmem:[%s12039_s18 + $0xb0] sm:$0xff] }
 0x24e   :  { %9025 = vmatpush3.bf16.msra.mxu1 %v9022_v51  ;;  %8331 = vmatprep.mubr.msk.f32.mxu1 %vm433_vm1, %v710_v43  ;;  %v9094_v6 = vpack.c.bf16 %v7676_v5, %v7675_v4  ;;  %v849_v43 = vld [vmem:[%s12039_s18 + $0x50] sm:$0xff]  ;;  %v7681_v51 = vld [vmem:[%s12039_s18 + $0xe0] sm:$0xff] }
 0x24f   :  { %9027 = vmatprep.subr.bf16.mxu1 %v9026_v54  ;;  %v11429_v4 = vld [vmem:[#allocation10 + $0x10] sm:$0xff] }
 0x252   :  { %9029 = vmatpush3.bf16.msra.mxu1 %v9026_v54  ;;  %v9106_v54 = vpack.c.bf16 %v7682_v53, %v7681_v51  ;;  %v1217_v51 = vld [vmem:[#allocation11 + $0xb0] sm:$0xff] }
 0x253   :  { %9031 = vmatprep.subr.bf16.mxu1 %v9030_v57 }
 0x256   :  { %9033 = vmatpush3.bf16.msra.mxu1 %v9030_v57  ;;  %v7683_v57 = vld [vmem:[%s12039_s18 + $0xf0] sm:$0xff] }
 0x257   :  { %9083 = vmatprep.subr.bf16.mxu1 %v9082_v61  ;;  %v9110_v60 = vpack.c.bf16 %v7684_v59, %v7683_v57 }
 0x259   :  { %8332 = vmatmul.mubr.msk.f32.vlgmr.msra.gmra.mrb[0].mxu1 %vm433_vm1, %v8311_v41  ;;  %v848_v41 = vld [vmem:[%s12039_s18 + $0x48] sm:$0xff] }
 0x25a   :  { %8334 = vmatprep.mubr.msk.f32.mxu1 %vm433_vm1, %v720_v48  ;;  %9085 = vmatpush3.bf16.msra.mxu1 %v9082_v61  ;;  %v9066_v42 = vpack.c.bf16 %v848_v41, %v847_v40  ;;  %v9102_v48 = vpack.c.bf16 %v7680_v47, %v7679_v45  ;;  %v1209_v40 = vld [vmem:[#allocation11 + $0x78] sm:$0xff]  ;;  %v1213_v45 = vld [vmem:[#allocation11 + $0x90] sm:$0xff] }
 0x25b   :  { %9087 = vmatprep.subr.bf16.mxu1 %v9086_v0 }
 0x25d   :  { %8335 = vmatmul.mubr.msk.f32.gmra.mrb[2].mxu1 %vm433_vm1, %v8314_v46  ;;  %v9070_v46 = vpack.c.bf16 %v850_v44, %v849_v43  ;;  %v1212_v43 = vld [vmem:[#allocation11 + $0x88] sm:$0xff] }
 0x25e   :  { %9089 = vmatpush3.bf16.msra.mxu1 %v9086_v0 }
 0x25f   :  { %9091 = vmatprep.subr.bf16.mxu1 %v9090_v3 }
 0x262   :  { %9093 = vmatpush3.bf16.msra.mxu1 %v9090_v3  ;;  %v11425_v3 = vld [vmem:[#allocation10] sm:$0xff] }
 0x263   :  { %9095 = vmatprep.subr.bf16.mxu1 %v9094_v6 }
 0x266   :  { %9097 = vmatpush3.bf16.msra.mxu1 %v9094_v6 }
 0x267   :  { %9099 = vmatprep.subr.bf16.mxu1 %v9098_v9 }
 0x26a   :  { %9101 = vmatpush3.bf16.msra.mxu1 %v9098_v9 }
 0x26b   :  { %9103 = vmatprep.subr.bf16.mxu1 %v9102_v48 }
 0x26e   :  { %9105 = vmatpush3.bf16.msra.mxu1 %v9102_v48  ;;  %v1215_v48 = vld [vmem:[#allocation11 + $0xa0] sm:$0xff] }
 0x26f   :  { %9107 = vmatprep.subr.bf16.mxu1 %v9106_v54  ;;  %v9162_v50 = vpack.c.bf16 %v1216_v49, %v1215_v48 }
 0x272   :  { %9109 = vmatpush3.bf16.msra.mxu1 %v9106_v54  ;;  %v7691_v54 = vld [vmem:[#allocation13] ss:$0 sm:$0xff] }
 0x273   :  { %9111 = vmatprep.subr.bf16.mxu1 %v9110_v60 }
 0x276   :  { %9113 = vmatpush3.bf16.msra.mxu1 %v9110_v60  ;;  %v1639_v60 = vld [vmem:[#allocation11 + $0xc0] sm:$0xff] }
 0x32c   :  { %v8333_v11 = vpop.f32.mrb[0].mxu1 }
 0x32d   :  { %v10330_v12 = vadd.f32 %v8333_v11, %v7652_v10  ;;  %v807_v13 = vpop.f32.mrb[1].mxu1  ;;  %v1194_v11 = vld [vmem:[#allocation11 + $0x8] sm:$0xff] }
 0x32e   :  { %v10331_v14 = vadd.f32 %v7652_v10, %v807_v13 }
 0x32f   :  { %v831_v15 = vmax.f32 %v10330_v12, 0.0 }
 0x330   :  { %v830_v16 = vmax.f32 %v10331_v14, 0.0  ;;  %v8336_v17 = vpop.f32.mrb[2].mxu1 }
 0x331   :  { %v10332_v18 = vadd.f32 %v8336_v17, %v7652_v10  ;;  %v817_v19 = vpop.f32.mrb[3].mxu1  ;;  %v11439_v17 = vld [vmem:[#allocation10 + $0x8] sm:$0xff] }
 0x332   :  { %v9034_v20 = vpack.c.bf16 %v831_v15, %v830_v16  ;;  %v10333_v21 = vadd.f32 %v7652_v10, %v817_v19  ;;  %v1193_v10 = vld [vmem:[#allocation11] sm:$0xff]  ;;  %v1195_v15 = vld [vmem:[#allocation11 + $0x10] sm:$0xff]  ;;  %v1196_v16 = vld [vmem:[#allocation11 + $0x18] sm:$0xff] }
 0x333   :  { %v833_v22 = vmax.f32 %v10332_v18, 0.0  ;;  %v9118_v14 = vpack.c.bf16 %v1194_v11, %v1193_v10  ;;  %v11441_v18 = vld [vmem:[#allocation10 + $0x18] sm:$0xff]  ;;  %v9122_v19 = vpack.c.bf16 %v1196_v16, %v1195_v15  ;;  %v1645_v10 = vld [vmem:[#allocation11 + $0xf0] sm:$0xff]  ;;  %v1649_v15 = vld [vmem:[#allocation11 + $0x108] sm:$0xff] }
 0x334   :  { %v832_v23 = vmax.f32 %v10333_v21, 0.0  ;;  %9035 = vmatprep.subr.bf16.mxu0 %v9034_v20  ;;  %v1198_v21 = vld [vmem:[#allocation11 + $0x28] sm:$0xff]  ;;  %v1646_v11 = vld [vmem:[#allocation11 + $0xf8] sm:$0xff] }
 0x335   :  { %9037 = vmatpush3.bf16.msra.mxu0 %v9034_v20 }
 0x336   :  { %v9038_v24 = vpack.c.bf16 %v833_v22, %v832_v23  ;;  %v1199_v23 = vld [vmem:[#allocation11 + $0x30] sm:$0xff] }
 0x338   :  { %9039 = vmatprep.subr.bf16.mxu0 %v9038_v24 }
 0x339   :  { %9041 = vmatpush3.bf16.msra.mxu0 %v9038_v24 }
 0x33a   :  { %9043 = vmatprep.subr.bf16.mxu0 %v9034_v20 }
 0x33c   :  { %8346 = vmatmul.mubr.msk.f32.vlgmr.msra.gmra.mrb[8].mxu0 %vm329_vm0, %v835_v25 }
 0x33d   :  { %9045 = vmatpush3.bf16.msra.mxu0 %v9034_v20  ;;  %8356 = vmatprep.mubr.msk.f32.mxu0 %vm329_vm0, %v837_v26  ;;  %v1197_v20 = vld [vmem:[#allocation11 + $0x20] sm:$0xff] }
 0x33e   :  { %9047 = vmatprep.subr.bf16.mxu0 %v9038_v24  ;;  %v9126_v22 = vpack.c.bf16 %v1198_v21, %v1197_v20  ;;  %v1202_v26 = vld [vmem:[#allocation11 + $0x40] sm:$0xff]  ;;  %v1651_v20 = vld [vmem:[#allocation11 + $0x118] sm:$0xff] }
 0x33f   :  { %v9134_v28 = vpack.c.bf16 %v1203_v27, %v1202_v26  ;;  %v1652_v26 = vld [vmem:[#allocation11 + $0x120] sm:$0xff]  ;;  %v1653_v27 = vld [vmem:[#allocation11 + $0x128] sm:$0xff] }
 0x341   :  { %9049 = vmatpush3.bf16.msra.mxu0 %v9038_v24  ;;  %v1200_v24 = vld [vmem:[#allocation11 + $0x38] sm:$0xff] }
 0x342   :  { %9051 = vmatprep.subr.bf16.mxu0 %v9050_v29  ;;  %v9130_v25 = vpack.c.bf16 %v1200_v24, %v1199_v23 }
 0x344   :  { %8357 = vmatmul.mubr.msk.f32.vlgmr.msra.gmra.mrb[10].mxu0 %vm329_vm0, %v838_v32 }
 0x345   :  { %9053 = vmatpush3.bf16.msra.mxu0 %v9050_v29  ;;  %v1204_v29 = vld [vmem:[#allocation11 + $0x50] sm:$0xff] }
 0x346   :  { %9055 = vmatprep.subr.bf16.mxu0 %v9054_v33  ;;  %v9138_v34 = vpack.c.bf16 %v1205_v30, %v1204_v29  ;;  %v1654_v29 = vld [vmem:[#allocation11 + $0x130] sm:$0xff]  ;;  %v1655_v30 = vld [vmem:[#allocation11 + $0x138] sm:$0xff] }
 0x349   :  { %9057 = vmatpush3.bf16.msra.mxu0 %v9054_v33 }
 0x34a   :  { %9059 = vmatprep.subr.bf16.mxu0 %v9058_v36 }
 0x34d   :  { %9061 = vmatpush3.bf16.msra.mxu0 %v9058_v36  ;;  %v1206_v36 = vld [vmem:[#allocation11 + $0x60] sm:$0xff] }
 0x34e   :  { %9063 = vmatprep.subr.bf16.mxu0 %v9062_v39  ;;  %v9142_v38 = vpack.c.bf16 %v1207_v37, %v1206_v36  ;;  %v1660_v36 = vld [vmem:[#allocation11 + $0x158] sm:$0xff] }
 0x351   :  { %9065 = vmatpush3.bf16.msra.mxu0 %v9062_v39  ;;  %v1208_v39 = vld [vmem:[#allocation11 + $0x70] sm:$0xff] }
 0x352   :  { %9067 = vmatprep.subr.bf16.mxu0 %v9066_v42  ;;  %v9146_v41 = vpack.c.bf16 %v1209_v40, %v1208_v39  ;;  %v1662_v39 = vld [vmem:[#allocation11 + $0x168] sm:$0xff] }
 0x355   :  { %9069 = vmatpush3.bf16.msra.mxu0 %v9066_v42  ;;  %v1211_v42 = vld [vmem:[#allocation11 + $0x80] sm:$0xff] }
 0x356   :  { %9071 = vmatprep.subr.bf16.mxu0 %v9070_v46  ;;  %v9154_v44 = vpack.c.bf16 %v1212_v43, %v1211_v42  ;;  %v1664_v42 = vld [vmem:[#allocation11 + $0x178] sm:$0xff] }
 0x359   :  { %9073 = vmatpush3.bf16.msra.mxu0 %v9070_v46  ;;  %v1214_v46 = vld [vmem:[#allocation11 + $0x98] sm:$0xff] }
 0x35a   :  { %9075 = vmatprep.subr.bf16.mxu0 %v9074_v52  ;;  %v9158_v47 = vpack.c.bf16 %v1214_v46, %v1213_v45 }
 0x35d   :  { %9077 = vmatpush3.bf16.msra.mxu0 %v9074_v52  ;;  %v1218_v52 = vld [vmem:[#allocation11 + $0xb8] sm:$0xff] }
 0x35e   :  { %9079 = vmatprep.subr.bf16.mxu0 %v9078_v58  ;;  %v9166_v53 = vpack.c.bf16 %v1218_v52, %v1217_v51  ;;  %v2075_v52 = vld [vmem:[#allocation11 + $0x180] sm:$0xff] }
 0x361   :  { %9081 = vmatpush3.bf16.msra.mxu0 %v9078_v58 }
 0x40f   :  { %v8347_v61 = vpop.f32.mrb[8].mxu0 }
 0x410   :  { %v944_v62 = vpop.f32.mrb[9].mxu0 }
 0x417   :  { %v8358_v63 = vpop.f32.mrb[10].mxu0 }
 0x418   :  { %v1035_v0 = vmax.f32 %v8347_v61, %v8358_v63  ;;  %v1025_v1 = vpop.f32.mrb[11].mxu0  ;;  %v1640_v61 = vld [vmem:[#allocation11 + $0xc8] sm:$0xff] }
 0x419   :  { %v1034_v2 = vmax.f32 %v944_v62, %v1025_v1  ;;  %v1641_v1 = vld [vmem:[#allocation11 + $0xd0] sm:$0xff] }
 0x41b   :  { %8391 = vmatprep.mubr.f32.mxu0 %v1034_v2  ;;  %8426 = vmatprep.mubr.f32.mxu1 %v1034_v2  ;;  %v1642_v2 = vld [vmem:[#allocation11 + $0xd8] sm:$0xff] }
 0x41c   :  { %8392 = vmatmul.mubr.f32.vlgmr.msra.gmra.mrb[12].mxu0 %v1035_v0  ;;  %8427 = vmatmul.mubr.f32.vlgmr.msra.gmra.mrb[4].mxu1 %v1035_v0  ;;  %v9174_v0 = vpack.c.bf16 %v1640_v61, %v1639_v60  ;;  %v2081_v61 = vld [vmem:[#allocation11 + $0x1b0] sm:$0xff] }
 0x41d   :  { %8433 = vmatprep.mubr.msk.f32.mxu0 %vm1220_vm2, %v11425_v3  ;;  %8478 = vmatprep.mubr.msk.f32.mxu1 %vm1220_vm2, %v11429_v4 }
 0x4ef   :  { %v8393_v5 = vpop.f32.mrb[12].mxu0  ;;  %v8428_v6 = vpop.f32.mrb[4].mxu1 }
 0x4f0   :  { %v11433_v7 = vmax.f32 %v8393_v5, %v8428_v6  ;;  %v1102_v8 = vpop.f32.mrb[13].mxu0  ;;  %v1177_v9 = vpop.f32.mrb[5].mxu1  ;;  %v9178_v5 = vpack.c.bf16 %v1642_v2, %v1641_v1  ;;  %v1643_v6 = vld [vmem:[#allocation11 + $0xe0] sm:$0xff]  ;;  %v2085_v1 = vld [vmem:[#allocation11 + $0x1c8] sm:$0xff] }
 0x4f1   :  { %v11435_v12 = vmax.f32 %v1102_v8, %v1177_v9  ;;  %v1644_v8 = vld [vmem:[#allocation11 + $0xe8] sm:$0xff] }
 0x4f2   :  { %v9182_v9 = vpack.c.bf16 %v1644_v8, %v1643_v6  ;;  %v2087_v6 = vld [vmem:[#allocation11 + $0x1d8] sm:$0xff] }
 0x4f3   :  { %v9114_v13 = vpack.c.bf16 %v11433_v7, %v11435_v12 }
 0x4f5   :  { %9115 = vmatprep.subr.bf16.mxu0 %v9114_v13  ;;  %9151 = vmatprep.subr.bf16.mxu1 %v9114_v13 }
 0x4f6   :  { %9117 = vmatpush3.bf16.msra.mxu0 %v9114_v13  ;;  %9153 = vmatpush3.bf16.msra.mxu1 %v9114_v13  ;;  %v9186_v13 = vpack.c.bf16 %v1646_v11, %v1645_v10 }
 0x4f7   :  { %9119 = vmatprep.subr.bf16.mxu0 %v9118_v14 }
 0x4f9   :  { %8434 = vmatmul.mubr.msk.f32.vlgmr.msra.gmra.mrb[14].mxu0 %vm1220_vm2, %v11439_v17  ;;  %8479 = vmatmul.mubr.msk.f32.vlgmr.msra.gmra.mrb[6].mxu1 %vm1220_vm2, %v11441_v18 }
 0x4fa   :  { %9121 = vmatpush3.bf16.msra.mxu0 %v9118_v14  ;;  %8504 = vmatprep.mubr.msk.f32.mxu1 %vm1220_vm2, %v11425_v3  ;;  %v1648_v14 = vld [vmem:[#allocation11 + $0x100] sm:$0xff] }
 0x4fb   :  { %9123 = vmatprep.subr.bf16.mxu0 %v9122_v19  ;;  %v9190_v16 = vpack.c.bf16 %v1649_v15, %v1648_v14  ;;  %v2088_v14 = vld [vmem:[#allocation11 + $0x1e0] sm:$0xff]  ;;  %v2089_v15 = vld [vmem:[#allocation11 + $0x1e8] sm:$0xff] }
 0x4fe   :  { %9125 = vmatpush3.bf16.msra.mxu0 %v9122_v19  ;;  %v1650_v19 = vld [vmem:[#allocation11 + $0x110] sm:$0xff] }
 0x4ff   :  { %9127 = vmatprep.subr.bf16.mxu0 %v9126_v22  ;;  %v9194_v24 = vpack.c.bf16 %v1651_v20, %v1650_v19  ;;  %v2090_v19 = vld [vmem:[#allocation11 + $0x1f0] sm:$0xff]  ;;  %v2091_v20 = vld [vmem:[#allocation11 + $0x1f8] sm:$0xff] }
 0x502   :  { %9129 = vmatpush3.bf16.msra.mxu0 %v9126_v22 }
 0x503   :  { %9131 = vmatprep.subr.bf16.mxu0 %v9130_v25 }
 0x506   :  { %9133 = vmatpush3.bf16.msra.mxu0 %v9130_v25 }
 0x507   :  { %9135 = vmatprep.subr.bf16.mxu0 %v9134_v28 }
 0x5cc   :  { %v8435_v31 = vpop.f32.mrb[14].mxu0  ;;  %v8480_v32 = vpop.f32.mrb[6].mxu1 }
 0x5cd   :  { %v1293_v33 = vpop.f32.mrb[15].mxu0  ;;  %v1544_v35 = vpop.f32.mrb[7].mxu1 }
 0x5ce   :  { %8452 = vmatprep.mubr.msk.f32.mxu0 %vm433_vm1, %v1293_v33  ;;  %v1658_v33 = vld [vmem:[#allocation11 + $0x148] sm:$0xff] }
 0x5cf   :  { %8453 = vmatmul.mubr.msk.f32.vlgmr.msra.gmra.mrb[16].mxu0 %vm433_vm1, %v8435_v31  ;;  %v9202_v31 = vpack.c.bf16 %v1655_v30, %v1654_v29  ;;  %v2098_v29 = vld [vmem:[#allocation11 + $0x228] sm:$0xff] }
 0x5d0   :  { %9137 = vmatpush3.bf16.msra.mxu0 %v9134_v28  ;;  %8471 = vmatprep.mubr.msk.f32.mxu0 %vm433_vm1, %v11435_v12  ;;  %v9198_v28 = vpack.c.bf16 %v1653_v27, %v1652_v26  ;;  %v2096_v26 = vld [vmem:[#allocation11 + $0x218] sm:$0xff] }
 0x5d1   :  { %9139 = vmatprep.subr.bf16.mxu0 %v9138_v34 }
 0x5d4   :  { %9141 = vmatpush3.bf16.msra.mxu0 %v9138_v34 }
 0x5d5   :  { %9143 = vmatprep.subr.bf16.mxu0 %v9142_v38 }
 0x5d8   :  { %9145 = vmatpush3.bf16.msra.mxu0 %v9142_v38  ;;  %v1661_v38 = vld [vmem:[#allocation11 + $0x160] sm:$0xff] }
 0x5d9   :  { %9147 = vmatprep.subr.bf16.mxu0 %v9146_v41  ;;  %v9218_v40 = vpack.c.bf16 %v1662_v39, %v1661_v38 }
 0x5dc   :  { %9149 = vmatpush3.bf16.msra.mxu0 %v9146_v41  ;;  %v1663_v41 = vld [vmem:[#allocation11 + $0x170] sm:$0xff] }
 0x5dd   :  { %9155 = vmatprep.subr.bf16.mxu0 %v9154_v44  ;;  %v9222_v43 = vpack.c.bf16 %v1664_v42, %v1663_v41  ;;  %v2510_v41 = vld [vmem:[#allocation11 + $0x248] sm:$0xff] }
 0x5df   :  { %8472 = vmatmul.mubr.msk.f32.vlgmr.msra.gmra.mrb[16].mxu0 %vm433_vm1, %v11433_v7 }
 0x5e0   :  { %9157 = vmatpush3.bf16.msra.mxu0 %v9154_v44  ;;  %8497 = vmatprep.mubr.msk.f32.mxu0 %vm433_vm1, %v1544_v35  ;;  %v1659_v35 = vld [vmem:[#allocation11 + $0x150] sm:$0xff]  ;;  %v7702_v44 = vld [vmem:[#allocation13 + $0x1] ss:$0 sm:$0xff] }
 0x5e1   :  { %9159 = vmatprep.subr.bf16.mxu0 %v9158_v47  ;;  %v9214_v37 = vpack.c.bf16 %v1660_v36, %v1659_v35 }
 0x5e4   :  { %9161 = vmatpush3.bf16.msra.mxu0 %v9158_v47 }
 0x5e5   :  { %9163 = vmatprep.subr.bf16.mxu0 %v9162_v50 }
 0x5e8   :  { %9165 = vmatpush3.bf16.msra.mxu0 %v9162_v50 }
 0x5e9   :  { %9167 = vmatprep.subr.bf16.mxu0 %v9166_v53 }
 0x5ec   :  { %9169 = vmatpush3.bf16.msra.mxu0 %v9166_v53  ;;  %v2076_v53 = vld [vmem:[#allocation11 + $0x188] sm:$0xff] }
 0x5ef   :  { %8498 = vmatmul.mubr.msk.f32.vlgmr.msra.gmra.mrb[16].mxu0 %vm433_vm1, %v8480_v32  ;;  %v1657_v32 = vld [vmem:[#allocation11 + $0x140] sm:$0xff] }
 0x5f0   :  { %8549 = vmatprep.mubr.msk.f32.mxu0 %vm1220_vm2, %v11429_v4  ;;  %v9210_v34 = vpack.c.bf16 %v1658_v33, %v1657_v32  ;;  %v2100_v32 = vld [vmem:[#allocation11 + $0x238] sm:$0xff] }
 0x6c2   :  { %v8499_v55 = vpop.f32.mrb[16].mxu0 }
 0x6c3   :  { %v11459_v56 = vadd.f32 %v8499_v55, %v7691_v54  ;;  %v1625_v57 = vpop.f32.mrb[17].mxu0 }
 0x6c4   :  { %v10335_v58 = vadd.f32 %v7691_v54, %v1625_v57  ;;  %v2077_v57 = vld [vmem:[#allocation11 + $0x190] sm:$0xff] }
 0x6c5   :  { %v1637_v59 = vmax.f32 %v11459_v56, 0.0  ;;  %v9230_v56 = vpack.c.bf16 %v2076_v53, %v2075_v52  ;;  %v2515_v52 = vld [vmem:[#allocation11 + $0x270] sm:$0xff]  ;;  %v2516_v53 = vld [vmem:[#allocation11 + $0x278] sm:$0xff] }
 0x6c6   :  { %v1636_v62 = vmax.f32 %v10335_v58, 0.0  ;;  %v2078_v58 = vld [vmem:[#allocation11 + $0x198] sm:$0xff] }
 0x6c8   :  { %v9170_v63 = vpack.c.bf16 %v1637_v59, %v1636_v62 }
 0x6ca   :  { %9171 = vmatprep.subr.bf16.mxu1 %v9170_v63  ;;  %9207 = vmatprep.subr.bf16.mxu0 %v9170_v63 }
 0x6cb   :  { %9173 = vmatpush3.bf16.msra.mxu1 %v9170_v63  ;;  %9209 = vmatpush3.bf16.msra.mxu0 %v9170_v63 }
 0x6cc   :  { %9175 = vmatprep.subr.bf16.mxu1 %v9174_v0 }
 0x6ce   :  { %8505 = vmatmul.mubr.msk.f32.vlgmr.msra.gmra.mrb[8].mxu1 %vm1220_vm2, %v11439_v17  ;;  %8550 = vmatmul.mubr.msk.f32.vlgmr.msra.gmra.mrb[18].mxu0 %vm1220_vm2, %v11441_v18 }
 0x6cf   :  { %9177 = vmatpush3.bf16.msra.mxu1 %v9174_v0  ;;  %8575 = vmatprep.mubr.msk.f32.mxu0 %vm1220_vm2, %v11425_v3  ;;  %v2084_v0 = vld [vmem:[#allocation11 + $0x1c0] sm:$0xff] }
 0x6d0   :  { %9179 = vmatprep.subr.bf16.mxu1 %v9178_v5  ;;  %v9246_v2 = vpack.c.bf16 %v2085_v1, %v2084_v0  ;;  %v2522_v0 = vld [vmem:[#allocation11 + $0x2a0] sm:$0xff]  ;;  %v2523_v1 = vld [vmem:[#allocation11 + $0x2a8] sm:$0xff] }
 0x6d3   :  { %9181 = vmatpush3.bf16.msra.mxu1 %v9178_v5  ;;  %v2086_v5 = vld [vmem:[#allocation11 + $0x1d0] sm:$0xff] }
 0x6d4   :  { %9183 = vmatprep.subr.bf16.mxu1 %v9182_v9  ;;  %v9250_v11 = vpack.c.bf16 %v2087_v6, %v2086_v5  ;;  %v2524_v5 = vld [vmem:[#allocation11 + $0x2b0] sm:$0xff]  ;;  %v2525_v6 = vld [vmem:[#allocation11 + $0x2b8] sm:$0xff] }
 0x6d7   :  { %9185 = vmatpush3.bf16.msra.mxu1 %v9182_v9 }
 0x6d8   :  { %9187 = vmatprep.subr.bf16.mxu1 %v9186_v13 }
 0x6db   :  { %9189 = vmatpush3.bf16.msra.mxu1 %v9186_v13 }
 0x6dc   :  { %9191 = vmatprep.subr.bf16.mxu1 %v9190_v16 }
 0x7a1   :  { %v8506_v21 = vpop.f32.mrb[8].mxu1  ;;  %v8551_v22 = vpop.f32.mrb[18].mxu0 }
 0x7a2   :  { %v1733_v23 = vpop.f32.mrb[9].mxu1  ;;  %v1978_v25 = vpop.f32.mrb[19].mxu0 }
 0x7a3   :  { %8523 = vmatprep.mubr.msk.f32.mxu1 %vm433_vm1, %v1733_v23  ;;  %v2094_v23 = vld [vmem:[#allocation11 + $0x208] sm:$0xff] }
 0x7a4   :  { %8524 = vmatmul.mubr.msk.f32.vlgmr.msra.gmra.mrb[10].mxu1 %vm433_vm1, %v8506_v21  ;;  %v9258_v21 = vpack.c.bf16 %v2091_v20, %v2090_v19  ;;  %v2532_v19 = vld [vmem:[#allocation11 + $0x2e8] sm:$0xff] }
 0x7a5   :  { %9193 = vmatpush3.bf16.msra.mxu1 %v9190_v16  ;;  %8542 = vmatprep.mubr.msk.f32.mxu1 %vm433_vm1, %v1636_v62  ;;  %v2082_v62 = vld [vmem:[#allocation11 + $0x1b8] sm:$0xff]  ;;  %v9254_v16 = vpack.c.bf16 %v2089_v15, %v2088_v14 }
 0x7a6   :  { %9195 = vmatprep.subr.bf16.mxu1 %v9194_v24  ;;  %v9242_v63 = vpack.c.bf16 %v2082_v62, %v2081_v61  ;;  %v2530_v14 = vld [vmem:[#allocation11 + $0x2d8] sm:$0xff] }
 0x7a9   :  { %9197 = vmatpush3.bf16.msra.mxu1 %v9194_v24 }
 0x7aa   :  { %9199 = vmatprep.subr.bf16.mxu1 %v9198_v28 }
 0x7ad   :  { %9201 = vmatpush3.bf16.msra.mxu1 %v9198_v28  ;;  %v2097_v28 = vld [vmem:[#allocation11 + $0x220] sm:$0xff] }
 0x7ae   :  { %9203 = vmatprep.subr.bf16.mxu1 %v9202_v31  ;;  %v9274_v30 = vpack.c.bf16 %v2098_v29, %v2097_v28 }
 0x7b1   :  { %9205 = vmatpush3.bf16.msra.mxu1 %v9202_v31  ;;  %v2099_v31 = vld [vmem:[#allocation11 + $0x230] sm:$0xff] }
 0x7b2   :  { %9211 = vmatprep.subr.bf16.mxu1 %v9210_v34  ;;  %v9278_v33 = vpack.c.bf16 %v2100_v32, %v2099_v31  ;;  %v2945_v32 = vld [vmem:[#allocation11 + $0x300] sm:$0xff] }
 0x7b4   :  { %8543 = vmatmul.mubr.msk.f32.vlgmr.msra.gmra.mrb[10].mxu1 %vm433_vm1, %v1637_v59  ;;  %v2079_v59 = vld [vmem:[#allocation11 + $0x1a0] sm:$0xff] }
 0x7b5   :  { %9213 = vmatpush3.bf16.msra.mxu1 %v9210_v34  ;;  %8568 = vmatprep.mubr.msk.f32.mxu1 %vm433_vm1, %v1978_v25  ;;  %v2095_v25 = vld [vmem:[#allocation11 + $0x210] sm:$0xff]  ;;  %v7713_v34 = vld [vmem:[#allocation13 + $0x2] ss:$0 sm:$0xff] }
 0x7b6   :  { %9215 = vmatprep.subr.bf16.mxu1 %v9214_v37  ;;  %v9270_v27 = vpack.c.bf16 %v2096_v26, %v2095_v25 }
 0x7b9   :  { %9217 = vmatpush3.bf16.msra.mxu1 %v9214_v37 }
 0x7ba   :  { %9219 = vmatprep.subr.bf16.mxu1 %v9218_v40 }
 0x7bd   :  { %9221 = vmatpush3.bf16.msra.mxu1 %v9218_v40  ;;  %v2509_v40 = vld [vmem:[#allocation11 + $0x240] sm:$0xff] }
 0x7be   :  { %9223 = vmatprep.subr.bf16.mxu1 %v9222_v43 }
 0x7c1   :  { %9225 = vmatpush3.bf16.msra.mxu1 %v9222_v43 }
 0x7c4   :  { %8569 = vmatmul.mubr.msk.f32.vlgmr.msra.gmra.mrb[10].mxu1 %vm433_vm1, %v8551_v22  ;;  %v2093_v22 = vld [vmem:[#allocation11 + $0x200] sm:$0xff] }
 0x7c5   :  { %8620 = vmatprep.mubr.msk.f32.mxu1 %vm1220_vm2, %v11429_v4  ;;  %v9266_v24 = vpack.c.bf16 %v2094_v23, %v2093_v22  ;;  %v2534_v22 = vld [vmem:[#allocation11 + $0x2f8] sm:$0xff] }
 0x897   :  { %v8570_v45 = vpop.f32.mrb[10].mxu1 }
 0x898   :  { %v10336_v46 = vadd.f32 %v8570_v45, %v7702_v44  ;;  %v2059_v47 = vpop.f32.mrb[11].mxu1  ;;  %v2511_v45 = vld [vmem:[#allocation11 + $0x250] sm:$0xff] }
 0x899   :  { %v10337_v48 = vadd.f32 %v7702_v44, %v2059_v47  ;;  %v9286_v44 = vpack.c.bf16 %v2510_v41, %v2509_v40  ;;  %v2951_v41 = vld [vmem:[#allocation11 + $0x330] sm:$0xff] }
 0x89a   :  { %v2071_v49 = vadd.f32 %v10336_v46, %v11433_v7  ;;  %v9234_v7 = vpack.c.bf16 %v2078_v58, %v2077_v57  ;;  %v2512_v46 = vld [vmem:[#allocation11 + $0x258] sm:$0xff]  ;;  %v2519_v57 = vld [vmem:[#allocation11 + $0x288] sm:$0xff] }
 0x89b   :  { %v2070_v50 = vadd.f32 %v10337_v48, %v11435_v12  ;;  %v2080_v12 = vld [vmem:[#allocation11 + $0x1a8] sm:$0xff]  ;;  %v9290_v47 = vpack.c.bf16 %v2512_v46, %v2511_v45  ;;  %v2513_v48 = vld [vmem:[#allocation11 + $0x260] sm:$0xff] }
 0x89c   :  { %v11482_v51 = vmax.f32 %v2071_v49, 0.0  ;;  %v9238_v60 = vpack.c.bf16 %v2080_v12, %v2079_v59  ;;  %v2514_v49 = vld [vmem:[#allocation11 + $0x268] sm:$0xff]  ;;  %v2521_v59 = vld [vmem:[#allocation11 + $0x298] sm:$0xff] }
 0x89d   :  { %v11484_v54 = vmax.f32 %v2070_v50, 0.0  ;;  %v9294_v50 = vpack.c.bf16 %v2514_v49, %v2513_v48  ;;  %v2955_v45 = vld [vmem:[#allocation11 + $0x348] sm:$0xff]  ;;  %v2957_v48 = vld [vmem:[#allocation11 + $0x358] sm:$0xff] }
 0x89f   :  { %v9226_v55 = vpack.c.bf16 %v11482_v51, %v11484_v54 }
 0x8a1   :  { %9227 = vmatprep.subr.bf16.mxu0 %v9226_v55  ;;  %9263 = vmatprep.subr.bf16.mxu1 %v9226_v55 }
 0x8a2   :  { %9229 = vmatpush3.bf16.msra.mxu0 %v9226_v55  ;;  %9265 = vmatpush3.bf16.msra.mxu1 %v9226_v55  ;;  %v9298_v55 = vpack.c.bf16 %v2516_v53, %v2515_v52 }
 0x8a3   :  { %9231 = vmatprep.subr.bf16.mxu0 %v9230_v56 }
 0x8a5   :  { %8576 = vmatmul.mubr.msk.f32.vlgmr.msra.gmra.mrb[20].mxu0 %vm1220_vm2, %v11439_v17  ;;  %8621 = vmatmul.mubr.msk.f32.vlgmr.msra.gmra.mrb[12].mxu1 %vm1220_vm2, %v11441_v18 }
 0x8a6   :  { %9233 = vmatpush3.bf16.msra.mxu0 %v9230_v56  ;;  %8646 = vmatprep.mubr.msk.f32.mxu1 %vm1220_vm2, %v11425_v3  ;;  %v2518_v56 = vld [vmem:[#allocation11 + $0x280] sm:$0xff] }
 0x8a7   :  { %9235 = vmatprep.subr.bf16.mxu0 %v9234_v7  ;;  %v9302_v58 = vpack.c.bf16 %v2519_v57, %v2518_v56  ;;  %v2959_v56 = vld [vmem:[#allocation11 + $0x368] sm:$0xff] }
 0x8aa   :  { %9237 = vmatpush3.bf16.msra.mxu0 %v9234_v7  ;;  %v2520_v7 = vld [vmem:[#allocation11 + $0x290] sm:$0xff] }
 0x8ab   :  { %9239 = vmatprep.subr.bf16.mxu0 %v9238_v60  ;;  %v9306_v62 = vpack.c.bf16 %v2521_v59, %v2520_v7  ;;  %v2961_v7 = vld [vmem:[#allocation11 + $0x378] sm:$0xff] }
 0x8ae   :  { %9241 = vmatpush3.bf16.msra.mxu0 %v9238_v60 }
 0x8af   :  { %9243 = vmatprep.subr.bf16.mxu0 %v9242_v63 }
 0x8b2   :  { %9245 = vmatpush3.bf16.msra.mxu0 %v9242_v63 }
 0x8b3   :  { %9247 = vmatprep.subr.bf16.mxu0 %v9246_v2 }
 0x978   :  { %v8577_v8 = vpop.f32.mrb[20].mxu0  ;;  %v8622_v9 = vpop.f32.mrb[12].mxu1 }
 0x979   :  { %v2169_v10 = vpop.f32.mrb[21].mxu0  ;;  %v2414_v13 = vpop.f32.mrb[13].mxu1 }
 0x97a   :  { %8594 = vmatprep.mubr.msk.f32.mxu0 %vm433_vm1, %v2169_v10  ;;  %v2528_v10 = vld [vmem:[#allocation11 + $0x2c8] sm:$0xff] }
 0x97b   :  { %8595 = vmatmul.mubr.msk.f32.vlgmr.msra.gmra.mrb[22].mxu0 %vm433_vm1, %v8577_v8  ;;  %v9314_v8 = vpack.c.bf16 %v2525_v6, %v2524_v5  ;;  %v2969_v6 = vld [vmem:[#allocation11 + $0x3b0] sm:$0xff] }
 0x97c   :  { %9249 = vmatpush3.bf16.msra.mxu0 %v9246_v2  ;;  %8613 = vmatprep.mubr.msk.f32.mxu0 %vm433_vm1, %v11484_v54  ;;  %v9310_v2 = vpack.c.bf16 %v2523_v1, %v2522_v0  ;;  %v2967_v1 = vld [vmem:[#allocation11 + $0x3a0] sm:$0xff] }
 0x97d   :  { %9251 = vmatprep.subr.bf16.mxu0 %v9250_v11 }
 0x980   :  { %9253 = vmatpush3.bf16.msra.mxu0 %v9250_v11 }
 0x981   :  { %9255 = vmatprep.subr.bf16.mxu0 %v9254_v16 }
 0x984   :  { %9257 = vmatpush3.bf16.msra.mxu0 %v9254_v16  ;;  %v2531_v16 = vld [vmem:[#allocation11 + $0x2e0] sm:$0xff] }
 0x985   :  { %9259 = vmatprep.subr.bf16.mxu0 %v9258_v21  ;;  %v9330_v20 = vpack.c.bf16 %v2532_v19, %v2531_v16  ;;  %v3379_v19 = vld [vmem:[#allocation11 + $0x3c0] sm:$0xff] }
 0x988   :  { %9261 = vmatpush3.bf16.msra.mxu0 %v9258_v21  ;;  %v2533_v21 = vld [vmem:[#allocation11 + $0x2f0] sm:$0xff] }
 0x989   :  { %9267 = vmatprep.subr.bf16.mxu0 %v9266_v24  ;;  %v9334_v23 = vpack.c.bf16 %v2534_v22, %v2533_v21 }
 0x98b   :  { %8614 = vmatmul.mubr.msk.f32.vlgmr.msra.gmra.mrb[22].mxu0 %vm433_vm1, %v11482_v51 }
 0x98c   :  { %9269 = vmatpush3.bf16.msra.mxu0 %v9266_v24  ;;  %8639 = vmatprep.mubr.msk.f32.mxu0 %vm433_vm1, %v2414_v13  ;;  %v2529_v13 = vld [vmem:[#allocation11 + $0x2d0] sm:$0xff]  ;;  %v7724_v24 = vld [vmem:[#allocation13 + $0x3] ss:$0 sm:$0xff] }
 0x98d   :  { %9271 = vmatprep.subr.bf16.mxu0 %v9270_v27  ;;  %v9326_v15 = vpack.c.bf16 %v2530_v14, %v2529_v13 }
 0x990   :  { %9273 = vmatpush3.bf16.msra.mxu0 %v9270_v27 }
 0x991   :  { %9275 = vmatprep.subr.bf16.mxu0 %v9274_v30 }
 0x994   :  { %9277 = vmatpush3.bf16.msra.mxu0 %v9274_v30 }
 0x995   :  { %9279 = vmatprep.subr.bf16.mxu0 %v9278_v33 }
 0x998   :  { %9281 = vmatpush3.bf16.msra.mxu0 %v9278_v33  ;;  %v2946_v33 = vld [vmem:[#allocation11 + $0x308] sm:$0xff] }
 0x99b   :  { %8640 = vmatmul.mubr.msk.f32.vlgmr.msra.gmra.mrb[22].mxu0 %vm433_vm1, %v8622_v9  ;;  %v2527_v9 = vld [vmem:[#allocation11 + $0x2c0] sm:$0xff] }
 0x99c   :  { %8691 = vmatprep.mubr.msk.f32.mxu0 %vm1220_vm2, %v11429_v4  ;;  %v9322_v11 = vpack.c.bf16 %v2528_v10, %v2527_v9  ;;  %v7735_v10 = vld [vmem:[#allocation13 + $0x4] ss:$0 sm:$0xff] }
 0xa6e   :  { %v8641_v35 = vpop.f32.mrb[22].mxu0 }
 0xa6f   :  { %v11504_v36 = vadd.f32 %v8641_v35, %v7713_v34  ;;  %v2495_v37 = vpop.f32.mrb[23].mxu0 }
 0xa70   :  { %v10339_v38 = vadd.f32 %v7713_v34, %v2495_v37  ;;  %v2947_v37 = vld [vmem:[#allocation11 + $0x310] sm:$0xff] }
 0xa71   :  { %v2507_v39 = vmax.f32 %v11504_v36, 0.0  ;;  %v9342_v36 = vpack.c.bf16 %v2946_v33, %v2945_v32  ;;  %v3388_v33 = vld [vmem:[#allocation11 + $0x400] sm:$0xff] }
 0xa72   :  { %v2506_v42 = vmax.f32 %v10339_v38, 0.0  ;;  %v2948_v38 = vld [vmem:[#allocation11 + $0x318] sm:$0xff] }
 0xa74   :  { %v9282_v43 = vpack.c.bf16 %v2507_v39, %v2506_v42 }
 0xa76   :  { %9283 = vmatprep.subr.bf16.mxu1 %v9282_v43  ;;  %9319 = vmatprep.subr.bf16.mxu0 %v9282_v43 }
 0xa77   :  { %9285 = vmatpush3.bf16.msra.mxu1 %v9282_v43  ;;  %9321 = vmatpush3.bf16.msra.mxu0 %v9282_v43 }
 0xa78   :  { %9287 = vmatprep.subr.bf16.mxu1 %v9286_v44 }
 0xa7a   :  { %8647 = vmatmul.mubr.msk.f32.vlgmr.msra.gmra.mrb[14].mxu1 %vm1220_vm2, %v11439_v17  ;;  %8692 = vmatmul.mubr.msk.f32.vlgmr.msra.gmra.mrb[24].mxu0 %vm1220_vm2, %v11441_v18 }
 0xa7b   :  { %9289 = vmatpush3.bf16.msra.mxu1 %v9286_v44  ;;  %8717 = vmatprep.mubr.msk.f32.mxu0 %vm1220_vm2, %v11425_v3  ;;  %v2954_v44 = vld [vmem:[#allocation11 + $0x340] sm:$0xff] }
 0xa7c   :  { %9291 = vmatprep.subr.bf16.mxu1 %v9290_v47  ;;  %v9358_v46 = vpack.c.bf16 %v2955_v45, %v2954_v44  ;;  %v3395_v44 = vld [vmem:[#allocation11 + $0x438] sm:$0xff] }
 0xa7f   :  { %9293 = vmatpush3.bf16.msra.mxu1 %v9290_v47  ;;  %v2956_v47 = vld [vmem:[#allocation11 + $0x350] sm:$0xff] }
 0xa80   :  { %9295 = vmatprep.subr.bf16.mxu1 %v9294_v50 }
 0xa83   :  { %9297 = vmatpush3.bf16.msra.mxu1 %v9294_v50 }
 0xa84   :  { %9299 = vmatprep.subr.bf16.mxu1 %v9298_v55 }
 0xa87   :  { %9301 = vmatpush3.bf16.msra.mxu1 %v9298_v55  ;;  %v2958_v55 = vld [vmem:[#allocation11 + $0x360] sm:$0xff] }
 0xa88   :  { %9303 = vmatprep.subr.bf16.mxu1 %v9302_v58  ;;  %v9366_v57 = vpack.c.bf16 %v2959_v56, %v2958_v55  ;;  %v3403_v56 = vld [vmem:[#allocation11 + $0x470] sm:$0xff] }
 0xb4d   :  { %v8648_v12 = vpop.f32.mrb[14].mxu1  ;;  %v8693_v60 = vpop.f32.mrb[24].mxu0 }
 0xb4e   :  { %v2603_v61 = vpop.f32.mrb[15].mxu1  ;;  %v2848_v63 = vpop.f32.mrb[25].mxu0 }
 0xb4f   :  { %8665 = vmatprep.mubr.msk.f32.mxu1 %vm433_vm1, %v2603_v61 }
 0xb50   :  { %8666 = vmatmul.mubr.msk.f32.vlgmr.msra.gmra.mrb[16].mxu1 %vm433_vm1, %v8648_v12  ;;  %v2963_v12 = vld [vmem:[#allocation11 + $0x380] sm:$0xff] }
 0xb51   :  { %9305 = vmatpush3.bf16.msra.mxu1 %v9302_v58  ;;  %8684 = vmatprep.mubr.msk.f32.mxu1 %vm433_vm1, %v2506_v42  ;;  %v2952_v42 = vld [vmem:[#allocation11 + $0x338] sm:$0xff]  ;;  %v2960_v58 = vld [vmem:[#allocation11 + $0x370] sm:$0xff] }
 0xb52   :  { %9307 = vmatprep.subr.bf16.mxu1 %v9306_v62  ;;  %v9354_v43 = vpack.c.bf16 %v2952_v42, %v2951_v41  ;;  %v9370_v59 = vpack.c.bf16 %v2961_v7, %v2960_v58  ;;  %v3393_v41 = vld [vmem:[#allocation11 + $0x428] sm:$0xff]  ;;  %v10904_v7 = vmov 0.0|0.0  }
 0xb55   :  { %9309 = vmatpush3.bf16.msra.mxu1 %v9306_v62  ;;  %v2965_v62 = vld [vmem:[#allocation11 + $0x390] sm:$0xff] }
 0xb56   :  { %9311 = vmatprep.subr.bf16.mxu1 %v9310_v2 }
 0xb59   :  { %9313 = vmatpush3.bf16.msra.mxu1 %v9310_v2  ;;  %v2968_v2 = vld [vmem:[#allocation11 + $0x3a8] sm:$0xff] }
 0xb5a   :  { %9315 = vmatprep.subr.bf16.mxu1 %v9314_v8  ;;  %v9386_v5 = vpack.c.bf16 %v2968_v2, %v2967_v1  ;;  %v7746_v1 = vld [vmem:[#allocation13 + $0x5] ss:$0 sm:$0xff] }
 0xb5d   :  { %9317 = vmatpush3.bf16.msra.mxu1 %v9314_v8  ;;  %v2970_v8 = vld [vmem:[#allocation11 + $0x3b8] sm:$0xff] }
 0xb5e   :  { %9323 = vmatprep.subr.bf16.mxu1 %v9322_v11  ;;  %v9390_v9 = vpack.c.bf16 %v2970_v8, %v2969_v6 }
 0xb60   :  { %8685 = vmatmul.mubr.msk.f32.vlgmr.msra.gmra.mrb[16].mxu1 %vm433_vm1, %v2507_v39  ;;  %v2949_v39 = vld [vmem:[#allocation11 + $0x320] sm:$0xff] }
 0xb61   :  { %9325 = vmatpush3.bf16.msra.mxu1 %v9322_v11  ;;  %8710 = vmatprep.mubr.msk.f32.mxu1 %vm433_vm1, %v2848_v63  ;;  %v2966_v63 = vld [vmem:[#allocation11 + $0x398] sm:$0xff] }
 0xb62   :  { %9327 = vmatprep.subr.bf16.mxu1 %v9326_v15  ;;  %v9382_v0 = vpack.c.bf16 %v2966_v63, %v2965_v62  ;;  %v7757_v62 = vld [vmem:[%s12006_s10 + $0x50] sm:$0xff]  ;;  %v7758_v63 = vld [vmem:[%s12006_s10 + $0x58] sm:$0xff] }
 0xb65   :  { %9329 = vmatpush3.bf16.msra.mxu1 %v9326_v15 }
 0xb66   :  { %9331 = vmatprep.subr.bf16.mxu1 %v9330_v20 }
 0xb69   :  { %9333 = vmatpush3.bf16.msra.mxu1 %v9330_v20  ;;  %v3380_v20 = vld [vmem:[#allocation11 + $0x3c8] sm:$0xff] }
 0xb6a   :  { %9335 = vmatprep.subr.bf16.mxu1 %v9334_v23 }
 0xb6d   :  { %9337 = vmatpush3.bf16.msra.mxu1 %v9334_v23  ;;  %v9398_v23 = vpack.c.bf16 %v3380_v20, %v3379_v19  ;;  %v3818_v19 = vld [vmem:[%s12006_s10 + $0x8] sm:$0xff]  ;;  %v3819_v20 = vld [vmem:[%s12006_s10 + $0x10] sm:$0xff] }
 0xb70   :  { %8711 = vmatmul.mubr.msk.f32.vlgmr.msra.gmra.mrb[16].mxu1 %vm433_vm1, %v8693_v60  ;;  %v2964_v60 = vld [vmem:[#allocation11 + $0x388] sm:$0xff] }
 0xb71   :  { %8762 = vmatprep.mubr.msk.f32.mxu1 %vm1220_vm2, %v11429_v4  ;;  %v9378_v61 = vpack.c.bf16 %v2964_v60, %v2963_v12  ;;  %v7755_v12 = vld [vmem:[%s12006_s10 + $0x40] sm:$0xff]  ;;  %v7756_v60 = vld [vmem:[%s12006_s10 + $0x48] sm:$0xff] }
 0xc43   :  { %v8712_v25 = vpop.f32.mrb[16].mxu1 }
 0xc44   :  { %v10340_v26 = vadd.f32 %v8712_v25, %v7724_v24  ;;  %v2929_v27 = vpop.f32.mrb[17].mxu1  ;;  %v3382_v25 = vld [vmem:[#allocation11 + $0x3d8] sm:$0xff] }
 0xc45   :  { %v10341_v28 = vadd.f32 %v7724_v24, %v2929_v27  ;;  %v3381_v24 = vld [vmem:[#allocation11 + $0x3d0] sm:$0xff]  ;;  %v3384_v27 = vld [vmem:[#allocation11 + $0x3e8] sm:$0xff] }
 0xc46   :  { %v2941_v29 = vadd.f32 %v10340_v26, %v11482_v51  ;;  %v9346_v51 = vpack.c.bf16 %v2948_v38, %v2947_v37  ;;  %v3383_v26 = vld [vmem:[#allocation11 + $0x3e0] sm:$0xff]  ;;  %v3390_v37 = vld [vmem:[#allocation11 + $0x410] sm:$0xff] }
 0xc47   :  { %v2940_v30 = vadd.f32 %v10341_v28, %v11484_v54  ;;  %v2950_v54 = vld [vmem:[#allocation11 + $0x328] sm:$0xff]  ;;  %v9406_v28 = vpack.c.bf16 %v3384_v27, %v3383_v26 }
 0xc48   :  { %v11527_v31 = vmax.f32 %v2941_v29, 0.0  ;;  %v9350_v40 = vpack.c.bf16 %v2950_v54, %v2949_v39  ;;  %v3385_v29 = vld [vmem:[#allocation11 + $0x3f0] sm:$0xff]  ;;  %v7760_v26 = vld [vmem:[%s12006_s10 + $0x68] sm:$0xff] }
 0xc49   :  { %v11529_v34 = vmax.f32 %v2940_v30, 0.0  ;;  %v3386_v30 = vld [vmem:[#allocation11 + $0x3f8] sm:$0xff] }
 0xc4a   :  { %v9410_v32 = vpack.c.bf16 %v3386_v30, %v3385_v29  ;;  %v3824_v29 = vld [vmem:[%s12006_s10 + $0x38] sm:$0xff]  ;;  %v7761_v30 = vld [vmem:[%s12006_s10 + $0x70] sm:$0xff] }
 0xc4b   :  { %v9338_v35 = vpack.c.bf16 %v11527_v31, %v11529_v34 }
 0xc4d   :  { %9339 = vmatprep.subr.bf16.mxu0 %v9338_v35  ;;  %9375 = vmatprep.subr.bf16.mxu1 %v9338_v35 }
 0xc4e   :  { %9341 = vmatpush3.bf16.msra.mxu0 %v9338_v35  ;;  %9377 = vmatpush3.bf16.msra.mxu1 %v9338_v35  ;;  %v3389_v35 = vld [vmem:[#allocation11 + $0x408] sm:$0xff] }
 0xc4f   :  { %9343 = vmatprep.subr.bf16.mxu0 %v9342_v36 }
 0xc51   :  { %8718 = vmatmul.mubr.msk.f32.vlgmr.msra.gmra.mrb[26].mxu0 %vm1220_vm2, %v11439_v17  ;;  %8763 = vmatmul.mubr.msk.f32.vlgmr.msra.gmra.mrb[18].mxu1 %vm1220_vm2, %v11441_v18 }
 0xc52   :  { %9345 = vmatpush3.bf16.msra.mxu0 %v9342_v36  ;;  %8788 = vmatprep.mubr.msk.f32.mxu1 %vm1220_vm2, %v11425_v3  ;;  %v9362_v3 = vpack.c.bf16 %v2957_v48, %v2956_v47  ;;  %v9414_v36 = vpack.c.bf16 %v3389_v35, %v3388_v33  ;;  %v3398_v47 = vld [vmem:[#allocation11 + $0x448] sm:$0xff]  ;;  %v7762_v33 = vld [vmem:[%s12006_s10 + $0x78] sm:$0xff] }
 0xc53   :  { %9347 = vmatprep.subr.bf16.mxu0 %v9346_v51  ;;  %v9478_v35 = vpack.c.bf16 %v7762_v33, %v7761_v30  ;;  %v4594_v30 = vld [vmem:[#allocation22 + $0x8] sm:$0xff] }
 0xc56   :  { %9349 = vmatpush3.bf16.msra.mxu0 %v9346_v51 }
 0xc57   :  { %9351 = vmatprep.subr.bf16.mxu0 %v9350_v40 }
 0xc5a   :  { %9353 = vmatpush3.bf16.msra.mxu0 %v9350_v40  ;;  %v3392_v40 = vld [vmem:[#allocation11 + $0x420] sm:$0xff] }
 0xc5b   :  { %9355 = vmatprep.subr.bf16.mxu0 %v9354_v43  ;;  %v9422_v42 = vpack.c.bf16 %v3393_v41, %v3392_v40 }
 0xc5e   :  { %9357 = vmatpush3.bf16.msra.mxu0 %v9354_v43  ;;  %v3394_v43 = vld [vmem:[#allocation11 + $0x430] sm:$0xff] }
 0xc5f   :  { %9359 = vmatprep.subr.bf16.mxu0 %v9358_v46  ;;  %v9426_v45 = vpack.c.bf16 %v3395_v44, %v3394_v43  ;;  %v4125_v44 = vld [vmem:[#allocation16] sm:$0xff] }
 0xd24   :  { %v8719_v49 = vpop.f32.mrb[26].mxu0  ;;  %v8764_v50 = vpop.f32.mrb[18].mxu1 }
 0xd25   :  { %v3039_v52 = vpop.f32.mrb[27].mxu0  ;;  %v3284_v53 = vpop.f32.mrb[19].mxu1 }
 0xd26   :  { %8736 = vmatprep.mubr.msk.f32.mxu0 %vm433_vm1, %v3039_v52 }
 0xd27   :  { %8737 = vmatmul.mubr.msk.f32.vlgmr.msra.gmra.mrb[28].mxu0 %vm433_vm1, %v8719_v49  ;;  %v3399_v49 = vld [vmem:[#allocation11 + $0x450] sm:$0xff] }
 0xd28   :  { %9361 = vmatpush3.bf16.msra.mxu0 %v9358_v46  ;;  %8755 = vmatprep.mubr.msk.f32.mxu0 %vm433_vm1, %v11529_v34  ;;  %v3397_v46 = vld [vmem:[#allocation11 + $0x440] sm:$0xff] }
 0xd29   :  { %9363 = vmatprep.subr.bf16.mxu0 %v9362_v3  ;;  %v9434_v48 = vpack.c.bf16 %v3398_v47, %v3397_v46  ;;  %v4130_v47 = vld [vmem:[#allocation17 + $0x10] sm:$0xff] }
 0xd2c   :  { %9365 = vmatpush3.bf16.msra.mxu0 %v9362_v3  ;;  %v3401_v3 = vld [vmem:[#allocation11 + $0x460] sm:$0xff] }
 0xd2d   :  { %9367 = vmatprep.subr.bf16.mxu0 %v9366_v57 }
 0xd30   :  { %9369 = vmatpush3.bf16.msra.mxu0 %v9366_v57  ;;  %v3404_v57 = vld [vmem:[#allocation11 + $0x478] sm:$0xff] }
 0xd31   :  { %9371 = vmatprep.subr.bf16.mxu0 %v9370_v59  ;;  %v9446_v58 = vpack.c.bf16 %v3404_v57, %v3403_v56 }
 0xd34   :  { %9373 = vmatpush3.bf16.msra.mxu0 %v9370_v59  ;;  %v10906_v59 = vmov 0.0  }
 0xd35   :  { %9379 = vmatprep.subr.bf16.mxu0 %v9378_v61 }
 0xd37   :  { %8756 = vmatmul.mubr.msk.f32.vlgmr.msra.gmra.mrb[28].mxu0 %vm433_vm1, %v11527_v31 }
 0xd38   :  { %9381 = vmatpush3.bf16.msra.mxu0 %v9378_v61  ;;  %8781 = vmatprep.mubr.msk.f32.mxu0 %vm433_vm1, %v3284_v53  ;;  %v3402_v53 = vld [vmem:[#allocation11 + $0x468] sm:$0xff]  ;;  %v9469_v61 = vpack.c.bf16 %v7756_v60, %v7755_v12 }
 0xd39   :  { %9383 = vmatprep.subr.bf16.mxu0 %v9382_v0  ;;  %v9442_v55 = vpack.c.bf16 %v3402_v53, %v3401_v3  ;;  %v4135_v53 = vld [vmem:[#allocation17 + $0x30] sm:$0xff] }
 0xd3c   :  { %9385 = vmatpush3.bf16.msra.mxu0 %v9382_v0  ;;  %v9472_v0 = vpack.c.bf16 %v7758_v63, %v7757_v62  ;;  %v4139_v62 = vld [vmem:[#allocation17 + $0x48] sm:$0xff] }
 0xd3d   :  { %9387 = vmatprep.subr.bf16.mxu0 %v9386_v5 }
 0xd40   :  { %9389 = vmatpush3.bf16.msra.mxu0 %v9386_v5 }
 0xd41   :  { %9391 = vmatprep.subr.bf16.mxu0 %v9390_v9 }
 0xd44   :  { %9393 = vmatpush3.bf16.msra.mxu0 %v9390_v9 }
 0xd47   :  { %8782 = vmatmul.mubr.msk.f32.vlgmr.msra.gmra.mrb[28].mxu0 %vm433_vm1, %v8764_v50  ;;  %v3400_v50 = vld [vmem:[#allocation11 + $0x458] sm:$0xff] }
 0xd48   :  { %8833 = vmatprep.mubr.msk.f32.mxu0 %vm1220_vm2, %v11429_v4  ;;  %v9402_v4 = vpack.c.bf16 %v3382_v25, %v3381_v24  ;;  %v9438_v52 = vpack.c.bf16 %v3400_v50, %v3399_v49  ;;  %v3822_v24 = vld [vmem:[%s12006_s10 + $0x28] sm:$0xff]  ;;  %v7759_v25 = vld [vmem:[%s12006_s10 + $0x60] sm:$0xff] }
 0xd49   :  { %v9475_v27 = vpack.c.bf16 %v7760_v26, %v7759_v25  ;;  %v4133_v50 = vld [vmem:[#allocation17 + $0x20] sm:$0xff] }
 0xd4a   :  { %v4652_v25 = vld [vmem:[#allocation22 + $0x1d8] sm:$0xff]  ;;  %v4643_v26 = vld [vmem:[#allocation22 + $0x190] sm:$0xff] }
 0xe1a   :  { %v8783_v11 = vpop.f32.mrb[28].mxu0 }
 0xe1b   :  { %v11549_v13 = vadd.f32 %v8783_v11, %v7735_v10  ;;  %v3365_v14 = vpop.f32.mrb[29].mxu0 }
 0xe1c   :  { %v10343_v15 = vadd.f32 %v7735_v10, %v3365_v14 }
 0xe1d   :  { %v3377_v16 = vmax.f32 %v11549_v13, 0.0 }
 0xe1e   :  { %v3376_v21 = vmax.f32 %v10343_v15, 0.0  ;;  %v3814_v15 = vld [vmem:[#allocation14] sm:$0xff] }
 0xe20   :  { %v9394_v22 = vpack.c.bf16 %v3377_v16, %v3376_v21 }
 0xe22   :  { %9395 = vmatprep.subr.bf16.mxu1 %v9394_v22  ;;  %9431 = vmatprep.subr.bf16.mxu0 %v9394_v22 }
 0xe23   :  { %9397 = vmatpush3.bf16.msra.mxu1 %v9394_v22  ;;  %9433 = vmatpush3.bf16.msra.mxu0 %v9394_v22 }
 0xe24   :  { %9399 = vmatprep.subr.bf16.mxu1 %v9398_v23  ;;  %9450 = vmatprep.subr.bf16.mxu0 %v10904_v7 }
 0xe26   :  { %8789 = vmatmul.mubr.msk.f32.vlgmr.msra.gmra.mrb[20].mxu1 %vm1220_vm2, %v11439_v17  ;;  %8834 = vmatmul.mubr.msk.f32.vlgmr.msra.gmra.mrb[30].mxu0 %vm1220_vm2, %v11441_v18  ;;  %v3391_v17 = vld [vmem:[#allocation11 + $0x418] sm:$0xff] }
 0xe27   :  { %9401 = vmatpush3.bf16.msra.mxu1 %v9398_v23  ;;  %v9418_v39 = vpack.c.bf16 %v3391_v17, %v3390_v37  ;;  %8859 = vmatprep.mubr.msk.f32.mxu0 %vm10905_vm3, %v10906_v59  ;;  %v3821_v23 = vld [vmem:[%s12006_s10 + $0x20] sm:$0xff] }
 0xe28   :  { %9403 = vmatprep.subr.bf16.mxu1 %v9402_v4 }
 0xe2b   :  { %9405 = vmatpush3.bf16.msra.mxu1 %v9402_v4  ;;  %v9463_v4 = vpack.c.bf16 %v3822_v24, %v3821_v23  ;;  %v4644_v24 = vld [vmem:[#allocation22 + $0x198] sm:$0xff] }
 0xe2c   :  { %9407 = vmatprep.subr.bf16.mxu1 %v9406_v28 }
 0xe2f   :  { %9409 = vmatpush3.bf16.msra.mxu1 %v9406_v28  ;;  %v3823_v28 = vld [vmem:[%s12006_s10 + $0x30] sm:$0xff] }
 0xe30   :  { %9411 = vmatprep.subr.bf16.mxu1 %v9410_v32 }
 0xe33   :  { %9413 = vmatpush3.bf16.msra.mxu1 %v9410_v32  ;;  %v9466_v32 = vpack.c.bf16 %v3824_v29, %v3823_v28  ;;  %v7768_v29 = vld [vmem:[#allocation19] ss:$0 sm:$0xff] }
 0xe34   :  { %9415 = vmatprep.subr.bf16.mxu1 %v9414_v36 }
 0xef9   :  { %v8790_v38 = vpop.f32.mrb[20].mxu1  ;;  %v8835_v51 = vpop.f32.mrb[30].mxu0 }
 0xefa   :  { %v3473_v18 = vpop.f32.mrb[21].mxu1  ;;  %v3718_v54 = vpop.f32.mrb[31].mxu0 }
 0xefb   :  { %8807 = vmatprep.mubr.msk.f32.mxu1 %vm433_vm1, %v3473_v18  ;;  %v4128_v18 = vld [vmem:[#allocation17] sm:$0xff] }
 0xefc   :  { %8808 = vmatmul.mubr.msk.f32.vlgmr.msra.gmra.mrb[22].mxu1 %vm433_vm1, %v8790_v38 }
 0xefd   :  { %9417 = vmatpush3.bf16.msra.mxu1 %v9414_v36  ;;  %8826 = vmatprep.mubr.msk.f32.mxu1 %vm433_vm1, %v3376_v21  ;;  %v3820_v21 = vld [vmem:[%s12006_s10 + $0x18] sm:$0xff] }
 0xefe   :  { %9419 = vmatprep.subr.bf16.mxu1 %v9418_v39  ;;  %v9460_v22 = vpack.c.bf16 %v3820_v21, %v3819_v20  ;;  %v4627_v21 = vld [vmem:[#allocation22 + $0x110] sm:$0xff] }
 0xf01   :  { %9421 = vmatpush3.bf16.msra.mxu1 %v9418_v39  ;;  %v4129_v39 = vld [vmem:[#allocation17 + $0x8] sm:$0xff] }
 0xf02   :  { %9423 = vmatprep.subr.bf16.mxu1 %v9422_v42  ;;  %v9481_v46 = vpack.c.bf16 %v4129_v39, %v4128_v18 }
 0xf05   :  { %9425 = vmatpush3.bf16.msra.mxu1 %v9422_v42 }
 0xf06   :  { %9427 = vmatprep.subr.bf16.mxu1 %v9426_v45 }
 0xf09   :  { %9429 = vmatpush3.bf16.msra.mxu1 %v9426_v45  ;;  %v4127_v45 = vld [vmem:[#allocation16 + $0x8] sm:$0xff] }
 0xf0a   :  { %9435 = vmatprep.subr.bf16.mxu1 %v9434_v48 }
 0xf0c   :  { %8827 = vmatmul.mubr.msk.f32.vlgmr.msra.gmra.mrb[22].mxu1 %vm433_vm1, %v3377_v16  ;;  %v3817_v16 = vld [vmem:[%s12006_s10] sm:$0xff] }
 0xf0d   :  { %9437 = vmatpush3.bf16.msra.mxu1 %v9434_v48  ;;  %8852 = vmatprep.mubr.msk.f32.mxu1 %vm433_vm1, %v3718_v54  ;;  %v4131_v48 = vld [vmem:[#allocation17 + $0x18] sm:$0xff] }
 0xf0e   :  { %9439 = vmatprep.subr.bf16.mxu1 %v9438_v52  ;;  %v9484_v49 = vpack.c.bf16 %v4131_v48, %v4130_v47  ;;  %v4625_v48 = vld [vmem:[#allocation22 + $0x100] sm:$0xff] }
 0xf11   :  { %9441 = vmatpush3.bf16.msra.mxu1 %v9438_v52  ;;  %v4134_v52 = vld [vmem:[#allocation17 + $0x28] sm:$0xff] }
 0xf12   :  { %9443 = vmatprep.subr.bf16.mxu1 %v9442_v55  ;;  %v9487_v3 = vpack.c.bf16 %v4134_v52, %v4133_v50  ;;  %v4642_v50 = vld [vmem:[#allocation22 + $0x188] sm:$0xff] }
 0xf13   :  { %v4650_v52 = vld [vmem:[#allocation22 + $0x1c8] sm:$0xff] }
 0xf15   :  { %9445 = vmatpush3.bf16.msra.mxu1 %v9442_v55  ;;  %v4136_v55 = vld [vmem:[#allocation17 + $0x38] sm:$0xff] }
 0xf16   :  { %9447 = vmatprep.subr.bf16.mxu1 %v9446_v58  ;;  %v9490_v60 = vpack.c.bf16 %v4136_v55, %v4135_v53  ;;  %v9510_v53 = vpack.c.bf16 %v4650_v52, %v4642_v50  ;;  %v4641_v55 = vld [vmem:[#allocation22 + $0x180] sm:$0xff]  ;;  %v5071_v50 = vld [vmem:[#allocation22 + $0x210] sm:$0xff] }
 0xf17   :  { %v5079_v52 = vld [vmem:[#allocation22 + $0x250] sm:$0xff] }
 0xf19   :  { %9449 = vmatpush3.bf16.msra.mxu1 %v9446_v58 }
 0xf1a   :  { %9468 = vmatprep.subr.bf16.mxu1 %v10904_v7 }
 0xf1c   :  { %8853 = vmatmul.mubr.msk.f32.vlgmr.msra.gmra.mrb[22].mxu1 %vm433_vm1, %v8835_v51 }
 0xf1d   :  { %8904 = vmatprep.mubr.msk.f32.mxu1 %vm10905_vm3, %v10906_v59  ;;  %9470 = vmatpush3.bf16.msra.mxu1 %v9469_v61  ;;  %v4138_v61 = vld [vmem:[#allocation17 + $0x40] sm:$0xff] }
 0xf1e   :  { %9471 = vmatprep.subr.bf16.mxu1 %v10904_v7  ;;  %v9493_v63 = vpack.c.bf16 %v4139_v62, %v4138_v61  ;;  %v4608_v62 = vld [vmem:[#allocation22 + $0x78] sm:$0xff] }
 0xf21   :  { %9473 = vmatpush3.bf16.msra.mxu1 %v9472_v0  ;;  %v4140_v0 = vld [vmem:[#allocation17 + $0x50] sm:$0xff] }
 0xf22   :  { %9474 = vmatprep.subr.bf16.mxu1 %v10904_v7 }
 0xf25   :  { %9476 = vmatpush3.bf16.msra.mxu1 %v9475_v27  ;;  %v4651_v27 = vld [vmem:[#allocation22 + $0x1d0] sm:$0xff] }
 0xf26   :  { %9477 = vmatprep.subr.bf16.mxu1 %v10904_v7  ;;  %v9528_v28 = vpack.c.bf16 %v4651_v27, %v4643_v26  ;;  %v4629_v26 = vld [vmem:[#allocation22 + $0x120] sm:$0xff] }
 0xf27   :  { %v4637_v27 = vld [vmem:[#allocation22 + $0x160] sm:$0xff] }
 0xf29   :  { %9479 = vmatpush3.bf16.msra.mxu1 %v9478_v35  ;;  %v4593_v35 = vld [vmem:[#allocation22] sm:$0xff] }
 0xf2a   :  { %8934 = vmatprep.subr.mxu1 %v10906_v59 }
 0xfef   :  { %v8854_v2 = vpop.f32.mrb[22].mxu1 }
 0xff0   :  { %v10344_v5 = vadd.f32 %v8854_v2, %v7746_v1  ;;  %v3799_v6 = vpop.f32.mrb[23].mxu1 }
 0xff1   :  { %v10345_v8 = vadd.f32 %v7746_v1, %v3799_v6  ;;  %v4141_v1 = vld [vmem:[#allocation17 + $0x58] sm:$0xff]  ;;  %v4604_v6 = vld [vmem:[#allocation22 + $0x58] sm:$0xff] }
 0xff2   :  { %v3811_v9 = vadd.f32 %v10344_v5, %v11527_v31  ;;  %v3816_v31 = vld [vmem:[#allocation14 + $0x8] sm:$0xff]  ;;  %v9496_v2 = vpack.c.bf16 %v4141_v1, %v4140_v0 }
 0xff3   :  { %v3810_v10 = vadd.f32 %v10345_v8, %v11529_v34  ;;  %v9457_v34 = vpack.c.bf16 %v3818_v19, %v3817_v16  ;;  %v4596_v5 = vld [vmem:[#allocation22 + $0x18] sm:$0xff]  ;;  %v4611_v16 = vld [vmem:[#allocation22 + $0x90] sm:$0xff]  ;;  %v4597_v0 = vld [vmem:[#allocation22 + $0x20] sm:$0xff] }
 0xff4   :  { %v3813_v11 = vmax.f32 %v3811_v9, 0.0  ;;  %v9514_v8 = vpack.c.bf16 %v4604_v6, %v4596_v5  ;;  %v4595_v9 = vld [vmem:[#allocation22 + $0x10] sm:$0xff]  ;;  %v4605_v1 = vld [vmem:[#allocation22 + $0x60] sm:$0xff]  ;;  %v4614_v6 = vld [vmem:[#allocation22 + $0xa8] sm:$0xff] }
 0xff5   :  { %v3812_v13 = vmax.f32 %v3810_v10, 0.0  ;;  %v4603_v10 = vld [vmem:[#allocation22 + $0x50] sm:$0xff] }
 0xff6   :  { %v4619_v19 = vld [vmem:[#allocation22 + $0xd0] sm:$0xff] }
 0xff7   :  { %v9451_v14 = vpack.c.bf16 %v3813_v11, %v3812_v13  ;;  %v9516_v11 = vpack.c.bf16 %v4603_v10, %v4595_v9  ;;  %v4612_v13 = vld [vmem:[#allocation22 + $0x98] sm:$0xff]  ;;  %v4607_v5 = vld [vmem:[#allocation22 + $0x70] sm:$0xff] }
 0xff8   :  { %v4616_v9 = vld [vmem:[#allocation22 + $0xb8] sm:$0xff] }
 0xff9   :  { %9452 = vmatpush3.bf16.msra.mxu0 %v9451_v14  ;;  %v4624_v10 = vld [vmem:[#allocation22 + $0xf8] sm:$0xff] }
 0xffa   :  { %9453 = vmatprep.subr.bf16.mxu0 %v10904_v7 }
 0xffc   :  { %8860 = vmatmul.mubr.msk.f32.vlgmr.msra.gmra.mrb[32].mxu0 %vm1220_vm2, %v3814_v15 }
 0xffd   :  { %9455 = vmatpush3.bf16.msra.mxu0 %v9451_v14  ;;  %8866 = vmatprep.mubr.msk.f32.mxu0 %vm10905_vm3, %v10906_v59  ;;  %v4620_v14 = vld [vmem:[#allocation22 + $0xd8] sm:$0xff] }
 0xffe   :  { %9456 = vmatprep.subr.bf16.mxu0 %v10904_v7  ;;  %v9518_v15 = vpack.c.bf16 %v4620_v14, %v4612_v13  ;;  %v4613_v14 = vld [vmem:[#allocation22 + $0xa0] sm:$0xff] }
0x1000   :  { %8867 = vmatmul.mubr.msk.f32.vlgmr.msra.gmra.mrb[34].mxu0 %vm1220_vm2, %v3816_v31  ;;  %v4628_v31 = vld [vmem:[#allocation22 + $0x118] sm:$0xff] }
0x1001   :  { %9458 = vmatpush3.bf16.msra.mxu0 %v9457_v34  ;;  %8885 = vmatprep.mubr.msk.f32.mxu0 %vm10905_vm3, %v10906_v59  ;;  %v4636_v34 = vld [vmem:[#allocation22 + $0x158] sm:$0xff] }
0x1002   :  { %9459 = vmatprep.subr.bf16.mxu0 %v10904_v7  ;;  %v9522_v20 = vpack.c.bf16 %v4636_v34, %v4628_v31  ;;  %v4623_v31 = vld [vmem:[#allocation22 + $0xf0] sm:$0xff]  ;;  %v4630_v34 = vld [vmem:[#allocation22 + $0x128] sm:$0xff] }
0x1005   :  { %9461 = vmatpush3.bf16.msra.mxu0 %v9460_v22  ;;  %v4635_v22 = vld [vmem:[#allocation22 + $0x150] sm:$0xff] }
0x1006   :  { %9462 = vmatprep.subr.bf16.mxu0 %v10904_v7  ;;  %v9524_v23 = vpack.c.bf16 %v4635_v22, %v4627_v21  ;;  %v4638_v21 = vld [vmem:[#allocation22 + $0x168] sm:$0xff]  ;;  %v4632_v22 = vld [vmem:[#allocation22 + $0x138] sm:$0xff] }
0x1009   :  { %9464 = vmatpush3.bf16.msra.mxu0 %v9463_v4  ;;  %v9526_v4 = vpack.c.bf16 %v4652_v25, %v4644_v24 }
0x100a   :  { %9465 = vmatprep.subr.bf16.mxu0 %v10904_v7 }
0x100d   :  { %9467 = vmatpush3.bf16.msra.mxu0 %v9466_v32  ;;  %v4602_v32 = vld [vmem:[#allocation22 + $0x48] sm:$0xff] }
0x100e   :  { %8907 = vmatprep.subr.mxu0 %v10906_v59  ;;  %v9498_v18 = vpack.c.bf16 %v4602_v32, %v4594_v30  ;;  %v4631_v30 = vld [vmem:[#allocation22 + $0x130] sm:$0xff] }
0x100f   :  { %v4639_v32 = vld [vmem:[#allocation22 + $0x170] sm:$0xff] }
0x10cf   :  { %v3903_v36 = vpop.f32.mrb[32].mxu0 }
0x10d0   :  { %v8861_v37 = vpop.f32.mrb[33].mxu0 }
0x10d3   :  { %v3976_v17 = vpop.f32.mrb[34].mxu0 }
0x10d4   :  { %v3980_v38 = vmax.f32 %v3903_v36, %v3976_v17  ;;  %v8868_v51 = vpop.f32.mrb[35].mxu0  ;;  %v4601_v36 = vld [vmem:[#allocation22 + $0x40] sm:$0xff] }
0x10d5   :  { %v4618_v51 = vld [vmem:[#allocation22 + $0xc8] sm:$0xff] }
0x10d6   :  { %8886 = vmatmul.mubr.msk.f32.vlgmr.msra.gmra.mrb[36].mxu0 %vm433_vm1, %v3980_v38  ;;  %8905 = vmatmul.mubr.msk.f32.vlgmr.msra.gmra.mrb[24].mxu1 %vm433_vm1, %v3980_v38  ;;  %v4610_v38 = vld [vmem:[#allocation22 + $0x88] sm:$0xff] }
0x10d7   :  { %8909 = vmatprep.mubr.msk.f32.mxu0 %vm10905_vm3, %v10906_v59  ;;  %8936 = vmatprep.mubr.msk.f32.mxu1 %vm10905_vm3, %v10906_v59 }
0x11a9   :  { %v4050_v54 = vpop.f32.mrb[36].mxu0  ;;  %v4120_v40 = vpop.f32.mrb[24].mxu1 }
0x11aa   :  { %v4124_v41 = vmax.f32 %v4050_v54, %v4120_v40  ;;  %v8887_v42 = vpop.f32.mrb[37].mxu0  ;;  %v8906_v43 = vpop.f32.mrb[25].mxu1  ;;  %v4519_v54 = vld [vmem:[#allocation20] sm:$0x3]  ;;  %v9500_v40 = vpack.c.bf16 %v4601_v36, %v4593_v35  ;;  %v4654_v35 = vld [vmem:[#allocation22 + $0x1e8] sm:$0xff] }
0x11ab   :  { %v4609_v42 = vld [vmem:[#allocation22 + $0x80] sm:$0xff]  ;;  %v4648_v36 = vld [vmem:[#allocation22 + $0x1b8] sm:$0xff] }
0x11ac   :  { %8908 = vmatpush3.msra.mxu0 %v4124_v41  ;;  %8935 = vmatpush3.msra.mxu1 %v4124_v41  ;;  %v4617_v43 = vld [vmem:[#allocation22 + $0xc0] sm:$0xff] }
0x11ad   :  { %8910 = vmatmul.mubr.msk.f32.vlgmr.msra.gmra.mrb[38].mxu0 %vm4143_vm4, %v4125_v44  ;;  %8937 = vmatmul.mubr.msk.f32.vlgmr.msra.gmra.mrb[26].mxu1 %vm4143_vm4, %v4127_v45  ;;  %v4626_v44 = vld [vmem:[#allocation22 + $0x108] sm:$0xff] }
0x11ae   :  { %9480 = vmatprep.subr.bf16.mxu0 %v10904_v7  ;;  %8920 = vmatprep.mubr.msk.f32.mxu0 %vm10905_vm3, %v10906_v59  ;;  %v4634_v45 = vld [vmem:[#allocation22 + $0x148] sm:$0xff] }
0x11af   :  { %9482 = vmatpush3.bf16.msra.mxu0 %v9481_v46  ;;  %8950 = vmatprep.subr.mxu1 %v10906_v59  ;;  %v9504_v46 = vpack.c.bf16 %v4617_v43, %v4609_v42  ;;  %v9506_v47 = vpack.c.bf16 %v4634_v45, %v4626_v44  ;;  %v4655_v42 = vld [vmem:[#allocation22 + $0x1f0] sm:$0xff]  ;;  %v5072_v43 = vld [vmem:[#allocation22 + $0x218] sm:$0xff] }
0x11b0   :  { %9483 = vmatprep.subr.bf16.mxu0 %v10904_v7  ;;  %8952 = vmatprep.mubr.msk.f32.mxu1 %vm10905_vm3, %v10906_v59  ;;  %v5080_v44 = vld [vmem:[#allocation22 + $0x258] sm:$0xff] }
0x11b3   :  { %9485 = vmatpush3.bf16.msra.mxu0 %v9484_v49  ;;  %v4633_v49 = vld [vmem:[#allocation22 + $0x140] sm:$0xff] }
0x11b4   :  { %9486 = vmatprep.subr.bf16.mxu0 %v10904_v7 }
0x1280   :  { %v4213_v56 = vpop.f32.mrb[38].mxu0  ;;  %v4439_v57 = vpop.f32.mrb[26].mxu1 }
0x1281   :  { %v8911_v58 = vpop.f32.mrb[39].mxu0  ;;  %8921 = vmatmul.mubr.msk.f32.vlgmr.msra.gmra.mrb[40].mxu0 %vm329_vm0, %v4213_v56  ;;  %v8938_v12 = vpop.f32.mrb[27].mxu1  ;;  %v4649_v56 = vld [vmem:[#allocation22 + $0x1c0] sm:$0xff] }
0x1282   :  { %9488 = vmatpush3.bf16.msra.mxu0 %v9487_v3  ;;  %8931 = vmatprep.mubr.msk.f32.mxu0 %vm10905_vm3, %v10906_v59  ;;  %v9508_v3 = vpack.c.bf16 %v4633_v49, %v4625_v48  ;;  %v4598_v58 = vld [vmem:[#allocation22 + $0x28] sm:$0xff]  ;;  %v9578_v48 = vpack.c.bf16 %v5080_v44, %v5072_v43  ;;  %v5092_v44 = vld [vmem:[#allocation22 + $0x2b8] sm:$0xff] }
0x1283   :  { %9489 = vmatprep.subr.bf16.mxu0 %v10904_v7  ;;  %v4606_v12 = vld [vmem:[#allocation22 + $0x68] sm:$0xff] }
0x1284   :  { %v9530_v61 = vpack.c.bf16 %v4606_v12, %v4598_v58  ;;  %v5078_v49 = vld [vmem:[#allocation22 + $0x248] sm:$0xff]  ;;  %v9580_v58 = vpack.c.bf16 %v5079_v52, %v5071_v50 }
0x1285   :  { %v5086_v12 = vld [vmem:[#allocation22 + $0x288] sm:$0xff] }
0x1286   :  { %9491 = vmatpush3.bf16.msra.mxu0 %v9490_v60  ;;  %v4600_v60 = vld [vmem:[#allocation22 + $0x38] sm:$0xff]  ;;  %v5098_v43 = vld [vmem:[#allocation22 + $0x2e8] sm:$0xff] }
0x1287   :  { %9492 = vmatprep.subr.bf16.mxu0 %v10904_v7 }
0x1289   :  { %8932 = vmatmul.mubr.msk.f32.vlgmr.msra.gmra.mrb[40].mxu0 %vm329_vm0, %v4124_v41  ;;  %v9502_v41 = vpack.c.bf16 %v4618_v51, %v4610_v38  ;;  %v9556_v38 = vpack.c.bf16 %v4639_v32, %v4631_v30  ;;  %v4645_v51 = vld [vmem:[#allocation22 + $0x1a0] sm:$0xff] }
0x128a   :  { %9494 = vmatpush3.bf16.msra.mxu0 %v9493_v63  ;;  %8947 = vmatprep.mubr.msk.f32.mxu0 %vm10905_vm3, %v10906_v59  ;;  %v9546_v63 = vpack.c.bf16 %v4608_v62, %v4600_v60  ;;  %v5094_v60 = vld [vmem:[#allocation22 + $0x2c8] sm:$0xff]  ;;  %v5087_v62 = vld [vmem:[#allocation22 + $0x290] sm:$0xff]  ;;  %v5125_v30 = vld [vmem:[#allocation22 + $0x3c0] sm:$0xff] }
0x128b   :  { %9495 = vmatprep.subr.bf16.mxu0 %v10904_v7  ;;  %v9520_v7 = vpack.c.bf16 %v4619_v19, %v4611_v16  ;;  %v9550_v19 = vpack.c.bf16 %v4624_v10, %v4616_v9  ;;  %v5093_v9 = vld [vmem:[#allocation22 + $0x2c0] sm:$0xff] }
0x128e   :  { %9497 = vmatpush3.bf16.msra.mxu0 %v9496_v2  ;;  %v4599_v2 = vld [vmem:[#allocation22 + $0x30] sm:$0xff] }
0x128f   :  { %9515 = vmatprep.subr.bf16.mxu0 %v9514_v8  ;;  %v4622_v8 = vld [vmem:[#allocation22 + $0xe8] sm:$0xff]  ;;  %v9548_v13 = vpack.c.bf16 %v4607_v5, %v4599_v2  ;;  %v4994_v2 = vld [vmem:[#allocation20 + $0x2] sm:$0x3] }
0x1290   :  { %v9534_v16 = vpack.c.bf16 %v4622_v8, %v4614_v6  ;;  %v9566_v6 = vpack.c.bf16 %v5094_v60, %v5086_v12  ;;  %v5085_v8 = vld [vmem:[#allocation22 + $0x280] sm:$0xff]  ;;  %v5116_v12 = vld [vmem:[#allocation22 + $0x378] sm:$0xff] }
0x1291   :  { %8948 = vmatmul.mubr.msk.f32.vlgmr.msra.gmra.mrb[40].mxu0 %vm329_vm0, %v4439_v57  ;;  %v9512_v57 = vpack.c.bf16 %v4649_v56, %v4641_v55  ;;  %v5069_v56 = vld [vmem:[#allocation22 + $0x200] sm:$0xff] }
0x1292   :  { %4795 = vmatprep.mubr.f32.mxu0 %v10906_v59  ;;  %9517 = vmatpush1.bf16.msra.mxu0 %v9516_v11  ;;  %v9532_v11 = vpack.c.bf16 %v4605_v1, %v4597_v0  ;;  %v5104_v0 = vld [vmem:[#allocation22 + $0x318] sm:$0xff] }
0x1293   :  { %9519 = vmatprep.subr.bf16.mxu0 %v9518_v15  ;;  %v4621_v15 = vld [vmem:[#allocation22 + $0xe0] sm:$0xff]  ;;  %v5112_v1 = vld [vmem:[#allocation22 + $0x358] sm:$0xff] }
0x1294   :  { %v9536_v25 = vpack.c.bf16 %v4621_v15, %v4613_v14  ;;  %v9586_v14 = vpack.c.bf16 %v5112_v1, %v5104_v0  ;;  %v5103_v15 = vld [vmem:[#allocation22 + $0x310] sm:$0xff]  ;;  %v5113_v0 = vld [vmem:[#allocation22 + $0x360] sm:$0xff] }
0x1296   :  { %9521 = vmatpush1.bf16.msra.mxu0 %v9520_v7  ;;  %v4615_v7 = vld [vmem:[#allocation22 + $0xb0] sm:$0xff] }
0x1297   :  { %9523 = vmatprep.subr.bf16.mxu0 %v9522_v20 }
0x129a   :  { %9525 = vmatpush1.bf16.msra.mxu0 %v9524_v23  ;;  %v4640_v23 = vld [vmem:[#allocation22 + $0x178] sm:$0xff] }
0x129b   :  { %9527 = vmatprep.subr.bf16.mxu0 %v9526_v4  ;;  %v9552_v4 = vpack.c.bf16 %v4623_v31, %v4615_v7  ;;  %v5128_v7 = vld [vmem:[#allocation22 + $0x3d8] sm:$0xff]  ;;  %v9568_v31 = vpack.c.bf16 %v5093_v9, %v5085_v8  ;;  %v5122_v8 = vld [vmem:[#allocation22 + $0x3a8] sm:$0xff] }
0x129c   :  { %v5130_v9 = vld [vmem:[#allocation22 + $0x3e8] sm:$0xff] }
0x129e   :  { %9529 = vmatpush1.bf16.msra.mxu0 %v9528_v28  ;;  %v9538_v28 = vpack.c.bf16 %v4638_v21, %v4630_v34  ;;  %v5109_v21 = vld [vmem:[#allocation22 + $0x340] sm:$0xff] }
0x129f   :  { %9547 = vmatprep.subr.bf16.mxu0 %v9546_v63  ;;  %v5095_v63 = vld [vmem:[#allocation22 + $0x2d0] sm:$0xff] }
0x12a0   :  { %v9584_v10 = vpack.c.bf16 %v5095_v63, %v5087_v62  ;;  %v5105_v63 = vld [vmem:[#allocation22 + $0x320] sm:$0xff] }
0x1364   :  { %v4512_v33 = vpop.f32.mrb[40].mxu0 }
0x1365   :  { %v10346_v37 = vadd.f32 %v7768_v29, %v4512_v33  ;;  %v8949_v17 = vpop.f32.mrb[41].mxu0  ;;  %v9554_v29 = vpack.c.bf16 %v4640_v23, %v4632_v22  ;;  %v4646_v33 = vld [vmem:[#allocation22 + $0x1a8] sm:$0xff] }
0x1366   :  { %v9540_v17 = vpack.c.bf16 %v4637_v27, %v4629_v26  ;;  %v5118_v23 = vld [vmem:[#allocation22 + $0x388] sm:$0xff]  ;;  %v5127_v26 = vld [vmem:[#allocation22 + $0x3d0] sm:$0xff] }
0x1367   :  { %v11665_v39 = vmax.f32 %v10346_v37, 0.0  ;;  %v4656_v37 = vld [vmem:[#allocation22 + $0x1f8] sm:$0xff] }
0x1369   :  { %8951 = vmatpush3.msra.mxu1 %v11665_v39 }
0x136a   :  { %8953 = vmatmul.mubr.msk.f32.vlgmr.msra.gmra.mrb[28].mxu1 %vm4143_vm4, %v4519_v54  ;;  %9499 = vmatprep.subr.bf16.mxu1 %v9498_v18  ;;  %v9542_v18 = vpack.c.bf16 %v4654_v35, %v4646_v33  ;;  %v9558_v54 = vpack.c.bf16 %v4656_v37, %v4648_v36  ;;  %v5074_v35 = vld [vmem:[#allocation22 + $0x228] sm:$0xff]  ;;  %v5076_v37 = vld [vmem:[#allocation22 + $0x238] sm:$0xff] }
0x136b   :  { %9501 = vmatpush1.bf16.msra.mxu1 %v9500_v40  ;;  %4724 = vmatprep.mubr.f32.mxu1 %v10906_v59  ;;  %v4653_v40 = vld [vmem:[#allocation22 + $0x1e0] sm:$0xff]  ;;  %v5082_v36 = vld [vmem:[#allocation22 + $0x268] sm:$0xff] }
0x136c   :  { %9503 = vmatprep.subr.bf16.mxu1 %v9502_v41  ;;  %v4647_v41 = vld [vmem:[#allocation22 + $0x1b0] sm:$0xff]  ;;  %v9544_v45 = vpack.c.bf16 %v4653_v40, %v4645_v51 }
0x136d   :  { %v5075_v40 = vld [vmem:[#allocation22 + $0x230] sm:$0xff] }
0x136f   :  { %9505 = vmatpush1.bf16.msra.mxu1 %v9504_v46  ;;  %v9560_v46 = vpack.c.bf16 %v4655_v42, %v4647_v41  ;;  %v5083_v41 = vld [vmem:[#allocation22 + $0x270] sm:$0xff]  ;;  %v5090_v42 = vld [vmem:[#allocation22 + $0x2a8] sm:$0xff] }
0x1370   :  { %9507 = vmatprep.subr.bf16.mxu1 %v9506_v47  ;;  %v5070_v47 = vld [vmem:[#allocation22 + $0x208] sm:$0xff]  ;;  %v9598_v50 = vpack.c.bf16 %v5098_v43, %v5090_v42  ;;  %v5520_v43 = vld [vmem:[#allocation22 + $0x480] sm:$0xff] }
0x1371   :  { %v9562_v55 = vpack.c.bf16 %v5078_v49, %v5070_v47  ;;  %v9612_v47 = vpack.c.bf16 %v5083_v41, %v5075_v40  ;;  %v5097_v49 = vld [vmem:[#allocation22 + $0x2e0] sm:$0xff]  ;;  %v5429_v40 = vld [vmem:[#allocation20 + $0x4] sm:$0x3] }
0x1373   :  { %9509 = vmatpush1.bf16.msra.mxu1 %v9508_v3  ;;  %v5088_v3 = vld [vmem:[#allocation22 + $0x298] sm:$0xff] }
0x1374   :  { %9511 = vmatprep.subr.bf16.mxu1 %v9510_v53  ;;  %v5096_v53 = vld [vmem:[#allocation22 + $0x2d8] sm:$0xff] }
0x1377   :  { %9513 = vmatpush1.bf16.msra.mxu1 %v9512_v57  ;;  %v5077_v57 = vld [vmem:[#allocation22 + $0x240] sm:$0xff] }
0x1378   :  { %9531 = vmatprep.subr.bf16.mxu1 %v9530_v61  ;;  %v9582_v61 = vpack.c.bf16 %v5096_v53, %v5088_v3  ;;  %v9564_v5 = vpack.c.bf16 %v5077_v57, %v5069_v56  ;;  %v5091_v3 = vld [vmem:[#allocation22 + $0x2b0] sm:$0xff]  ;;  %v5114_v57 = vld [vmem:[#allocation22 + $0x368] sm:$0xff] }
0x1379   :  { %v5099_v53 = vld [vmem:[#allocation22 + $0x2f0] sm:$0xff] }
0x137a   :  { %v9616_v62 = vpack.c.bf16 %v5099_v53, %v5091_v3  ;;  %v5563_v3 = vld [vmem:[#allocation22 + $0x5d8] sm:$0xff] }
0x143d   :  { %v11670_v20 = vpop.f32.mrb[28].mxu1 }
0x143e   :  { %7774 = vmatmul.mubr.msk.f32.vlgmr.msra.gmra.mrb[30].mxu1 %vm433_vm1, %v11670_v20  ;;  %7775 = vmatmul.mubr.msk.f32.vlgmr.msra.gmra.mrb[42].mxu0 %vm433_vm1, %v11670_v20  ;;  %v8954_v24 = vpop.f32.mrb[29].mxu1 }
0x143f   :  { %9533 = vmatpush1.bf16.msra.mxu1 %v9532_v11  ;;  %9549 = vmatpush1.bf16.msra.mxu0 %v9548_v13  ;;  %v5102_v11 = vld [vmem:[#allocation22 + $0x308] sm:$0xff] }
0x1440   :  { %9535 = vmatprep.subr.bf16.mxu1 %v9534_v16  ;;  %9551 = vmatprep.subr.bf16.mxu0 %v9550_v19  ;;  %v5110_v13 = vld [vmem:[#allocation22 + $0x348] sm:$0xff]  ;;  %v5111_v16 = vld [vmem:[#allocation22 + $0x350] sm:$0xff]  ;;  %v5120_v19 = vld [vmem:[#allocation22 + $0x398] sm:$0xff] }
0x1441   :  { %4866 = vmatprep.mubr.f32.mxu1 %v10906_v59  ;;  %4937 = vmatprep.mubr.f32.mxu0 %v10906_v59  ;;  %v9570_v34 = vpack.c.bf16 %v5110_v13, %v5102_v11  ;;  %v9588_v22 = vpack.c.bf16 %v5111_v16, %v5103_v15  ;;  %v5126_v24 = vld [vmem:[#allocation22 + $0x3c8] sm:$0xff]  ;;  %v5132_v11 = vld [vmem:[#allocation22 + $0x3f8] sm:$0xff]  ;;  %v9604_v13 = vpack.c.bf16 %v5113_v0, %v5105_v63  ;;  %v5121_v15 = vld [vmem:[#allocation22 + $0x3a0] sm:$0xff] }
0x1442   :  { %v9606_v16 = vpack.c.bf16 %v5130_v9, %v5122_v8  ;;  %v5562_v63 = vld [vmem:[#allocation22 + $0x5d0] sm:$0xff]  ;;  %v5509_v9 = vld [vmem:[#allocation22 + $0x428] sm:$0xff] }
0x1443   :  { %9537 = vmatpush1.bf16.msra.mxu1 %v9536_v25  ;;  %9553 = vmatpush1.bf16.msra.mxu0 %v9552_v4  ;;  %v9590_v25 = vpack.c.bf16 %v5128_v7, %v5120_v19  ;;  %v5119_v4 = vld [vmem:[#allocation22 + $0x390] sm:$0xff]  ;;  %v5129_v7 = vld [vmem:[#allocation22 + $0x3e0] sm:$0xff] }
0x1444   :  { %9539 = vmatprep.subr.bf16.mxu1 %v9538_v28  ;;  %9555 = vmatprep.subr.bf16.mxu0 %v9554_v29  ;;  %v9574_v28 = vpack.c.bf16 %v5126_v24, %v5118_v23  ;;  %v5117_v29 = vld [vmem:[#allocation22 + $0x380] sm:$0xff]  ;;  %v9592_v32 = vpack.c.bf16 %v5127_v26, %v5119_v4  ;;  %v5505_v24 = vld [vmem:[#allocation22 + $0x408] sm:$0xff]  ;;  %v5506_v26 = vld [vmem:[#allocation22 + $0x410] sm:$0xff] }
0x1445   :  { %v9576_v33 = vpack.c.bf16 %v5125_v30, %v5117_v29  ;;  %v5513_v4 = vld [vmem:[#allocation22 + $0x448] sm:$0xff]  ;;  %v5531_v29 = vld [vmem:[#allocation22 + $0x4d8] sm:$0xff] }
0x1446   :  { %v9626_v30 = vpack.c.bf16 %v5513_v4, %v5505_v24  ;;  %v5532_v4 = vld [vmem:[#allocation22 + $0x4e0] sm:$0xff] }
0x1447   :  { %9541 = vmatpush1.bf16.msra.mxu1 %v9540_v17  ;;  %9557 = vmatpush1.bf16.msra.mxu0 %v9556_v38  ;;  %v9594_v17 = vpack.c.bf16 %v5082_v36, %v5074_v35  ;;  %v5084_v38 = vld [vmem:[#allocation22 + $0x278] sm:$0xff]  ;;  %v5521_v36 = vld [vmem:[#allocation22 + $0x488] sm:$0xff] }
0x1448   :  { %9543 = vmatprep.subr.bf16.mxu1 %v9542_v18  ;;  %9559 = vmatprep.subr.bf16.mxu0 %v9558_v54  ;;  %v9610_v51 = vpack.c.bf16 %v5084_v38, %v5076_v37  ;;  %v5073_v18 = vld [vmem:[#allocation22 + $0x220] sm:$0xff]  ;;  %v5529_v37 = vld [vmem:[#allocation22 + $0x4c8] sm:$0xff]  ;;  %v5522_v38 = vld [vmem:[#allocation22 + $0x490] sm:$0xff] }
0x1449   :  { %v5081_v54 = vld [vmem:[#allocation22 + $0x260] sm:$0xff]  ;;  %v9630_v42 = vpack.c.bf16 %v5529_v37, %v5521_v36  ;;  %v5551_v36 = vld [vmem:[#allocation22 + $0x578] sm:$0xff] }
0x144b   :  { %9545 = vmatpush1.bf16.msra.mxu1 %v9544_v45  ;;  %9561 = vmatpush1.bf16.msra.mxu0 %v9560_v46  ;;  %v5100_v45 = vld [vmem:[#allocation22 + $0x2f8] sm:$0xff]  ;;  %v9596_v46 = vpack.c.bf16 %v5081_v54, %v5073_v18 }
0x144c   :  { %8955 = vmatprep.subr.mxu1 %v10906_v59  ;;  %9579 = vmatprep.subr.bf16.mxu0 %v9578_v48  ;;  %v5089_v48 = vld [vmem:[#allocation22 + $0x2a0] sm:$0xff]  ;;  %v9614_v52 = vpack.c.bf16 %v5100_v45, %v5092_v44  ;;  %v5539_v18 = vld [vmem:[#allocation22 + $0x518] sm:$0xff] }
0x144d   :  { %v5547_v54 = vld [vmem:[#allocation22 + $0x558] sm:$0xff]  ;;  %v5528_v44 = vld [vmem:[#allocation22 + $0x4c0] sm:$0xff] }
0x144e   :  { %7776 = vmatmul.mubr.msk.f32.vlgmr.msra.gmra.mrb[32].mxu1 %vm433_vm1, %v11670_v20  ;;  %7777 = vmatmul.mubr.msk.f32.vlgmr.msra.gmra.mrb[44].mxu0 %vm433_vm1, %v11670_v20  ;;  %v5101_v20 = vld [vmem:[#allocation22 + $0x300] sm:$0xff]  ;;  %v9632_v53 = vpack.c.bf16 %v5528_v44, %v5520_v43  ;;  %v5557_v43 = vld [vmem:[#allocation22 + $0x5a8] sm:$0xff] }
0x144f   :  { %8956 = vmatpush3.msra.mxu1 %v11665_v39  ;;  %8957 = vmatprep.mubr.msk.f32.mxu1 %vm10905_vm3, %v10906_v59  ;;  %v9572_v27 = vpack.c.bf16 %v5109_v21, %v5101_v20  ;;  %v5507_v20 = vld [vmem:[#allocation22 + $0x418] sm:$0xff]  ;;  %v5565_v44 = vld [vmem:[#allocation22 + $0x5e8] sm:$0xff] }
0x1450   :  { %9563 = vmatprep.subr.bf16.mxu1 %v9562_v55  ;;  %9581 = vmatpush1.bf16.msra.mxu0 %v9580_v58  ;;  %v5106_v55 = vld [vmem:[#allocation22 + $0x328] sm:$0xff]  ;;  %v5108_v58 = vld [vmem:[#allocation22 + $0x338] sm:$0xff] }
0x1451   :  { %9583 = vmatprep.subr.bf16.mxu0 %v9582_v61  ;;  %5271 = vmatprep.mubr.f32.mxu0 %v10906_v59  ;;  %v9600_v61 = vpack.c.bf16 %v5097_v49, %v5089_v48  ;;  %v9602_v1 = vpack.c.bf16 %v5114_v57, %v5106_v55  ;;  %v5515_v21 = vld [vmem:[#allocation22 + $0x458] sm:$0xff]  ;;  %v9650_v48 = vpack.c.bf16 %v5547_v54, %v5539_v18  ;;  %v5538_v49 = vld [vmem:[#allocation22 + $0x510] sm:$0xff]  ;;  %v5544_v57 = vld [vmem:[#allocation22 + $0x540] sm:$0xff] }
0x1452   :  { %8958 = vmatmul.mubr.msk.f32.vlgmr.msra.gmra.mrb[34].mxu1 %vm4143_vm4, %v4994_v2  ;;  %v9618_v2 = vpack.c.bf16 %v5116_v12, %v5108_v58  ;;  %v5553_v12 = vld [vmem:[#allocation22 + $0x588] sm:$0xff]  ;;  %v5548_v18 = vld [vmem:[#allocation22 + $0x560] sm:$0xff] }
0x1453   :  { %9565 = vmatpush1.bf16.msra.mxu1 %v9564_v5  ;;  %5200 = vmatprep.mubr.f32.mxu1 %v10906_v59  ;;  %v5107_v5 = vld [vmem:[#allocation22 + $0x330] sm:$0xff] }
0x1454   :  { %9567 = vmatprep.subr.bf16.mxu1 %v9566_v6  ;;  %9585 = vmatpush1.bf16.msra.mxu0 %v9584_v10  ;;  %v5115_v6 = vld [vmem:[#allocation22 + $0x370] sm:$0xff]  ;;  %v5124_v10 = vld [vmem:[#allocation22 + $0x3b8] sm:$0xff] }
0x1455   :  { %9587 = vmatprep.subr.bf16.mxu0 %v9586_v14  ;;  %v9620_v14 = vpack.c.bf16 %v5115_v6, %v5107_v5  ;;  %v9622_v19 = vpack.c.bf16 %v5132_v11, %v5124_v10  ;;  %v5560_v5 = vld [vmem:[#allocation22 + $0x5c0] sm:$0xff]  ;;  %v5517_v10 = vld [vmem:[#allocation22 + $0x468] sm:$0xff]  ;;  %v5511_v11 = vld [vmem:[#allocation22 + $0x438] sm:$0xff] }
0x1457   :  { %9569 = vmatpush1.bf16.msra.mxu1 %v9568_v31  ;;  %v5123_v31 = vld [vmem:[#allocation22 + $0x3b0] sm:$0xff] }
0x1458   :  { %9571 = vmatprep.subr.bf16.mxu1 %v9570_v34  ;;  %9589 = vmatpush1.bf16.msra.mxu0 %v9588_v22  ;;  %v5131_v34 = vld [vmem:[#allocation22 + $0x3f0] sm:$0xff]  ;;  %v9608_v22 = vpack.c.bf16 %v5129_v7, %v5121_v15 }
0x1459   :  { %9591 = vmatprep.subr.bf16.mxu0 %v9590_v25  ;;  %v9624_v23 = vpack.c.bf16 %v5131_v34, %v5123_v31  ;;  %v9642_v25 = vpack.c.bf16 %v5515_v21, %v5507_v20  ;;  %v5510_v7 = vld [vmem:[#allocation22 + $0x430] sm:$0xff]  ;;  %v5525_v34 = vld [vmem:[#allocation22 + $0x4a8] sm:$0xff]  ;;  %v5527_v21 = vld [vmem:[#allocation22 + $0x4b8] sm:$0xff] }
0x145a   :  { %v5518_v31 = vld [vmem:[#allocation22 + $0x470] sm:$0xff]  ;;  %v5533_v20 = vld [vmem:[#allocation22 + $0x4e8] sm:$0xff] }
0x145b   :  { %9573 = vmatpush1.bf16.msra.mxu1 %v9572_v27  ;;  %v5514_v27 = vld [vmem:[#allocation22 + $0x450] sm:$0xff]  ;;  %v9676_v24 = vpack.c.bf16 %v5518_v31, %v5510_v7  ;;  %v5864_v7 = vld [vmem:[#allocation20 + $0x6] sm:$0x3] }
0x145c   :  { %9575 = vmatprep.subr.bf16.mxu1 %v9574_v28  ;;  %9593 = vmatpush1.bf16.msra.mxu0 %v9592_v32  ;;  %v5523_v28 = vld [vmem:[#allocation22 + $0x498] sm:$0xff]  ;;  %v5504_v32 = vld [vmem:[#allocation22 + $0x400] sm:$0xff]  ;;  %v9644_v35 = vpack.c.bf16 %v5514_v27, %v5506_v26  ;;  %v9662_v26 = vpack.c.bf16 %v5533_v20, %v5525_v34 }
0x145d   :  { %9611 = vmatprep.subr.bf16.mxu0 %v9610_v51  ;;  %v5530_v51 = vld [vmem:[#allocation22 + $0x4d0] sm:$0xff]  ;;  %v5955_v20 = vld [vmem:[#allocation22 + $0x680] sm:$0xff] }
0x145e   :  { %v9648_v45 = vpack.c.bf16 %v5530_v51, %v5522_v38  ;;  %v5540_v51 = vld [vmem:[#allocation22 + $0x520] sm:$0xff] }
0x145f   :  { %9577 = vmatpush1.bf16.msra.mxu1 %v9576_v33  ;;  %v5512_v33 = vld [vmem:[#allocation22 + $0x440] sm:$0xff] }
0x1460   :  { %9595 = vmatprep.subr.bf16.mxu1 %v9594_v17  ;;  %v9646_v17 = vpack.c.bf16 %v5531_v29, %v5523_v28  ;;  %v9628_v41 = vpack.c.bf16 %v5512_v33, %v5504_v32  ;;  %v5526_v28 = vld [vmem:[#allocation22 + $0x4b0] sm:$0xff]  ;;  %v5549_v33 = vld [vmem:[#allocation22 + $0x568] sm:$0xff] }
0x1461   :  { %v5534_v29 = vld [vmem:[#allocation22 + $0x4f0] sm:$0xff] }
0x1462   :  { %v9680_v38 = vpack.c.bf16 %v5534_v29, %v5526_v28 }
0x1525   :  { %v11689_v56 = vpop.f32.mrb[34].mxu1 }
0x1526   :  { %7779 = vmatmul.mubr.msk.f32.vlgmr.msra.gmra.mrb[30].mxu1 %vm433_vm1, %v11689_v56  ;;  %7780 = vmatmul.mubr.msk.f32.vlgmr.msra.gmra.mrb[42].mxu0 %vm433_vm1, %v11689_v56  ;;  %v8959_v60 = vpop.f32.mrb[35].mxu1 }
0x1527   :  { %9597 = vmatpush1.bf16.msra.mxu1 %v9596_v46  ;;  %9613 = vmatpush1.bf16.msra.mxu0 %v9612_v47  ;;  %v5537_v46 = vld [vmem:[#allocation22 + $0x508] sm:$0xff] }
0x1528   :  { %9599 = vmatprep.subr.bf16.mxu1 %v9598_v50  ;;  %9615 = vmatprep.subr.bf16.mxu0 %v9614_v52  ;;  %v5545_v47 = vld [vmem:[#allocation22 + $0x548] sm:$0xff]  ;;  %v5546_v50 = vld [vmem:[#allocation22 + $0x550] sm:$0xff]  ;;  %v5555_v52 = vld [vmem:[#allocation22 + $0x598] sm:$0xff] }
0x1529   :  { %5342 = vmatprep.mubr.f32.mxu1 %v10906_v59  ;;  %5413 = vmatprep.mubr.f32.mxu0 %v10906_v59  ;;  %v9634_v55 = vpack.c.bf16 %v5545_v47, %v5537_v46  ;;  %v9652_v58 = vpack.c.bf16 %v5546_v50, %v5538_v49  ;;  %v5561_v60 = vld [vmem:[#allocation22 + $0x5c8] sm:$0xff]  ;;  %v5567_v46 = vld [vmem:[#allocation22 + $0x5f8] sm:$0xff]  ;;  %v9668_v47 = vpack.c.bf16 %v5548_v18, %v5540_v51  ;;  %v5556_v49 = vld [vmem:[#allocation22 + $0x5a0] sm:$0xff] }
0x152a   :  { %v9670_v50 = vpack.c.bf16 %v5565_v44, %v5557_v43  ;;  %v5944_v43 = vld [vmem:[#allocation22 + $0x628] sm:$0xff] }
0x152b   :  { %9601 = vmatpush1.bf16.msra.mxu1 %v9600_v61  ;;  %9617 = vmatpush1.bf16.msra.mxu0 %v9616_v62  ;;  %v9654_v61 = vpack.c.bf16 %v5563_v3, %v5555_v52  ;;  %v5554_v62 = vld [vmem:[#allocation22 + $0x590] sm:$0xff]  ;;  %v5564_v3 = vld [vmem:[#allocation22 + $0x5e0] sm:$0xff]  ;;  %v5952_v44 = vld [vmem:[#allocation22 + $0x668] sm:$0xff] }
0x152c   :  { %9603 = vmatprep.subr.bf16.mxu1 %v9602_v1  ;;  %9619 = vmatprep.subr.bf16.mxu0 %v9618_v2  ;;  %v9638_v1 = vpack.c.bf16 %v5561_v60, %v5553_v12  ;;  %v5552_v2 = vld [vmem:[#allocation22 + $0x580] sm:$0xff]  ;;  %v9656_v6 = vpack.c.bf16 %v5562_v63, %v5554_v62  ;;  %v5940_v60 = vld [vmem:[#allocation22 + $0x608] sm:$0xff]  ;;  %v5941_v63 = vld [vmem:[#allocation22 + $0x610] sm:$0xff] }
0x152d   :  { %v9640_v8 = vpack.c.bf16 %v5560_v5, %v5552_v2  ;;  %v5948_v62 = vld [vmem:[#allocation22 + $0x648] sm:$0xff]  ;;  %v5966_v2 = vld [vmem:[#allocation22 + $0x6d8] sm:$0xff] }
0x152e   :  { %v9690_v5 = vpack.c.bf16 %v5948_v62, %v5940_v60  ;;  %v5959_v60 = vld [vmem:[#allocation22 + $0x6a0] sm:$0xff] }
0x152f   :  { %9605 = vmatpush1.bf16.msra.mxu1 %v9604_v13  ;;  %9621 = vmatpush1.bf16.msra.mxu0 %v9620_v14  ;;  %v9658_v13 = vpack.c.bf16 %v5517_v10, %v5509_v9  ;;  %v5519_v14 = vld [vmem:[#allocation22 + $0x478] sm:$0xff]  ;;  %v5956_v10 = vld [vmem:[#allocation22 + $0x688] sm:$0xff] }
0x1530   :  { %9607 = vmatprep.subr.bf16.mxu1 %v9606_v16  ;;  %9623 = vmatprep.subr.bf16.mxu0 %v9622_v19  ;;  %v9674_v15 = vpack.c.bf16 %v5519_v14, %v5511_v11  ;;  %v5508_v16 = vld [vmem:[#allocation22 + $0x420] sm:$0xff]  ;;  %v5964_v11 = vld [vmem:[#allocation22 + $0x6c8] sm:$0xff]  ;;  %v5957_v14 = vld [vmem:[#allocation22 + $0x690] sm:$0xff] }
0x1531   :  { %v5516_v19 = vld [vmem:[#allocation22 + $0x460] sm:$0xff]  ;;  %v9694_v34 = vpack.c.bf16 %v5964_v11, %v5956_v10 }
0x1533   :  { %9609 = vmatpush1.bf16.msra.mxu1 %v9608_v22  ;;  %9625 = vmatpush1.bf16.msra.mxu0 %v9624_v23  ;;  %v5535_v22 = vld [vmem:[#allocation22 + $0x4f8] sm:$0xff]  ;;  %v9660_v23 = vpack.c.bf16 %v5516_v19, %v5508_v16 }
0x1534   :  { %8960 = vmatprep.subr.mxu1 %v10906_v59  ;;  %9643 = vmatprep.subr.bf16.mxu0 %v9642_v25  ;;  %v5524_v25 = vld [vmem:[#allocation22 + $0x4a0] sm:$0xff]  ;;  %v9678_v27 = vpack.c.bf16 %v5535_v22, %v5527_v21  ;;  %v5974_v16 = vld [vmem:[#allocation22 + $0x718] sm:$0xff] }
0x1535   :  { %v5982_v19 = vld [vmem:[#allocation22 + $0x758] sm:$0xff]  ;;  %v5963_v21 = vld [vmem:[#allocation22 + $0x6c0] sm:$0xff] }
0x1536   :  { %7781 = vmatmul.mubr.msk.f32.vlgmr.msra.gmra.mrb[32].mxu1 %vm433_vm1, %v11689_v56  ;;  %7782 = vmatmul.mubr.msk.f32.vlgmr.msra.gmra.mrb[44].mxu0 %vm433_vm1, %v11689_v56  ;;  %v5536_v56 = vld [vmem:[#allocation22 + $0x500] sm:$0xff]  ;;  %v9696_v28 = vpack.c.bf16 %v5963_v21, %v5955_v20  ;;  %v6000_v20 = vld [vmem:[#allocation22 + $0x7e8] sm:$0xff]  ;;  %v5994_v21 = vld [vmem:[#allocation22 + $0x7b8] sm:$0xff] }
0x1537   :  { %8961 = vmatpush3.msra.mxu1 %v11665_v39  ;;  %8962 = vmatprep.mubr.msk.f32.mxu1 %vm10905_vm3, %v10906_v59  ;;  %v9636_v0 = vpack.c.bf16 %v5544_v57, %v5536_v56  ;;  %v5942_v56 = vld [vmem:[#allocation22 + $0x618] sm:$0xff] }
0x1538   :  { %9627 = vmatprep.subr.bf16.mxu1 %v9626_v30  ;;  %9645 = vmatpush1.bf16.msra.mxu0 %v9644_v35  ;;  %v5541_v30 = vld [vmem:[#allocation22 + $0x528] sm:$0xff]  ;;  %v5543_v35 = vld [vmem:[#allocation22 + $0x538] sm:$0xff] }
0x1539   :  { %9647 = vmatprep.subr.bf16.mxu0 %v9646_v17  ;;  %5706 = vmatprep.mubr.f32.mxu0 %v10906_v59  ;;  %v9664_v17 = vpack.c.bf16 %v5532_v4, %v5524_v25  ;;  %v9666_v54 = vpack.c.bf16 %v5549_v33, %v5541_v30  ;;  %v5950_v57 = vld [vmem:[#allocation22 + $0x658] sm:$0xff]  ;;  %v9714_v25 = vpack.c.bf16 %v5982_v19, %v5974_v16  ;;  %v5973_v4 = vld [vmem:[#allocation22 + $0x710] sm:$0xff]  ;;  %v5971_v30 = vld [vmem:[#allocation22 + $0x700] sm:$0xff] }
0x153a   :  { %8963 = vmatmul.mubr.msk.f32.vlgmr.msra.gmra.mrb[36].mxu1 %vm4143_vm4, %v5429_v40  ;;  %v9682_v40 = vpack.c.bf16 %v5551_v36, %v5543_v35  ;;  %v5988_v35 = vld [vmem:[#allocation22 + $0x788] sm:$0xff] }
0x153b   :  { %9629 = vmatpush1.bf16.msra.mxu1 %v9628_v41  ;;  %5635 = vmatprep.mubr.f32.mxu1 %v10906_v59  ;;  %v5542_v41 = vld [vmem:[#allocation22 + $0x530] sm:$0xff]  ;;  %v5996_v36 = vld [vmem:[#allocation22 + $0x7c8] sm:$0xff] }
0x153c   :  { %9631 = vmatprep.subr.bf16.mxu1 %v9630_v42  ;;  %9649 = vmatpush1.bf16.msra.mxu0 %v9648_v45  ;;  %v5550_v42 = vld [vmem:[#allocation22 + $0x570] sm:$0xff]  ;;  %v5559_v45 = vld [vmem:[#allocation22 + $0x5b8] sm:$0xff]  ;;  %v9702_v18 = vpack.c.bf16 %v5996_v36, %v5988_v35  ;;  %v6306_v36 = vld [vmem:[#allocation25] sm:$0xff] }
0x153d   :  { %9651 = vmatprep.subr.bf16.mxu0 %v9650_v48  ;;  %v9684_v48 = vpack.c.bf16 %v5550_v42, %v5542_v41  ;;  %v9686_v52 = vpack.c.bf16 %v5567_v46, %v5559_v45  ;;  %v5946_v45 = vld [vmem:[#allocation22 + $0x638] sm:$0xff]  ;;  %v9722_v46 = vpack.c.bf16 %v5952_v44, %v5944_v43 }
0x153f   :  { %9633 = vmatpush1.bf16.msra.mxu1 %v9632_v53  ;;  %v5558_v53 = vld [vmem:[#allocation22 + $0x5b0] sm:$0xff] }
0x1540   :  { %9635 = vmatprep.subr.bf16.mxu1 %v9634_v55  ;;  %9653 = vmatpush1.bf16.msra.mxu0 %v9652_v58  ;;  %v5566_v55 = vld [vmem:[#allocation22 + $0x5f0] sm:$0xff]  ;;  %v9672_v58 = vpack.c.bf16 %v5564_v3, %v5556_v49  ;;  %v5943_v49 = vld [vmem:[#allocation22 + $0x620] sm:$0xff] }
0x1541   :  { %9655 = vmatprep.subr.bf16.mxu0 %v9654_v61  ;;  %v9688_v12 = vpack.c.bf16 %v5566_v55, %v5558_v53  ;;  %v9706_v61 = vpack.c.bf16 %v5950_v57, %v5942_v56  ;;  %v5953_v3 = vld [vmem:[#allocation22 + $0x670] sm:$0xff]  ;;  %v5960_v53 = vld [vmem:[#allocation22 + $0x6a8] sm:$0xff]  ;;  %v5962_v56 = vld [vmem:[#allocation22 + $0x6b8] sm:$0xff] }
0x1542   :  { %v5968_v55 = vld [vmem:[#allocation22 + $0x6e8] sm:$0xff]  ;;  %v5970_v57 = vld [vmem:[#allocation22 + $0x6f8] sm:$0xff] }
0x1543   :  { %9637 = vmatpush1.bf16.msra.mxu1 %v9636_v0  ;;  %v5949_v0 = vld [vmem:[#allocation22 + $0x650] sm:$0xff]  ;;  %v9726_v62 = vpack.c.bf16 %v5968_v55, %v5960_v53  ;;  %v6325_v53 = vld [vmem:[#allocation25 + $0x98] sm:$0xff] }
0x1544   :  { %9639 = vmatprep.subr.bf16.mxu1 %v9638_v1  ;;  %9657 = vmatpush1.bf16.msra.mxu0 %v9656_v6  ;;  %v5958_v1 = vld [vmem:[#allocation22 + $0x698] sm:$0xff]  ;;  %v5939_v6 = vld [vmem:[#allocation22 + $0x600] sm:$0xff]  ;;  %v9708_v9 = vpack.c.bf16 %v5949_v0, %v5941_v63  ;;  %v9742_v63 = vpack.c.bf16 %v5970_v57, %v5962_v56  ;;  %v5961_v0 = vld [vmem:[#allocation22 + $0x6b0] sm:$0xff] }
0x1545   :  { %9675 = vmatprep.subr.bf16.mxu0 %v9674_v15  ;;  %v5965_v15 = vld [vmem:[#allocation22 + $0x6d0] sm:$0xff]  ;;  %v6329_v55 = vld [vmem:[#allocation25 + $0xb8] sm:$0xff] }
0x1546   :  { %v9712_v22 = vpack.c.bf16 %v5965_v15, %v5957_v14  ;;  %v5975_v14 = vld [vmem:[#allocation22 + $0x720] sm:$0xff] }
0x1547   :  { %9641 = vmatpush1.bf16.msra.mxu1 %v9640_v8  ;;  %v5947_v8 = vld [vmem:[#allocation22 + $0x640] sm:$0xff] }
0x1548   :  { %9659 = vmatprep.subr.bf16.mxu1 %v9658_v13  ;;  %v9710_v13 = vpack.c.bf16 %v5966_v2, %v5958_v1  ;;  %v9692_v31 = vpack.c.bf16 %v5947_v8, %v5939_v6  ;;  %v5969_v1 = vld [vmem:[#allocation22 + $0x6f0] sm:$0xff]  ;;  %v5976_v2 = vld [vmem:[#allocation22 + $0x728] sm:$0xff]  ;;  %v5978_v8 = vld [vmem:[#allocation22 + $0x738] sm:$0xff] }
0x1549   :  { %v5984_v6 = vld [vmem:[#allocation22 + $0x768] sm:$0xff]  ;;  %v5983_v15 = vld [vmem:[#allocation22 + $0x760] sm:$0xff] }
0x154a   :  { %v9730_v16 = vpack.c.bf16 %v5984_v6, %v5976_v2  ;;  %v6333_v2 = vld [vmem:[#allocation25 + $0xd8] sm:$0xff] }
0x154b   :  { %v6337_v6 = vld [vmem:[#allocation25 + $0xf8] sm:$0xff] }
0x160d   :  { %v11708_v32 = vpop.f32.mrb[36].mxu1 }
0x160e   :  { %7784 = vmatmul.mubr.msk.f32.vlgmr.msra.gmra.mrb[30].mxu1 %vm433_vm1, %v11708_v32  ;;  %7785 = vmatmul.mubr.msk.f32.vlgmr.msra.gmra.mrb[42].mxu0 %vm433_vm1, %v11708_v32  ;;  %v8964_v37 = vpop.f32.mrb[37].mxu1 }
0x160f   :  { %9661 = vmatpush1.bf16.msra.mxu1 %v9660_v23  ;;  %9677 = vmatpush1.bf16.msra.mxu0 %v9676_v24  ;;  %v5972_v23 = vld [vmem:[#allocation22 + $0x708] sm:$0xff] }
0x1610   :  { %9663 = vmatprep.subr.bf16.mxu1 %v9662_v26  ;;  %9679 = vmatprep.subr.bf16.mxu0 %v9678_v27  ;;  %v5980_v24 = vld [vmem:[#allocation22 + $0x748] sm:$0xff]  ;;  %v5981_v26 = vld [vmem:[#allocation22 + $0x750] sm:$0xff]  ;;  %v5998_v27 = vld [vmem:[#allocation22 + $0x7d8] sm:$0xff] }
0x1611   :  { %5777 = vmatprep.mubr.f32.mxu1 %v10906_v59  ;;  %5848 = vmatprep.mubr.f32.mxu0 %v10906_v59  ;;  %v9698_v29 = vpack.c.bf16 %v5980_v24, %v5972_v23  ;;  %v9716_v33 = vpack.c.bf16 %v5981_v26, %v5973_v4  ;;  %v9732_v23 = vpack.c.bf16 %v5983_v15, %v5975_v14  ;;  %v5999_v4 = vld [vmem:[#allocation22 + $0x7e0] sm:$0xff]  ;;  %v6332_v14 = vld [vmem:[#allocation25 + $0xd0] sm:$0xff] }
0x1612   :  { %v6336_v15 = vld [vmem:[#allocation25 + $0xf0] sm:$0xff] }
0x1613   :  { %9665 = vmatpush1.bf16.msra.mxu1 %v9664_v17  ;;  %9681 = vmatpush1.bf16.msra.mxu0 %v9680_v38  ;;  %v5989_v17 = vld [vmem:[#allocation22 + $0x790] sm:$0xff] }
0x1614   :  { %9667 = vmatprep.subr.bf16.mxu1 %v9666_v54  ;;  %9683 = vmatprep.subr.bf16.mxu0 %v9682_v40  ;;  %v5997_v38 = vld [vmem:[#allocation22 + $0x7d0] sm:$0xff]  ;;  %v5987_v54 = vld [vmem:[#allocation22 + $0x780] sm:$0xff] }
0x1615   :  { %v5995_v40 = vld [vmem:[#allocation22 + $0x7c0] sm:$0xff]  ;;  %v9720_v41 = vpack.c.bf16 %v5997_v38, %v5989_v17 }
0x1616   :  { %v9704_v42 = vpack.c.bf16 %v5995_v40, %v5987_v54  ;;  %v6315_v54 = vld [vmem:[#allocation25 + $0x48] sm:$0xff] }
0x1617   :  { %9669 = vmatpush1.bf16.msra.mxu1 %v9668_v47  ;;  %9685 = vmatpush1.bf16.msra.mxu0 %v9684_v48  ;;  %v5954_v47 = vld [vmem:[#allocation22 + $0x678] sm:$0xff]  ;;  %v6319_v40 = vld [vmem:[#allocation25 + $0x68] sm:$0xff] }
0x1618   :  { %9671 = vmatprep.subr.bf16.mxu1 %v9670_v50  ;;  %9687 = vmatprep.subr.bf16.mxu0 %v9686_v52  ;;  %v9738_v48 = vpack.c.bf16 %v5954_v47, %v5946_v45  ;;  %v5951_v50 = vld [vmem:[#allocation22 + $0x660] sm:$0xff]  ;;  %v5945_v52 = vld [vmem:[#allocation22 + $0x630] sm:$0xff]  ;;  %v6314_v45 = vld [vmem:[#allocation25 + $0x40] sm:$0xff]  ;;  %v9758_v47 = vpack.c.bf16 %v6319_v40, %v6315_v54 }
0x161b   :  { %9673 = vmatpush1.bf16.msra.mxu1 %v9672_v58  ;;  %9689 = vmatpush1.bf16.msra.mxu0 %v9688_v12  ;;  %v9724_v58 = vpack.c.bf16 %v5951_v50, %v5943_v49  ;;  %v9740_v12 = vpack.c.bf16 %v5953_v3, %v5945_v52  ;;  %v6316_v49 = vld [vmem:[#allocation25 + $0x50] sm:$0xff]  ;;  %v6323_v52 = vld [vmem:[#allocation25 + $0x88] sm:$0xff] }
0x161c   :  { %8965 = vmatprep.subr.mxu1 %v10906_v59  ;;  %9707 = vmatprep.subr.bf16.mxu0 %v9706_v61  ;;  %v5967_v61 = vld [vmem:[#allocation22 + $0x6e0] sm:$0xff]  ;;  %v6320_v50 = vld [vmem:[#allocation25 + $0x70] sm:$0xff]  ;;  %v6327_v3 = vld [vmem:[#allocation25 + $0xa8] sm:$0xff] }
0x161d   :  { %v9728_v11 = vpack.c.bf16 %v5967_v61, %v5959_v60  ;;  %v10016_v57 = vpack.c.bf16 %v6320_v50, %v6316_v49  ;;  %v9762_v60 = vpack.c.bf16 %v6327_v3, %v6323_v52  ;;  %v10018_v61 = vpack.c.bf16 %v6329_v55, %v6325_v53  ;;  %v6365_v49 = vld [vmem:[#allocation25 + $0x1d8] sm:$0xff]  ;;  %v6362_v53 = vld [vmem:[#allocation25 + $0x1c0] sm:$0xff] }
0x161e   :  { %7786 = vmatmul.mubr.msk.f32.vlgmr.msra.gmra.mrb[32].mxu1 %vm433_vm1, %v11708_v32  ;;  %7787 = vmatmul.mubr.msk.f32.vlgmr.msra.gmra.mrb[44].mxu0 %vm433_vm1, %v11708_v32  ;;  %v5979_v32 = vld [vmem:[#allocation22 + $0x740] sm:$0xff]  ;;  %v6366_v55 = vld [vmem:[#allocation25 + $0x1e0] sm:$0xff] }
0x161f   :  { %8966 = vmatpush3.msra.mxu1 %v11665_v39  ;;  %8967 = vmatprep.mubr.msk.f32.mxu1 %vm10905_vm3, %v10906_v59  ;;  %v5990_v39 = vld [vmem:[#allocation22 + $0x798] sm:$0xff]  ;;  %v9700_v51 = vpack.c.bf16 %v5979_v32, %v5971_v30  ;;  %v6311_v30 = vld [vmem:[#allocation25 + $0x28] sm:$0xff]  ;;  %v6309_v32 = vld [vmem:[#allocation25 + $0x18] sm:$0xff] }
0x1620   :  { %9691 = vmatprep.subr.bf16.mxu1 %v9690_v5  ;;  %9709 = vmatpush1.bf16.msra.mxu0 %v9708_v9  ;;  %v9718_v37 = vpack.c.bf16 %v5998_v27, %v5990_v39  ;;  %v5986_v9 = vld [vmem:[#allocation22 + $0x778] sm:$0xff]  ;;  %v5993_v27 = vld [vmem:[#allocation22 + $0x7b0] sm:$0xff]  ;;  %v6369_v50 = vld [vmem:[#allocation25 + $0x1f8] sm:$0xff] }
0x1621   :  { %9711 = vmatprep.subr.bf16.mxu0 %v9710_v13  ;;  %6141 = vmatprep.mubr.f32.mxu0 %v10906_v59  ;;  %v9744_v13 = vpack.c.bf16 %v5969_v1, %v5961_v0  ;;  %v9746_v19 = vpack.c.bf16 %v5986_v9, %v5978_v8  ;;  %v6331_v0 = vld [vmem:[#allocation25 + $0xc8] sm:$0xff]  ;;  %v6330_v9 = vld [vmem:[#allocation25 + $0xc0] sm:$0xff] }
0x1622   :  { %8968 = vmatmul.mubr.msk.f32.vlgmr.msra.gmra.mrb[38].mxu1 %vm4143_vm4, %v5864_v7  ;;  %v5977_v7 = vld [vmem:[#allocation22 + $0x730] sm:$0xff] }
0x1623   :  { %9693 = vmatpush1.bf16.msra.mxu1 %v9692_v31  ;;  %6070 = vmatprep.mubr.f32.mxu1 %v10906_v59  ;;  %v5985_v31 = vld [vmem:[#allocation22 + $0x770] sm:$0xff] }
0x1624   :  { %9695 = vmatprep.subr.bf16.mxu1 %v9694_v34  ;;  %9713 = vmatpush1.bf16.msra.mxu0 %v9712_v22  ;;  %v5992_v34 = vld [vmem:[#allocation22 + $0x7a8] sm:$0xff]  ;;  %v6002_v22 = vld [vmem:[#allocation22 + $0x7f8] sm:$0xff]  ;;  %v9748_v24 = vpack.c.bf16 %v5985_v31, %v5977_v7  ;;  %v6335_v1 = vld [vmem:[#allocation25 + $0xe8] sm:$0xff] }
0x1625   :  { %9715 = vmatprep.subr.bf16.mxu0 %v9714_v25  ;;  %v5991_v25 = vld [vmem:[#allocation22 + $0x7a0] sm:$0xff]  ;;  %v9734_v26 = vpack.c.bf16 %v6000_v20, %v5992_v34  ;;  %v9750_v39 = vpack.c.bf16 %v6002_v22, %v5994_v21  ;;  %v10024_v20 = vpack.c.bf16 %v6336_v15, %v6332_v14  ;;  %v6338_v21 = vld [vmem:[#allocation25 + $0x100] sm:$0xff] }
0x1626   :  { %v9736_v35 = vpack.c.bf16 %v5999_v4, %v5991_v25  ;;  %v6341_v7 = vld [vmem:[#allocation25 + $0x118] sm:$0xff]  ;;  %v6342_v22 = vld [vmem:[#allocation25 + $0x120] sm:$0xff]  ;;  %v6340_v25 = vld [vmem:[#allocation25 + $0x110] sm:$0xff] }
0x1627   :  { %9697 = vmatpush1.bf16.msra.mxu1 %v9696_v28  ;;  %v6001_v28 = vld [vmem:[#allocation22 + $0x7f0] sm:$0xff]  ;;  %v6345_v31 = vld [vmem:[#allocation25 + $0x138] sm:$0xff]  ;;  %v6344_v4 = vld [vmem:[#allocation25 + $0x130] sm:$0xff] }
0x1628   :  { %9699 = vmatprep.subr.bf16.mxu1 %v9698_v29  ;;  %9717 = vmatpush1.bf16.msra.mxu0 %v9716_v33  ;;  %v6307_v29 = vld [vmem:[#allocation25 + $0x8] sm:$0xff]  ;;  %v6313_v33 = vld [vmem:[#allocation25 + $0x38] sm:$0xff] }
0x1629   :  { %9719 = vmatprep.subr.bf16.mxu0 %v9718_v37  ;;  %v6310_v37 = vld [vmem:[#allocation25 + $0x20] sm:$0xff]  ;;  %v9754_v17 = vpack.c.bf16 %v6311_v30, %v6307_v29  ;;  %v10010_v38 = vpack.c.bf16 %v6313_v33, %v6309_v32  ;;  %v9772_v29 = vpack.c.bf16 %v6342_v22, %v6338_v21  ;;  %v10028_v30 = vpack.c.bf16 %v6344_v4, %v6340_v25  ;;  %v6381_v14 = vld [vmem:[#allocation25 + $0x258] sm:$0xff]  ;;  %v6380_v21 = vld [vmem:[#allocation25 + $0x250] sm:$0xff] }
0x162a   :  { %v9756_v43 = vpack.c.bf16 %v6310_v37, %v6306_v36  ;;  %v6346_v32 = vld [vmem:[#allocation25 + $0x140] sm:$0xff]  ;;  %v6348_v36 = vld [vmem:[#allocation25 + $0x150] sm:$0xff]  ;;  %v6385_v15 = vld [vmem:[#allocation25 + $0x278] sm:$0xff] }
0x162b   :  { %9701 = vmatpush1.bf16.msra.mxu1 %v9700_v51  ;;  %v6308_v51 = vld [vmem:[#allocation25 + $0x10] sm:$0xff]  ;;  %v6350_v33 = vld [vmem:[#allocation25 + $0x160] sm:$0xff]  ;;  %v6389_v25 = vld [vmem:[#allocation25 + $0x298] sm:$0xff] }
0x162c   :  { %9703 = vmatprep.subr.bf16.mxu1 %v9702_v18  ;;  %9721 = vmatpush1.bf16.msra.mxu0 %v9720_v41  ;;  %v6312_v18 = vld [vmem:[#allocation25 + $0x30] sm:$0xff]  ;;  %v6317_v41 = vld [vmem:[#allocation25 + $0x58] sm:$0xff]  ;;  %v9776_v54 = vpack.c.bf16 %v6350_v33, %v6346_v32 }
0x162d   :  { %9739 = vmatprep.subr.bf16.mxu0 %v9738_v48  ;;  %v10012_v44 = vpack.c.bf16 %v6312_v18, %v6308_v51  ;;  %v6352_v37 = vld [vmem:[#allocation25 + $0x170] sm:$0xff]  ;;  %v6357_v51 = vld [vmem:[#allocation25 + $0x198] sm:$0xff] }
0x162e   :  { %v6361_v18 = vld [vmem:[#allocation25 + $0x1b8] sm:$0xff]  ;;  %v10032_v40 = vpack.c.bf16 %v6352_v37, %v6348_v36  ;;  %v6384_v22 = vld [vmem:[#allocation25 + $0x270] sm:$0xff] }
0x162f   :  { %9705 = vmatpush1.bf16.msra.mxu1 %v9704_v42  ;;  %v6321_v42 = vld [vmem:[#allocation25 + $0x78] sm:$0xff]  ;;  %v6388_v32 = vld [vmem:[#allocation25 + $0x290] sm:$0xff] }
0x1630   :  { %9723 = vmatprep.subr.bf16.mxu1 %v9722_v46  ;;  %v6318_v46 = vld [vmem:[#allocation25 + $0x60] sm:$0xff]  ;;  %v10014_v48 = vpack.c.bf16 %v6321_v42, %v6317_v41  ;;  %v6393_v4 = vld [vmem:[#allocation25 + $0x2b8] sm:$0xff]  ;;  %v6392_v33 = vld [vmem:[#allocation25 + $0x2b0] sm:$0xff] }
0x1631   :  { %v9760_v56 = vpack.c.bf16 %v6318_v46, %v6314_v45  ;;  %v6354_v41 = vld [vmem:[#allocation25 + $0x180] sm:$0xff]  ;;  %v6356_v45 = vld [vmem:[#allocation25 + $0x190] sm:$0xff]  ;;  %v6397_v36 = vld [vmem:[#allocation25 + $0x2d8] sm:$0xff] }
0x1632   :  { %v6358_v42 = vld [vmem:[#allocation25 + $0x1a0] sm:$0xff]  ;;  %v6360_v46 = vld [vmem:[#allocation25 + $0x1b0] sm:$0xff]  ;;  %v6401_v37 = vld [vmem:[#allocation25 + $0x2f8] sm:$0xff] }
0x1633   :  { %v9780_v52 = vpack.c.bf16 %v6358_v42, %v6354_v41  ;;  %v10036_v3 = vpack.c.bf16 %v6360_v46, %v6356_v45  ;;  %v6396_v41 = vld [vmem:[#allocation25 + $0x2d0] sm:$0xff]  ;;  %v6405_v45 = vld [vmem:[#allocation25 + $0x318] sm:$0xff] }
0x1634   :  { %v6400_v42 = vld [vmem:[#allocation25 + $0x2f0] sm:$0xff]  ;;  %v6409_v46 = vld [vmem:[#allocation25 + $0x338] sm:$0xff] }
0x16f5   :  { %v11727_v5 = vpop.f32.mrb[38].mxu1 }
0x16f6   :  { %7789 = vmatmul.mubr.msk.f32.vlgmr.msra.gmra.mrb[30].mxu1 %vm433_vm1, %v11727_v5  ;;  %7790 = vmatmul.mubr.msk.f32.vlgmr.msra.gmra.mrb[42].mxu0 %vm433_vm1, %v11727_v5  ;;  %v8969_v10 = vpop.f32.mrb[39].mxu1 }
0x16f7   :  { %9725 = vmatpush1.bf16.msra.mxu1 %v9724_v58  ;;  %9741 = vmatpush1.bf16.msra.mxu0 %v9740_v12  ;;  %v6322_v58 = vld [vmem:[#allocation25 + $0x80] sm:$0xff] }
0x16f8   :  { %9727 = vmatprep.subr.bf16.mxu1 %v9726_v62  ;;  %9743 = vmatprep.subr.bf16.mxu0 %v9742_v63  ;;  %v6326_v12 = vld [vmem:[#allocation25 + $0xa0] sm:$0xff]  ;;  %v6324_v62 = vld [vmem:[#allocation25 + $0x90] sm:$0xff] }
0x16f9   :  { %6212 = vmatprep.mubr.f32.mxu1 %v10906_v59  ;;  %6283 = vmatprep.mubr.f32.mxu0 %v10906_v59  ;;  %v9752_v59 = vpack.c.bf16 %v6001_v28, %v5993_v27  ;;  %v6328_v63 = vld [vmem:[#allocation25 + $0xb0] sm:$0xff]  ;;  %v9764_v8 = vpack.c.bf16 %v6326_v12, %v6322_v58  ;;  %v6334_v10 = vld [vmem:[#allocation25 + $0xe0] sm:$0xff]  ;;  %v6349_v27 = vld [vmem:[#allocation25 + $0x158] sm:$0xff] }
0x16fa   :  { %v9768_v34 = vpack.c.bf16 %v6334_v10, %v6330_v9  ;;  %v6353_v28 = vld [vmem:[#allocation25 + $0x178] sm:$0xff]  ;;  %v6364_v58 = vld [vmem:[#allocation25 + $0x1d0] sm:$0xff] }
0x16fb   :  { %9729 = vmatpush1.bf16.msra.mxu1 %v9728_v11  ;;  %9745 = vmatpush1.bf16.msra.mxu0 %v9744_v13  ;;  %v9766_v11 = vpack.c.bf16 %v6335_v1, %v6331_v0  ;;  %v10022_v13 = vpack.c.bf16 %v6337_v6, %v6333_v2  ;;  %v6368_v12 = vld [vmem:[#allocation25 + $0x1f0] sm:$0xff]  ;;  %v9784_v0 = vpack.c.bf16 %v6366_v55, %v6362_v53  ;;  %v6370_v2 = vld [vmem:[#allocation25 + $0x200] sm:$0xff] }
0x16fc   :  { %9731 = vmatprep.subr.bf16.mxu1 %v9730_v16  ;;  %9747 = vmatprep.subr.bf16.mxu0 %v9746_v19  ;;  %v6339_v16 = vld [vmem:[#allocation25 + $0x108] sm:$0xff]  ;;  %v10040_v1 = vpack.c.bf16 %v6368_v12, %v6364_v58  ;;  %v6374_v6 = vld [vmem:[#allocation25 + $0x220] sm:$0xff]  ;;  %v6372_v9 = vld [vmem:[#allocation25 + $0x210] sm:$0xff] }
0x16fd   :  { %v6343_v19 = vld [vmem:[#allocation25 + $0x128] sm:$0xff]  ;;  %v6376_v10 = vld [vmem:[#allocation25 + $0x230] sm:$0xff]  ;;  %v6413_v58 = vld [vmem:[#allocation25 + $0x358] sm:$0xff] }
0x16fe   :  { %v6404_v53 = vld [vmem:[#allocation25 + $0x310] sm:$0xff]  ;;  %v6417_v12 = vld [vmem:[#allocation25 + $0x378] sm:$0xff] }
0x16ff   :  { %9733 = vmatpush1.bf16.msra.mxu1 %v9732_v23  ;;  %9749 = vmatpush1.bf16.msra.mxu0 %v9748_v24  ;;  %v9770_v23 = vpack.c.bf16 %v6343_v19, %v6339_v16  ;;  %v10026_v24 = vpack.c.bf16 %v6345_v31, %v6341_v7  ;;  %v9788_v16 = vpack.c.bf16 %v6374_v6, %v6370_v2  ;;  %v6378_v7 = vld [vmem:[#allocation25 + $0x240] sm:$0xff]  ;;  %v6408_v55 = vld [vmem:[#allocation25 + $0x330] sm:$0xff] }
0x1700   :  { %9735 = vmatprep.subr.bf16.mxu1 %v9734_v26  ;;  %9751 = vmatprep.subr.bf16.mxu0 %v9750_v39  ;;  %v6347_v26 = vld [vmem:[#allocation25 + $0x148] sm:$0xff]  ;;  %v10044_v19 = vpack.c.bf16 %v6376_v10, %v6372_v9  ;;  %v6382_v31 = vld [vmem:[#allocation25 + $0x260] sm:$0xff]  ;;  %v6412_v2 = vld [vmem:[#allocation25 + $0x350] sm:$0xff] }
0x1701   :  { %v6351_v39 = vld [vmem:[#allocation25 + $0x168] sm:$0xff]  ;;  %v6416_v6 = vld [vmem:[#allocation25 + $0x370] sm:$0xff]  ;;  %v6421_v9 = vld [vmem:[#allocation25 + $0x398] sm:$0xff] }
0x1702   :  { %v6425_v10 = vld [vmem:[#allocation25 + $0x3b8] sm:$0xff] }
0x1703   :  { %9737 = vmatpush1.bf16.msra.mxu1 %v9736_v35  ;;  %9753 = vmatpush1.bf16.msra.mxu0 %v9752_v59  ;;  %v9774_v35 = vpack.c.bf16 %v6351_v39, %v6347_v26  ;;  %v10030_v59 = vpack.c.bf16 %v6353_v28, %v6349_v27  ;;  %v9792_v26 = vpack.c.bf16 %v6382_v31, %v6378_v7  ;;  %v6386_v27 = vld [vmem:[#allocation25 + $0x280] sm:$0xff]  ;;  %v6420_v7 = vld [vmem:[#allocation25 + $0x390] sm:$0xff] }
0x1704   :  { %9755 = vmatprep.subr.bf16.mxu0 %v9754_v17  ;;  %10011 = vmatprep.subr.bf16.mxu1 %v10010_v38  ;;  %v6355_v17 = vld [vmem:[#allocation25 + $0x188] sm:$0xff]  ;;  %v10048_v39 = vpack.c.bf16 %v6384_v22, %v6380_v21  ;;  %v6390_v28 = vld [vmem:[#allocation25 + $0x2a0] sm:$0xff]  ;;  %v6424_v31 = vld [vmem:[#allocation25 + $0x3b0] sm:$0xff] }
0x1705   :  { %v6359_v38 = vld [vmem:[#allocation25 + $0x1a8] sm:$0xff] }
0x1706   :  { %7791 = vmatmul.mubr.msk.f32.vlgmr.msra.gmra.mrb[32].mxu1 %vm433_vm1, %v11727_v5  ;;  %7792 = vmatmul.mubr.msk.f32.vlgmr.msra.gmra.mrb[44].mxu0 %vm433_vm1, %v11727_v5  ;;  %v10020_v5 = vpack.c.bf16 %v6328_v63, %v6324_v62  ;;  %v6373_v62 = vld [vmem:[#allocation25 + $0x218] sm:$0xff]  ;;  %v6427_v21 = vld [vmem:[#allocation25 + $0x3c8] sm:$0xff] }
0x1707   :  { %9757 = vmatpush1.bf16.msra.mxu0 %v9756_v43  ;;  %10013 = vmatpush1.bf16.msra.mxu1 %v10012_v44  ;;  %v9778_v43 = vpack.c.bf16 %v6359_v38, %v6355_v17  ;;  %v10034_v44 = vpack.c.bf16 %v6361_v18, %v6357_v51  ;;  %v6377_v63 = vld [vmem:[#allocation25 + $0x238] sm:$0xff]  ;;  %v9796_v17 = vpack.c.bf16 %v6390_v28, %v6386_v27  ;;  %v6394_v51 = vld [vmem:[#allocation25 + $0x2c0] sm:$0xff]  ;;  %v6431_v22 = vld [vmem:[#allocation25 + $0x3e8] sm:$0xff] }
0x1708   :  { %9759 = vmatprep.subr.bf16.mxu0 %v9758_v47  ;;  %10015 = vmatprep.subr.bf16.mxu1 %v10014_v48  ;;  %v6363_v47 = vld [vmem:[#allocation25 + $0x1c8] sm:$0xff]  ;;  %v10052_v38 = vpack.c.bf16 %v6392_v33, %v6388_v32  ;;  %v6398_v18 = vld [vmem:[#allocation25 + $0x2e0] sm:$0xff]  ;;  %v6428_v28 = vld [vmem:[#allocation25 + $0x3d0] sm:$0xff] }
0x1709   :  { %v6367_v48 = vld [vmem:[#allocation25 + $0x1e8] sm:$0xff] }
0x170a   :  { %v6435_v32 = vld [vmem:[#allocation25 + $0x408] sm:$0xff] }
0x170b   :  { %9761 = vmatpush1.bf16.msra.mxu0 %v9760_v56  ;;  %10017 = vmatpush1.bf16.msra.mxu1 %v10016_v57  ;;  %v9782_v56 = vpack.c.bf16 %v6367_v48, %v6363_v47  ;;  %v10038_v57 = vpack.c.bf16 %v6369_v50, %v6365_v49  ;;  %v9800_v47 = vpack.c.bf16 %v6398_v18, %v6394_v51  ;;  %v6402_v49 = vld [vmem:[#allocation25 + $0x300] sm:$0xff]  ;;  %v6439_v33 = vld [vmem:[#allocation25 + $0x428] sm:$0xff]  ;;  %v11742_v18 = vld [vmem:[#allocation23] sm:$0xff] }
0x170c   :  { %9763 = vmatprep.subr.bf16.mxu0 %v9762_v60  ;;  %10019 = vmatprep.subr.bf16.mxu1 %v10018_v61  ;;  %v6371_v60 = vld [vmem:[#allocation25 + $0x208] sm:$0xff]  ;;  %v10056_v48 = vpack.c.bf16 %v6400_v42, %v6396_v41  ;;  %v6406_v50 = vld [vmem:[#allocation25 + $0x320] sm:$0xff] }
0x170d   :  { %v6375_v61 = vld [vmem:[#allocation25 + $0x228] sm:$0xff] }
0x170f   :  { %9765 = vmatpush1.bf16.msra.mxu0 %v9764_v8  ;;  %10021 = vmatpush1.bf16.msra.mxu1 %v10020_v5  ;;  %v9786_v8 = vpack.c.bf16 %v6375_v61, %v6371_v60  ;;  %v10042_v5 = vpack.c.bf16 %v6377_v63, %v6373_v62  ;;  %v9804_v60 = vpack.c.bf16 %v6406_v50, %v6402_v49  ;;  %v6410_v62 = vld [vmem:[#allocation25 + $0x340] sm:$0xff] }
0x1710   :  { %9767 = vmatprep.subr.bf16.mxu0 %v9766_v11  ;;  %10023 = vmatprep.subr.bf16.mxu1 %v10022_v13  ;;  %v6379_v11 = vld [vmem:[#allocation25 + $0x248] sm:$0xff]  ;;  %v10060_v61 = vpack.c.bf16 %v6408_v55, %v6404_v53  ;;  %v6414_v63 = vld [vmem:[#allocation25 + $0x360] sm:$0xff] }
0x1711   :  { %v6383_v13 = vld [vmem:[#allocation25 + $0x268] sm:$0xff]  ;;  %v6438_v50 = vld [vmem:[#allocation25 + $0x420] sm:$0xff] }
0x1712   :  { %v6443_v55 = vld [vmem:[#allocation25 + $0x448] sm:$0xff] }
0x1713   :  { %9769 = vmatpush1.bf16.msra.mxu0 %v9768_v34  ;;  %10025 = vmatpush1.bf16.msra.mxu1 %v10024_v20  ;;  %v9790_v34 = vpack.c.bf16 %v6383_v13, %v6379_v11  ;;  %v10046_v20 = vpack.c.bf16 %v6385_v15, %v6381_v14  ;;  %v9808_v11 = vpack.c.bf16 %v6414_v63, %v6410_v62  ;;  %v6418_v14 = vld [vmem:[#allocation25 + $0x380] sm:$0xff] }
0x1714   :  { %9771 = vmatprep.subr.bf16.mxu0 %v9770_v23  ;;  %10027 = vmatprep.subr.bf16.mxu1 %v10026_v24  ;;  %v6387_v23 = vld [vmem:[#allocation25 + $0x288] sm:$0xff]  ;;  %v10064_v13 = vpack.c.bf16 %v6416_v6, %v6412_v2  ;;  %v6442_v63 = vld [vmem:[#allocation25 + $0x440] sm:$0xff]  ;;  %v6444_v2 = vld [vmem:[#allocation25 + $0x450] sm:$0xff] }
0x1715   :  { %v6391_v24 = vld [vmem:[#allocation25 + $0x2a8] sm:$0xff]  ;;  %v6448_v6 = vld [vmem:[#allocation25 + $0x470] sm:$0xff] }
0x1717   :  { %9773 = vmatpush1.bf16.msra.mxu0 %v9772_v29  ;;  %10029 = vmatpush1.bf16.msra.mxu1 %v10028_v30  ;;  %v9794_v29 = vpack.c.bf16 %v6391_v24, %v6387_v23  ;;  %v10050_v30 = vpack.c.bf16 %v6393_v4, %v6389_v25  ;;  %v6429_v23 = vld [vmem:[#allocation25 + $0x3d8] sm:$0xff]  ;;  %v9814_v24 = vpack.c.bf16 %v6431_v22, %v6427_v21  ;;  %v6426_v4 = vld [vmem:[#allocation25 + $0x3c0] sm:$0xff]  ;;  %v6456_v21 = vld [vmem:[#allocation25 + $0x4b0] sm:$0xff] }
0x1718   :  { %9775 = vmatprep.subr.bf16.mxu0 %v9774_v35  ;;  %10031 = vmatprep.subr.bf16.mxu1 %v10030_v59  ;;  %v6395_v35 = vld [vmem:[#allocation25 + $0x2c8] sm:$0xff]  ;;  %v6433_v25 = vld [vmem:[#allocation25 + $0x3f8] sm:$0xff] }
0x1719   :  { %v6399_v59 = vld [vmem:[#allocation25 + $0x2e8] sm:$0xff] }
0x171a   :  { %v6459_v22 = vld [vmem:[#allocation25 + $0x4c8] sm:$0xff] }
0x171b   :  { %9777 = vmatpush1.bf16.msra.mxu0 %v9776_v54  ;;  %10033 = vmatpush1.bf16.msra.mxu1 %v10032_v40  ;;  %v9798_v54 = vpack.c.bf16 %v6399_v59, %v6395_v35  ;;  %v10054_v40 = vpack.c.bf16 %v6401_v37, %v6397_v36  ;;  %v6437_v35 = vld [vmem:[#allocation25 + $0x418] sm:$0xff]  ;;  %v9818_v59 = vpack.c.bf16 %v6439_v33, %v6435_v32  ;;  %v6464_v32 = vld [vmem:[#allocation25 + $0x4f0] sm:$0xff]  ;;  %v6467_v33 = vld [vmem:[#allocation25 + $0x508] sm:$0xff] }
0x171c   :  { %9779 = vmatprep.subr.bf16.mxu0 %v9778_v43  ;;  %10035 = vmatprep.subr.bf16.mxu1 %v10034_v44  ;;  %v6403_v43 = vld [vmem:[#allocation25 + $0x308] sm:$0xff]  ;;  %v6441_v36 = vld [vmem:[#allocation25 + $0x438] sm:$0xff] }
0x171d   :  { %v6407_v44 = vld [vmem:[#allocation25 + $0x328] sm:$0xff]  ;;  %v10074_v37 = vpack.c.bf16 %v6441_v36, %v6437_v35  ;;  %v6473_v36 = vld [vmem:[#allocation25 + $0x538] sm:$0xff] }
0x171e   :  { %v6471_v35 = vld [vmem:[#allocation25 + $0x528] sm:$0xff] }
0x171f   :  { %9781 = vmatpush1.bf16.msra.mxu0 %v9780_v52  ;;  %10037 = vmatpush1.bf16.msra.mxu1 %v10036_v3  ;;  %v9802_v52 = vpack.c.bf16 %v6407_v44, %v6403_v43  ;;  %v10058_v3 = vpack.c.bf16 %v6409_v46, %v6405_v45  ;;  %v6434_v46 = vld [vmem:[#allocation25 + $0x400] sm:$0xff] }
0x1720   :  { %9783 = vmatprep.subr.bf16.mxu0 %v9782_v56  ;;  %10039 = vmatprep.subr.bf16.mxu1 %v10038_v57  ;;  %v6411_v56 = vld [vmem:[#allocation25 + $0x348] sm:$0xff] }
0x1721   :  { %v6415_v57 = vld [vmem:[#allocation25 + $0x368] sm:$0xff] }
0x1723   :  { %9785 = vmatpush1.bf16.msra.mxu0 %v9784_v0  ;;  %10041 = vmatpush1.bf16.msra.mxu1 %v10040_v1  ;;  %v9806_v0 = vpack.c.bf16 %v6415_v57, %v6411_v56  ;;  %v10062_v1 = vpack.c.bf16 %v6417_v12, %v6413_v58  ;;  %v6447_v57 = vld [vmem:[#allocation25 + $0x468] sm:$0xff]  ;;  %v6445_v58 = vld [vmem:[#allocation25 + $0x458] sm:$0xff] }
0x1724   :  { %9787 = vmatprep.subr.bf16.mxu0 %v9786_v8  ;;  %10043 = vmatprep.subr.bf16.mxu1 %v10042_v5  ;;  %v6419_v8 = vld [vmem:[#allocation25 + $0x388] sm:$0xff]  ;;  %v6449_v12 = vld [vmem:[#allocation25 + $0x478] sm:$0xff] }
0x1725   :  { %v6423_v5 = vld [vmem:[#allocation25 + $0x3a8] sm:$0xff] }
0x1726   :  { %v9810_v15 = vpack.c.bf16 %v6423_v5, %v6419_v8  ;;  %v6451_v8 = vld [vmem:[#allocation25 + $0x488] sm:$0xff]  ;;  %v9822_v5 = vpack.c.bf16 %v6447_v57, %v6443_v55  ;;  %v6477_v55 = vld [vmem:[#allocation25 + $0x558] sm:$0xff] }
0x1727   :  { %9789 = vmatpush1.bf16.msra.mxu0 %v9788_v16  ;;  %10045 = vmatpush1.bf16.msra.mxu1 %v10044_v19  ;;  %v10066_v16 = vpack.c.bf16 %v6425_v10, %v6421_v9  ;;  %v6422_v19 = vld [vmem:[#allocation25 + $0x3a0] sm:$0xff]  ;;  %v10078_v9 = vpack.c.bf16 %v6449_v12, %v6445_v58  ;;  %v6455_v10 = vld [vmem:[#allocation25 + $0x4a8] sm:$0xff] }
0x1728   :  { %9791 = vmatprep.subr.bf16.mxu0 %v9790_v34  ;;  %10047 = vmatprep.subr.bf16.mxu1 %v10046_v20  ;;  %v9812_v34 = vpack.c.bf16 %v6422_v19, %v6418_v14  ;;  %v10068_v20 = vpack.c.bf16 %v6424_v31, %v6420_v7  ;;  %v6450_v19 = vld [vmem:[#allocation25 + $0x480] sm:$0xff]  ;;  %v9826_v31 = vpack.c.bf16 %v6455_v10, %v6451_v8  ;;  %v6489_v8 = vld [vmem:[#allocation25 + $0x5b8] sm:$0xff] }
0x1729   :  { %v6454_v7 = vld [vmem:[#allocation25 + $0x4a0] sm:$0xff] }
0x172a   :  { %v6474_v12 = vld [vmem:[#allocation25 + $0x540] sm:$0xff] }
0x172b   :  { %9793 = vmatpush1.bf16.msra.mxu0 %v9792_v26  ;;  %10049 = vmatpush1.bf16.msra.mxu1 %v10048_v39  ;;  %v6430_v26 = vld [vmem:[#allocation25 + $0x3e0] sm:$0xff]  ;;  %v10070_v39 = vpack.c.bf16 %v6433_v25, %v6429_v23  ;;  %v6463_v23 = vld [vmem:[#allocation25 + $0x4e8] sm:$0xff]  ;;  %v6465_v25 = vld [vmem:[#allocation25 + $0x4f8] sm:$0xff] }
0x172c   :  { %9795 = vmatprep.subr.bf16.mxu0 %v9794_v29  ;;  %10051 = vmatprep.subr.bf16.mxu1 %v10050_v30  ;;  %v9816_v27 = vpack.c.bf16 %v6430_v26, %v6426_v4  ;;  %v6432_v29 = vld [vmem:[#allocation25 + $0x3f0] sm:$0xff]  ;;  %v9828_v4 = vpack.c.bf16 %v6454_v7, %v6450_v19  ;;  %v6482_v10 = vld [vmem:[#allocation25 + $0x580] sm:$0xff]  ;;  %v6491_v19 = vld [vmem:[#allocation25 + $0x5c8] sm:$0xff] }
0x172d   :  { %v10072_v30 = vpack.c.bf16 %v6432_v29, %v6428_v28  ;;  %v9830_v28 = vpack.c.bf16 %v6463_v23, %v6459_v22  ;;  %v6495_v7 = vld [vmem:[#allocation25 + $0x5e8] sm:$0xff]  ;;  %v6490_v22 = vld [vmem:[#allocation25 + $0x5c0] sm:$0xff] }
0x172e   :  { %v6494_v23 = vld [vmem:[#allocation25 + $0x5e0] sm:$0xff] }
0x172f   :  { %9797 = vmatpush1.bf16.msra.mxu0 %v9796_v17  ;;  %10053 = vmatpush1.bf16.msra.mxu1 %v10052_v38  ;;  %v4945_v17 = vlaneseq }
0x1730   :  { %9799 = vmatprep.subr.bf16.mxu0 %v9798_v54  ;;  %10055 = vmatprep.subr.bf16.mxu1 %v10054_v40 }
0x1731   :  { %v11739_v38 = vshrl.u32 %v4945_v17, 7 }
0x1733   :  { %9801 = vmatpush1.bf16.msra.mxu0 %v9800_v47  ;;  %10057 = vmatpush1.bf16.msra.mxu1 %v10056_v48  ;;  %v4947_v51 = vsub.s32 0, %v11739_v38  ;;  %v4951_v54 = vsub.s32 1, %v11739_v38  ;;  %v4959_v40 = vsub.s32 3, %v11739_v38 }
0x1734   :  { %9803 = vmatprep.subr.bf16.mxu0 %v9802_v52  ;;  %10059 = vmatprep.subr.bf16.mxu1 %v10058_v3  ;;  %v6436_v52 = vld [vmem:[#allocation25 + $0x410] sm:$0xff] }
0x1735   :  { %v4948_v41 = vrot.slane %v11742_v18, %v4947_v51  ;;  %v4952_v42 = vrot.slane %v11742_v18, %v4951_v54  ;;  %v4960_v43 = vrot.slane %v11742_v18, %v4959_v40  ;;  %v6440_v3 = vld [vmem:[#allocation25 + $0x430] sm:$0xff] }
0x1736   :  { %v10076_v62 = vpack.c.bf16 %v6440_v3, %v6436_v52  ;;  %v6472_v52 = vld [vmem:[#allocation25 + $0x530] sm:$0xff]  ;;  %v6475_v3 = vld [vmem:[#allocation25 + $0x548] sm:$0xff] }
0x1737   :  { %9805 = vmatpush1.bf16.msra.mxu0 %v9804_v60  ;;  %10061 = vmatpush1.bf16.msra.mxu1 %v10060_v61  ;;  %v9820_v61 = vpack.c.bf16 %v6438_v50, %v6434_v46  ;;  %v6468_v50 = vld [vmem:[#allocation25 + $0x510] sm:$0xff] }
0x1738   :  { %9807 = vmatprep.subr.bf16.mxu0 %v9806_v0  ;;  %10063 = vmatprep.subr.bf16.mxu1 %v10062_v1  ;;  %v6446_v0 = vld [vmem:[#allocation25 + $0x460] sm:$0xff]  ;;  %v10092_v58 = vpack.c.bf16 %v6472_v52, %v6468_v50 }
0x173b   :  { %9809 = vmatpush1.bf16.msra.mxu0 %v9808_v11  ;;  %10065 = vmatpush1.bf16.msra.mxu1 %v10064_v13  ;;  %v6453_v11 = vld [vmem:[#allocation25 + $0x498] sm:$0xff] }
0x173c   :  { %9811 = vmatprep.subr.bf16.mxu0 %v9810_v15  ;;  %10067 = vmatprep.subr.bf16.mxu1 %v10066_v16  ;;  %v6457_v13 = vld [vmem:[#allocation25 + $0x4b8] sm:$0xff]  ;;  %v9824_v15 = vpack.c.bf16 %v6446_v0, %v6442_v63  ;;  %v10080_v16 = vpack.c.bf16 %v6448_v6, %v6444_v2  ;;  %v6476_v63 = vld [vmem:[#allocation25 + $0x550] sm:$0xff]  ;;  %v6487_v2 = vld [vmem:[#allocation25 + $0x5a8] sm:$0xff] }
0x173d   :  { %v6480_v0 = vld [vmem:[#allocation25 + $0x570] sm:$0xff]  ;;  %v6485_v6 = vld [vmem:[#allocation25 + $0x598] sm:$0xff] }
0x173f   :  { %9813 = vmatpush1.bf16.msra.mxu0 %v9812_v34  ;;  %10069 = vmatpush1.bf16.msra.mxu1 %v10068_v20  ;;  %v10082_v34 = vpack.c.bf16 %v6457_v13, %v6453_v11  ;;  %v6452_v20 = vld [vmem:[#allocation25 + $0x490] sm:$0xff]  ;;  %v6486_v11 = vld [vmem:[#allocation25 + $0x5a0] sm:$0xff] }
0x1740   :  { %9815 = vmatprep.subr.bf16.mxu0 %v9814_v24  ;;  %10071 = vmatprep.subr.bf16.mxu1 %v10070_v39  ;;  %v6461_v24 = vld [vmem:[#allocation25 + $0x4d8] sm:$0xff]  ;;  %v10084_v26 = vpack.c.bf16 %v6456_v21, %v6452_v20  ;;  %v6458_v39 = vld [vmem:[#allocation25 + $0x4c0] sm:$0xff]  ;;  %v9844_v20 = vpack.c.bf16 %v6486_v11, %v6482_v10  ;;  %v6523_v10 = vld [vmem:[#allocation25 + $0x6c8] sm:$0xff] }
0x1741   :  { %v10086_v29 = vpack.c.bf16 %v6465_v25, %v6461_v24  ;;  %v9846_v24 = vpack.c.bf16 %v6495_v7, %v6491_v19  ;;  %v6527_v11 = vld [vmem:[#allocation25 + $0x6e8] sm:$0xff]  ;;  %v6522_v19 = vld [vmem:[#allocation25 + $0x6c0] sm:$0xff] }
0x1742   :  { %v6526_v7 = vld [vmem:[#allocation25 + $0x6e0] sm:$0xff] }
0x1743   :  { %9817 = vmatpush1.bf16.msra.mxu0 %v9816_v27  ;;  %10073 = vmatpush1.bf16.msra.mxu1 %v10072_v30  ;;  %v6462_v27 = vld [vmem:[#allocation25 + $0x4e0] sm:$0xff]  ;;  %v6460_v30 = vld [vmem:[#allocation25 + $0x4d0] sm:$0xff] }
0x1744   :  { %9819 = vmatprep.subr.bf16.mxu0 %v9818_v59  ;;  %10075 = vmatprep.subr.bf16.mxu1 %v10074_v37  ;;  %v6469_v59 = vld [vmem:[#allocation25 + $0x518] sm:$0xff] }
0x17c9   :  { %v6072_v44 = vpop.f32.mrb[30].mxu1  ;;  %v11755_v45 = vpop.f32.mrb[42].mxu0 }
0x17ca   :  { %v10347_v47 = vadd.f32 %v6072_v44, %v4948_v41  ;;  %v6074_v48 = vpop.f32.mrb[31].mxu1  ;;  %v6145_v49 = vpop.f32.mrb[43].mxu0  ;;  %v9832_v41 = vpack.c.bf16 %v6462_v27, %v6458_v39  ;;  %v6470_v44 = vld [vmem:[#allocation25 + $0x520] sm:$0xff]  ;;  %v6499_v39 = vld [vmem:[#allocation25 + $0x608] sm:$0xff] }
0x17cb   :  { %v10348_v53 = vadd.f32 %v6074_v48, %v4952_v42  ;;  %v10350_v56 = vadd.f32 %v6145_v49, %v4960_v43  ;;  %v10088_v42 = vpack.c.bf16 %v6464_v32, %v6460_v30  ;;  %v6466_v43 = vld [vmem:[#allocation25 + $0x500] sm:$0xff]  ;;  %v9834_v48 = vpack.c.bf16 %v6471_v35, %v6467_v33  ;;  %v6503_v27 = vld [vmem:[#allocation25 + $0x628] sm:$0xff] }
0x17cc   :  { %v6298_v1 = vmax.f32 %v10347_v47, 0.0  ;;  %v10090_v49 = vpack.c.bf16 %v6473_v36, %v6469_v59  ;;  %v9836_v57 = vpack.c.bf16 %v6470_v44, %v6466_v43  ;;  %v9848_v30 = vpack.c.bf16 %v6494_v23, %v6490_v22  ;;  %v6498_v33 = vld [vmem:[#allocation25 + $0x600] sm:$0xff]  ;;  %v6507_v43 = vld [vmem:[#allocation25 + $0x648] sm:$0xff] }
0x17cd   :  { %v6299_v60 = vmax.f32 %v10348_v53, 0.0  ;;  %v6301_v14 = vmax.f32 %v10350_v56, 0.0  ;;  %v6479_v53 = vld [vmem:[#allocation25 + $0x568] sm:$0xff]  ;;  %v6481_v56 = vld [vmem:[#allocation25 + $0x578] sm:$0xff]  ;;  %v6502_v35 = vld [vmem:[#allocation25 + $0x620] sm:$0xff]  ;;  %v9850_v59 = vpack.c.bf16 %v6503_v27, %v6499_v39 }
0x17ce   :  { %v6511_v44 = vld [vmem:[#allocation25 + $0x668] sm:$0xff]  ;;  %v9852_v50 = vpack.c.bf16 %v6502_v35, %v6498_v33  ;;  %v6530_v39 = vld [vmem:[#allocation25 + $0x700] sm:$0xff] }
0x17cf   :  { %6904 = vmatprep.mubr.f32.mxu0 %v6299_v60  ;;  %7188 = vmatprep.mubr.f32.mxu1 %v6299_v60  ;;  %v6478_v60 = vld [vmem:[#allocation25 + $0x560] sm:$0xff]  ;;  %v6531_v22 = vld [vmem:[#allocation25 + $0x708] sm:$0xff] }
0x17d0   :  { %6905 = vmatmul.mubr.f32.vlgmr.msra.gmra.mrb[46].mxu0 %v6298_v1  ;;  %7189 = vmatmul.mubr.f32.vlgmr.msra.gmra.mrb[40].mxu1 %v6298_v1  ;;  %v6483_v1 = vld [vmem:[#allocation25 + $0x588] sm:$0xff]  ;;  %v6534_v27 = vld [vmem:[#allocation25 + $0x720] sm:$0xff] }
0x17d1   :  { %9821 = vmatpush1.bf16.msra.mxu0 %v9820_v61  ;;  %10077 = vmatpush1.bf16.msra.mxu1 %v10076_v62  ;;  %v9838_v61 = vpack.c.bf16 %v6479_v53, %v6475_v3  ;;  %v10094_v62 = vpack.c.bf16 %v6481_v56, %v6477_v55  ;;  %v9842_v13 = vpack.c.bf16 %v6487_v2, %v6483_v1  ;;  %v6506_v3 = vld [vmem:[#allocation25 + $0x640] sm:$0xff]  ;;  %v6535_v23 = vld [vmem:[#allocation25 + $0x728] sm:$0xff] }
0x17d2   :  { %6975 = vmatprep.mubr.f32.mxu0 %v6301_v14  ;;  %7259 = vmatprep.mubr.f32.mxu1 %v6301_v14  ;;  %v10098_v14 = vpack.c.bf16 %v6489_v8, %v6485_v6  ;;  %v6510_v53 = vld [vmem:[#allocation25 + $0x660] sm:$0xff]  ;;  %v9854_v55 = vpack.c.bf16 %v6511_v44, %v6507_v43  ;;  %v6539_v33 = vld [vmem:[#allocation25 + $0x748] sm:$0xff] }
0x17d3   :  { %9823 = vmatprep.subr.bf16.mxu0 %v9822_v5  ;;  %10079 = vmatprep.subr.bf16.mxu1 %v10078_v9  ;;  %v9840_v5 = vpack.c.bf16 %v6478_v60, %v6474_v12  ;;  %v10096_v9 = vpack.c.bf16 %v6480_v0, %v6476_v63  ;;  %v6515_v12 = vld [vmem:[#allocation25 + $0x688] sm:$0xff]  ;;  %v9856_v63 = vpack.c.bf16 %v6510_v53, %v6506_v3  ;;  %v6514_v1 = vld [vmem:[#allocation25 + $0x680] sm:$0xff] }
0x17d4   :  { %v6519_v60 = vld [vmem:[#allocation25 + $0x6a8] sm:$0xff]  ;;  %v6518_v2 = vld [vmem:[#allocation25 + $0x6a0] sm:$0xff] }
0x17d5   :  { %9825 = vmatpush1.bf16.msra.mxu0 %v9824_v15  ;;  %10081 = vmatpush1.bf16.msra.mxu1 %v10080_v16  ;;  %v6484_v15 = vld [vmem:[#allocation25 + $0x590] sm:$0xff]  ;;  %v9858_v6 = vpack.c.bf16 %v6519_v60, %v6515_v12  ;;  %v6543_v35 = vld [vmem:[#allocation25 + $0x768] sm:$0xff]  ;;  %v6538_v43 = vld [vmem:[#allocation25 + $0x740] sm:$0xff] }
0x17d6   :  { %9827 = vmatprep.subr.bf16.mxu0 %v9826_v31  ;;  %10083 = vmatprep.subr.bf16.mxu1 %v10082_v34  ;;  %v6488_v16 = vld [vmem:[#allocation25 + $0x5b0] sm:$0xff]  ;;  %v6493_v31 = vld [vmem:[#allocation25 + $0x5d8] sm:$0xff]  ;;  %v6542_v44 = vld [vmem:[#allocation25 + $0x760] sm:$0xff] }
0x17d7   :  { %v6497_v34 = vld [vmem:[#allocation25 + $0x5f8] sm:$0xff]  ;;  %v10100_v21 = vpack.c.bf16 %v6488_v16, %v6484_v15  ;;  %v9860_v15 = vpack.c.bf16 %v6518_v2, %v6514_v1  ;;  %v6547_v3 = vld [vmem:[#allocation25 + $0x788] sm:$0xff]  ;;  %v6546_v12 = vld [vmem:[#allocation25 + $0x780] sm:$0xff] }
0x17d8   :  { %v10102_v25 = vpack.c.bf16 %v6497_v34, %v6493_v31  ;;  %v9862_v31 = vpack.c.bf16 %v6527_v11, %v6523_v10  ;;  %v6551_v53 = vld [vmem:[#allocation25 + $0x7a8] sm:$0xff]  ;;  %v6550_v60 = vld [vmem:[#allocation25 + $0x7a0] sm:$0xff]  ;;  %v6552_v1 = vld [vmem:[#allocation25 + $0x7b0] sm:$0xff] }
0x17d9   :  { %v11757_v37 = vpop.f32.mrb[32].mxu1  ;;  %v11759_v17 = vpop.f32.mrb[44].mxu0  ;;  %9829 = vmatpush1.bf16.msra.mxu0 %v9828_v4  ;;  %10085 = vmatpush1.bf16.msra.mxu1 %v10084_v26  ;;  %v6492_v4 = vld [vmem:[#allocation25 + $0x5d0] sm:$0xff]  ;;  %v6555_v2 = vld [vmem:[#allocation25 + $0x7c8] sm:$0xff]  ;;  %v9876_v10 = vpack.c.bf16 %v6550_v60, %v6546_v12  ;;  %v6578_v12 = vld [vmem:[#allocation25 + $0x880] sm:$0xff] }
0x17da   :  { %v11761_v46 = vpop.f32.mrb[33].mxu1  ;;  %v11763_v47 = vpop.f32.mrb[45].mxu0  ;;  %9831 = vmatprep.subr.bf16.mxu0 %v9830_v28  ;;  %10087 = vmatprep.subr.bf16.mxu1 %v10086_v29  ;;  %v6496_v26 = vld [vmem:[#allocation25 + $0x5f0] sm:$0xff]  ;;  %v6501_v28 = vld [vmem:[#allocation25 + $0x618] sm:$0xff]  ;;  %v6582_v60 = vld [vmem:[#allocation25 + $0x8a0] sm:$0xff] }
0x17db   :  { %v6505_v29 = vld [vmem:[#allocation25 + $0x638] sm:$0xff]  ;;  %v10104_v32 = vpack.c.bf16 %v6496_v26, %v6492_v4  ;;  %v9864_v4 = vpack.c.bf16 %v6526_v7, %v6522_v19  ;;  %v6556_v7 = vld [vmem:[#allocation25 + $0x7d0] sm:$0xff] }
0x17dc   :  { %v10106_v36 = vpack.c.bf16 %v6505_v29, %v6501_v28  ;;  %v9866_v28 = vpack.c.bf16 %v6535_v23, %v6531_v22  ;;  %v6565_v22 = vld [vmem:[#allocation25 + $0x818] sm:$0xff] }
0x17dd   :  { %9833 = vmatpush1.bf16.msra.mxu0 %v9832_v41  ;;  %10089 = vmatpush1.bf16.msra.mxu1 %v10088_v42  ;;  %v6500_v41 = vld [vmem:[#allocation25 + $0x610] sm:$0xff]  ;;  %v6569_v23 = vld [vmem:[#allocation25 + $0x838] sm:$0xff] }
0x17de   :  { %9835 = vmatprep.subr.bf16.mxu0 %v9834_v48  ;;  %10091 = vmatprep.subr.bf16.mxu1 %v10090_v49  ;;  %v6504_v42 = vld [vmem:[#allocation25 + $0x630] sm:$0xff]  ;;  %v6509_v48 = vld [vmem:[#allocation25 + $0x658] sm:$0xff] }
0x17df   :  { %v6513_v49 = vld [vmem:[#allocation25 + $0x678] sm:$0xff]  ;;  %v10108_v52 = vpack.c.bf16 %v6504_v42, %v6500_v41  ;;  %v9868_v41 = vpack.c.bf16 %v6534_v27, %v6530_v39  ;;  %v10138_v39 = vpack.c.bf16 %v6569_v23, %v6565_v22  ;;  %v6562_v27 = vld [vmem:[#allocation25 + $0x800] sm:$0xff] }
0x17e0   :  { %v10110_v56 = vpack.c.bf16 %v6513_v49, %v6509_v48  ;;  %v9870_v48 = vpack.c.bf16 %v6543_v35, %v6539_v33  ;;  %v6575_v33 = vld [vmem:[#allocation25 + $0x868] sm:$0xff]  ;;  %v6573_v35 = vld [vmem:[#allocation25 + $0x858] sm:$0xff]  ;;  %v6594_v23 = vld [vmem:[#allocation25 + $0x900] sm:$0xff] }
0x17e1   :  { %9837 = vmatpush1.bf16.msra.mxu0 %v9836_v57  ;;  %10093 = vmatpush1.bf16.msra.mxu1 %v10092_v58  ;;  %v6508_v57 = vld [vmem:[#allocation25 + $0x650] sm:$0xff] }
0x17e2   :  { %9839 = vmatprep.subr.bf16.mxu0 %v9838_v61  ;;  %10095 = vmatprep.subr.bf16.mxu1 %v10094_v62  ;;  %v6512_v58 = vld [vmem:[#allocation25 + $0x670] sm:$0xff]  ;;  %v6517_v61 = vld [vmem:[#allocation25 + $0x698] sm:$0xff] }
0x17e3   :  { %v6521_v62 = vld [vmem:[#allocation25 + $0x6b8] sm:$0xff]  ;;  %v10112_v0 = vpack.c.bf16 %v6512_v58, %v6508_v57  ;;  %v9872_v57 = vpack.c.bf16 %v6542_v44, %v6538_v43  ;;  %v6574_v43 = vld [vmem:[#allocation25 + $0x860] sm:$0xff]  ;;  %v6572_v44 = vld [vmem:[#allocation25 + $0x850] sm:$0xff] }
0x17e4   :  { %v10114_v8 = vpack.c.bf16 %v6521_v62, %v6517_v61  ;;  %v4955_v61 = vsub.s32 2, %v11739_v38  ;;  %v9874_v62 = vpack.c.bf16 %v6551_v53, %v6547_v3  ;;  %v6583_v3 = vld [vmem:[#allocation25 + $0x8a8] sm:$0xff]  ;;  %v6581_v53 = vld [vmem:[#allocation25 + $0x898] sm:$0xff] }
0x17e5   :  { %9841 = vmatpush1.bf16.msra.mxu0 %v9840_v5  ;;  %10097 = vmatpush1.bf16.msra.mxu1 %v10096_v9  ;;  %v6516_v5 = vld [vmem:[#allocation25 + $0x690] sm:$0xff] }
0x17e6   :  { %9843 = vmatprep.subr.bf16.mxu0 %v9842_v13  ;;  %10099 = vmatprep.subr.bf16.mxu1 %v10098_v14  ;;  %v6520_v9 = vld [vmem:[#allocation25 + $0x6b0] sm:$0xff]  ;;  %v6525_v13 = vld [vmem:[#allocation25 + $0x6d8] sm:$0xff] }
0x17e7   :  { %v6529_v14 = vld [vmem:[#allocation25 + $0x6f8] sm:$0xff]  ;;  %v10116_v16 = vpack.c.bf16 %v6520_v9, %v6516_v5 }
0x17e8   :  { %v10118_v34 = vpack.c.bf16 %v6529_v14, %v6525_v13  ;;  %v6557_v5 = vld [vmem:[#allocation25 + $0x7d8] sm:$0xff]  ;;  %v6554_v13 = vld [vmem:[#allocation25 + $0x7c0] sm:$0xff] }
0x17e9   :  { %9845 = vmatpush1.bf16.msra.mxu0 %v9844_v20  ;;  %10101 = vmatpush1.bf16.msra.mxu1 %v10100_v21  ;;  %v6524_v20 = vld [vmem:[#allocation25 + $0x6d0] sm:$0xff]  ;;  %v6561_v9 = vld [vmem:[#allocation25 + $0x7f8] sm:$0xff]  ;;  %v6558_v14 = vld [vmem:[#allocation25 + $0x7e0] sm:$0xff] }
0x17ea   :  { %9847 = vmatprep.subr.bf16.mxu0 %v9846_v24  ;;  %10103 = vmatprep.subr.bf16.mxu1 %v10102_v25  ;;  %v6528_v21 = vld [vmem:[#allocation25 + $0x6f0] sm:$0xff]  ;;  %v6533_v24 = vld [vmem:[#allocation25 + $0x718] sm:$0xff]  ;;  %v10134_v19 = vpack.c.bf16 %v6561_v9, %v6557_v5  ;;  %v9892_v5 = vpack.c.bf16 %v6582_v60, %v6578_v12 }
0x17eb   :  { %v6537_v25 = vld [vmem:[#allocation25 + $0x738] sm:$0xff]  ;;  %v10120_v26 = vpack.c.bf16 %v6528_v21, %v6524_v20  ;;  %v6567_v21 = vld [vmem:[#allocation25 + $0x828] sm:$0xff] }
0x17ec   :  { %v10122_v29 = vpack.c.bf16 %v6537_v25, %v6533_v24  ;;  %v9880_v24 = vpack.c.bf16 %v6558_v14, %v6554_v13  ;;  %v6590_v13 = vld [vmem:[#allocation25 + $0x8e0] sm:$0xff]  ;;  %v6588_v14 = vld [vmem:[#allocation25 + $0x8d0] sm:$0xff]  ;;  %v6625_v12 = vld [vmem:[#allocation25 + $0x9f8] sm:$0xff] }
0x17ed   :  { %9849 = vmatpush1.bf16.msra.mxu0 %v9848_v30  ;;  %10105 = vmatpush1.bf16.msra.mxu1 %v10104_v32  ;;  %v6532_v30 = vld [vmem:[#allocation25 + $0x710] sm:$0xff] }
0x17ee   :  { %9851 = vmatprep.subr.bf16.mxu0 %v9850_v59  ;;  %10107 = vmatprep.subr.bf16.mxu1 %v10106_v36  ;;  %v6536_v32 = vld [vmem:[#allocation25 + $0x730] sm:$0xff]  ;;  %v6541_v59 = vld [vmem:[#allocation25 + $0x758] sm:$0xff] }
0x17ef   :  { %v6545_v36 = vld [vmem:[#allocation25 + $0x778] sm:$0xff]  ;;  %v10124_v42 = vpack.c.bf16 %v6536_v32, %v6532_v30  ;;  %v6564_v30 = vld [vmem:[#allocation25 + $0x810] sm:$0xff] }
0x17f0   :  { %v10126_v49 = vpack.c.bf16 %v6545_v36, %v6541_v59  ;;  %v6568_v32 = vld [vmem:[#allocation25 + $0x830] sm:$0xff]  ;;  %v6577_v59 = vld [vmem:[#allocation25 + $0x878] sm:$0xff] }
0x17f1   :  { %9853 = vmatpush1.bf16.msra.mxu0 %v9852_v50  ;;  %10109 = vmatpush1.bf16.msra.mxu1 %v10108_v52  ;;  %v6540_v50 = vld [vmem:[#allocation25 + $0x750] sm:$0xff] }
0x17f2   :  { %9855 = vmatprep.subr.bf16.mxu0 %v9854_v55  ;;  %10111 = vmatprep.subr.bf16.mxu1 %v10110_v56  ;;  %v6544_v52 = vld [vmem:[#allocation25 + $0x770] sm:$0xff]  ;;  %v6549_v55 = vld [vmem:[#allocation25 + $0x798] sm:$0xff] }
0x17f3   :  { %v6553_v56 = vld [vmem:[#allocation25 + $0x7b8] sm:$0xff]  ;;  %v10128_v58 = vpack.c.bf16 %v6544_v52, %v6540_v50  ;;  %v10142_v50 = vpack.c.bf16 %v6577_v59, %v6573_v35  ;;  %v6579_v52 = vld [vmem:[#allocation25 + $0x888] sm:$0xff]  ;;  %v6606_v35 = vld [vmem:[#allocation25 + $0x960] sm:$0xff] }
0x17f4   :  { %v6604_v59 = vld [vmem:[#allocation25 + $0x950] sm:$0xff] }
0x17f5   :  { %9857 = vmatpush1.bf16.msra.mxu0 %v9856_v63  ;;  %10113 = vmatpush1.bf16.msra.mxu1 %v10112_v0  ;;  %v10130_v63 = vpack.c.bf16 %v6553_v56, %v6549_v55  ;;  %v6548_v0 = vld [vmem:[#allocation25 + $0x790] sm:$0xff]  ;;  %v6585_v55 = vld [vmem:[#allocation25 + $0x8b8] sm:$0xff] }
0x17f6   :  { %9859 = vmatprep.subr.bf16.mxu0 %v9858_v6  ;;  %10115 = vmatprep.subr.bf16.mxu1 %v10114_v8  ;;  %v4967_v6 = vsub.s32 5, %v11739_v38  ;;  %v6559_v8 = vld [vmem:[#allocation25 + $0x7e8] sm:$0xff]  ;;  %v10132_v11 = vpack.c.bf16 %v6552_v1, %v6548_v0  ;;  %v6584_v0 = vld [vmem:[#allocation25 + $0x8b0] sm:$0xff] }
0x17f7   :  { %v6587_v1 = vld [vmem:[#allocation25 + $0x8c8] sm:$0xff] }
0x17f8   :  { %v4968_v20 = vrot.slane %v11742_v18, %v4967_v6  ;;  %v6589_v6 = vld [vmem:[#allocation25 + $0x8d8] sm:$0xff] }
0x17f9   :  { %9861 = vmatpush1.bf16.msra.mxu0 %v9860_v15  ;;  %10117 = vmatpush1.bf16.msra.mxu1 %v10116_v16  ;;  %v4956_v15 = vrot.slane %v11742_v18, %v4955_v61  ;;  %v9878_v16 = vpack.c.bf16 %v6559_v8, %v6555_v2  ;;  %v6571_v18 = vld [vmem:[#allocation25 + $0x848] sm:$0xff]  ;;  %v6593_v8 = vld [vmem:[#allocation25 + $0x8f8] sm:$0xff] }
0x17fa   :  { %9863 = vmatprep.subr.bf16.mxu0 %v9862_v31  ;;  %10119 = vmatprep.subr.bf16.mxu1 %v10118_v34  ;;  %v6560_v31 = vld [vmem:[#allocation25 + $0x7f0] sm:$0xff]  ;;  %v6563_v34 = vld [vmem:[#allocation25 + $0x808] sm:$0xff] }
0x17fb   :  { %v10136_v25 = vpack.c.bf16 %v6560_v31, %v6556_v7  ;;  %v6591_v2 = vld [vmem:[#allocation25 + $0x8e8] sm:$0xff]  ;;  %v6597_v31 = vld [vmem:[#allocation25 + $0x918] sm:$0xff] }
0x17fc   :  { %v6599_v7 = vld [vmem:[#allocation25 + $0x928] sm:$0xff] }
0x17fd   :  { %9865 = vmatpush1.bf16.msra.mxu0 %v9864_v4  ;;  %10121 = vmatpush1.bf16.msra.mxu1 %v10120_v26  ;;  %v10349_v4 = vadd.f32 %v11755_v45, %v4956_v15  ;;  %v9882_v26 = vpack.c.bf16 %v6567_v21, %v6563_v34  ;;  %v10140_v45 = vpack.c.bf16 %v6568_v32, %v6564_v30  ;;  %v6601_v34 = vld [vmem:[#allocation25 + $0x938] sm:$0xff] }
0x17fe   :  { %9867 = vmatprep.subr.bf16.mxu0 %v9866_v28  ;;  %10123 = vmatprep.subr.bf16.mxu1 %v10122_v29  ;;  %v6566_v28 = vld [vmem:[#allocation25 + $0x820] sm:$0xff]  ;;  %v10352_v29 = vadd.f32 %v11761_v46, %v4968_v20  ;;  %v6576_v46 = vld [vmem:[#allocation25 + $0x870] sm:$0xff]  ;;  %v10150_v15 = vpack.c.bf16 %v6593_v8, %v6589_v6 }
0x17ff   :  { %v9884_v36 = vpack.c.bf16 %v6566_v28, %v6562_v27  ;;  %v6607_v27 = vld [vmem:[#allocation25 + $0x968] sm:$0xff]  ;;  %v6605_v28 = vld [vmem:[#allocation25 + $0x958] sm:$0xff]  ;;  %v6624_v8 = vld [vmem:[#allocation25 + $0x9f0] sm:$0xff] }
0x1801   :  { %9869 = vmatpush1.bf16.msra.mxu0 %v9868_v41  ;;  %10125 = vmatpush1.bf16.msra.mxu1 %v10124_v42  ;;  %v6300_v41 = vmax.f32 %v10349_v4, 0.0  ;;  %v6570_v42 = vld [vmem:[#allocation25 + $0x840] sm:$0xff]  ;;  %v10154_v4 = vpack.c.bf16 %v6601_v34, %v6597_v31  ;;  %v6632_v34 = vld [vmem:[#allocation25 + $0xa30] sm:$0xff] }
0x1802   :  { %9871 = vmatprep.subr.bf16.mxu0 %v9870_v48  ;;  %10127 = vmatprep.subr.bf16.mxu1 %v10126_v49  ;;  %v6303_v48 = vmax.f32 %v10352_v29, 0.0  ;;  %v9886_v49 = vpack.c.bf16 %v6575_v33, %v6571_v18  ;;  %v9888_v56 = vpack.c.bf16 %v6574_v43, %v6570_v42  ;;  %v6609_v29 = vld [vmem:[#allocation25 + $0x978] sm:$0xff]  ;;  %v6602_v33 = vld [vmem:[#allocation25 + $0x940] sm:$0xff]  ;;  %v6615_v42 = vld [vmem:[#allocation25 + $0x9a8] sm:$0xff] }
0x1803   :  { %v6613_v43 = vld [vmem:[#allocation25 + $0x998] sm:$0xff] }
0x1805   :  { %9873 = vmatpush1.bf16.msra.mxu0 %v9872_v57  ;;  %10129 = vmatpush1.bf16.msra.mxu1 %v10128_v58  ;;  %v10144_v57 = vpack.c.bf16 %v6576_v46, %v6572_v44  ;;  %v9890_v58 = vpack.c.bf16 %v6583_v3, %v6579_v52  ;;  %v6617_v44 = vld [vmem:[#allocation25 + $0x9b8] sm:$0xff]  ;;  %v6610_v46 = vld [vmem:[#allocation25 + $0x980] sm:$0xff]  ;;  %v6612_v3 = vld [vmem:[#allocation25 + $0x990] sm:$0xff] }
0x1806   :  { %9875 = vmatprep.subr.bf16.mxu0 %v9874_v62  ;;  %10131 = vmatprep.subr.bf16.mxu1 %v10130_v63  ;;  %v6580_v62 = vld [vmem:[#allocation25 + $0x890] sm:$0xff]  ;;  %v10146_v63 = vpack.c.bf16 %v6585_v55, %v6581_v53  ;;  %v6614_v52 = vld [vmem:[#allocation25 + $0x9a0] sm:$0xff]  ;;  %v10162_v53 = vpack.c.bf16 %v6617_v44, %v6613_v43 }
0x1807   :  { %v10148_v9 = vpack.c.bf16 %v6584_v0, %v6580_v62  ;;  %v6616_v55 = vld [vmem:[#allocation25 + $0x9b0] sm:$0xff]  ;;  %v9908_v60 = vpack.c.bf16 %v6614_v52, %v6610_v46  ;;  %v6618_v0 = vld [vmem:[#allocation25 + $0x9c0] sm:$0xff]  ;;  %v6657_v46 = vld [vmem:[#allocation25 + $0xaf8] sm:$0xff] }
0x1808   :  { %v10164_v62 = vpack.c.bf16 %v6616_v55, %v6612_v3  ;;  %v6648_v44 = vld [vmem:[#allocation25 + $0xab0] sm:$0xff]  ;;  %v6650_v55 = vld [vmem:[#allocation25 + $0xac0] sm:$0xff] }
0x1809   :  { %9877 = vmatpush1.bf16.msra.mxu0 %v9876_v10  ;;  %10133 = vmatpush1.bf16.msra.mxu1 %v10132_v11  ;;  %v9894_v10 = vpack.c.bf16 %v6591_v2, %v6587_v1  ;;  %v6586_v11 = vld [vmem:[#allocation25 + $0x8c0] sm:$0xff]  ;;  %v6620_v2 = vld [vmem:[#allocation25 + $0x9d0] sm:$0xff] }
0x180a   :  { %9879 = vmatprep.subr.bf16.mxu0 %v9878_v16  ;;  %10135 = vmatprep.subr.bf16.mxu1 %v10134_v19  ;;  %v6592_v16 = vld [vmem:[#allocation25 + $0x8f0] sm:$0xff]  ;;  %v6595_v19 = vld [vmem:[#allocation25 + $0x908] sm:$0xff]  ;;  %v9896_v20 = vpack.c.bf16 %v6590_v13, %v6586_v11  ;;  %v6622_v1 = vld [vmem:[#allocation25 + $0x9e0] sm:$0xff] }
0x180b   :  { %v10152_v21 = vpack.c.bf16 %v6592_v16, %v6588_v14  ;;  %v9898_v22 = vpack.c.bf16 %v6599_v7, %v6595_v19  ;;  %v6633_v11 = vld [vmem:[#allocation25 + $0xa38] sm:$0xff]  ;;  %v9912_v13 = vpack.c.bf16 %v6622_v1, %v6618_v0  ;;  %v10168_v14 = vpack.c.bf16 %v6624_v8, %v6620_v2  ;;  %v6626_v16 = vld [vmem:[#allocation25 + $0xa00] sm:$0xff]  ;;  %v6628_v7 = vld [vmem:[#allocation25 + $0xa10] sm:$0xff] }
0x180c   :  { %v6630_v19 = vld [vmem:[#allocation25 + $0xa20] sm:$0xff]  ;;  %v6665_v0 = vld [vmem:[#allocation25 + $0xb38] sm:$0xff] }
0x180d   :  { %9881 = vmatpush1.bf16.msra.mxu0 %v9880_v24  ;;  %10137 = vmatpush1.bf16.msra.mxu1 %v10136_v25  ;;  %v6598_v24 = vld [vmem:[#allocation25 + $0x920] sm:$0xff]  ;;  %v6596_v25 = vld [vmem:[#allocation25 + $0x910] sm:$0xff] }
0x180e   :  { %9883 = vmatprep.subr.bf16.mxu0 %v9882_v26  ;;  %10139 = vmatprep.subr.bf16.mxu1 %v10138_v39  ;;  %v6600_v26 = vld [vmem:[#allocation25 + $0x930] sm:$0xff]  ;;  %v6603_v39 = vld [vmem:[#allocation25 + $0x948] sm:$0xff]  ;;  %v9900_v30 = vpack.c.bf16 %v6598_v24, %v6594_v23  ;;  %v6641_v23 = vld [vmem:[#allocation25 + $0xa78] sm:$0xff]  ;;  %v9916_v24 = vpack.c.bf16 %v6630_v19, %v6626_v16 }
0x180f   :  { %v10156_v32 = vpack.c.bf16 %v6600_v26, %v6596_v25  ;;  %v9902_v18 = vpack.c.bf16 %v6607_v27, %v6603_v39  ;;  %v10172_v25 = vpack.c.bf16 %v6632_v34, %v6628_v7  ;;  %v6634_v26 = vld [vmem:[#allocation25 + $0xa40] sm:$0xff]  ;;  %v6636_v27 = vld [vmem:[#allocation25 + $0xa50] sm:$0xff]  ;;  %v6673_v16 = vld [vmem:[#allocation25 + $0xb78] sm:$0xff] }
0x1810   :  { %6976 = vmatmul.mubr.f32.vlgmr.msra.gmra.mrb[46].mxu0 %v6300_v41  ;;  %7260 = vmatmul.mubr.f32.vlgmr.msra.gmra.mrb[40].mxu1 %v6300_v41  ;;  %v6608_v41 = vld [vmem:[#allocation25 + $0x970] sm:$0xff]  ;;  %v6638_v39 = vld [vmem:[#allocation25 + $0xa60] sm:$0xff] }
0x1811   :  { %9885 = vmatpush1.bf16.msra.mxu0 %v9884_v36  ;;  %7046 = vmatprep.mubr.f32.mxu0 %v6303_v48  ;;  %v10158_v36 = vpack.c.bf16 %v6609_v29, %v6605_v28  ;;  %v6640_v29 = vld [vmem:[#allocation25 + $0xa70] sm:$0xff]  ;;  %v6658_v8 = vld [vmem:[#allocation25 + $0xb00] sm:$0xff] }
0x1812   :  { %10141 = vmatpush1.bf16.msra.mxu1 %v10140_v45  ;;  %7330 = vmatprep.mubr.f32.mxu1 %v6303_v48  ;;  %v6611_v45 = vld [vmem:[#allocation25 + $0x988] sm:$0xff]  ;;  %v9904_v48 = vpack.c.bf16 %v6606_v35, %v6602_v33  ;;  %v6649_v33 = vld [vmem:[#allocation25 + $0xab8] sm:$0xff]  ;;  %v9920_v35 = vpack.c.bf16 %v6638_v39, %v6634_v26  ;;  %v6666_v34 = vld [vmem:[#allocation25 + $0xb40] sm:$0xff] }
0x1813   :  { %9887 = vmatprep.subr.bf16.mxu0 %v9886_v49  ;;  %10143 = vmatprep.subr.bf16.mxu1 %v10142_v50  ;;  %v10160_v49 = vpack.c.bf16 %v6608_v41, %v6604_v59  ;;  %v9906_v50 = vpack.c.bf16 %v6615_v42, %v6611_v45  ;;  %v10176_v59 = vpack.c.bf16 %v6640_v29, %v6636_v27  ;;  %v6642_v41 = vld [vmem:[#allocation25 + $0xa80] sm:$0xff]  ;;  %v6644_v42 = vld [vmem:[#allocation25 + $0xa90] sm:$0xff]  ;;  %v6681_v26 = vld [vmem:[#allocation25 + $0xbb8] sm:$0xff]  ;;  %v4963_v27 = vsub.s32 4, %v11739_v38 }
0x1814   :  { %v6646_v45 = vld [vmem:[#allocation25 + $0xaa0] sm:$0xff]  ;;  %v10180_v3 = vpack.c.bf16 %v6648_v44, %v6644_v42  ;;  %v6689_v42 = vld [vmem:[#allocation25 + $0xbf8] sm:$0xff] }
0x1815   :  { %9889 = vmatpush1.bf16.msra.mxu0 %v9888_v56  ;;  %v6619_v56 = vld [vmem:[#allocation25 + $0x9c8] sm:$0xff]  ;;  %v9924_v52 = vpack.c.bf16 %v6646_v45, %v6642_v41  ;;  %v4975_v41 = vsub.s32 7, %v11739_v38  ;;  %v6685_v45 = vld [vmem:[#allocation25 + $0xbd8] sm:$0xff] }
0x1816   :  { %10145 = vmatpush1.bf16.msra.mxu1 %v10144_v57  ;;  %9891 = vmatprep.subr.bf16.mxu0 %v9890_v58  ;;  %v6623_v57 = vld [vmem:[#allocation25 + $0x9e8] sm:$0xff]  ;;  %v6621_v58 = vld [vmem:[#allocation25 + $0x9d8] sm:$0xff] }
0x1817   :  { %10147 = vmatprep.subr.bf16.mxu1 %v10146_v63  ;;  %v9910_v63 = vpack.c.bf16 %v6623_v57, %v6619_v56  ;;  %v10166_v6 = vpack.c.bf16 %v6625_v12, %v6621_v58  ;;  %v6654_v56 = vld [vmem:[#allocation25 + $0xae0] sm:$0xff]  ;;  %v6652_v57 = vld [vmem:[#allocation25 + $0xad0] sm:$0xff]  ;;  %v11775_v44 = vld [vmem:[#allocation23] sm:$0xff] }
0x1818   :  { %v6656_v12 = vld [vmem:[#allocation25 + $0xaf0] sm:$0xff]  ;;  %v9928_v1 = vpack.c.bf16 %v6654_v56, %v6650_v55  ;;  %v6691_v56 = vld [vmem:[#allocation25 + $0xc08] sm:$0xff] }
0x1819   :  { %9893 = vmatpush1.bf16.msra.mxu0 %v9892_v5  ;;  %v6627_v5 = vld [vmem:[#allocation25 + $0xa08] sm:$0xff]  ;;  %v10184_v2 = vpack.c.bf16 %v6656_v12, %v6652_v57  ;;  %v6688_v55 = vld [vmem:[#allocation25 + $0xbf0] sm:$0xff]  ;;  %v6693_v12 = vld [vmem:[#allocation25 + $0xc18] sm:$0xff] }
0x181a   :  { %10149 = vmatpush1.bf16.msra.mxu1 %v10148_v9  ;;  %9895 = vmatprep.subr.bf16.mxu0 %v9894_v10  ;;  %v6631_v9 = vld [vmem:[#allocation25 + $0xa28] sm:$0xff]  ;;  %v6629_v10 = vld [vmem:[#allocation25 + $0xa18] sm:$0xff] }
0x181b   :  { %10151 = vmatprep.subr.bf16.mxu1 %v10150_v15  ;;  %v9914_v15 = vpack.c.bf16 %v6631_v9, %v6627_v5  ;;  %v10170_v31 = vpack.c.bf16 %v6633_v11, %v6629_v10  ;;  %v6662_v5 = vld [vmem:[#allocation25 + $0xb20] sm:$0xff]  ;;  %v6660_v9 = vld [vmem:[#allocation25 + $0xb10] sm:$0xff]  ;;  %v6695_v57 = vld [vmem:[#allocation25 + $0xc28] sm:$0xff] }
0x181c   :  { %v6664_v11 = vld [vmem:[#allocation25 + $0xb30] sm:$0xff]  ;;  %v9932_v19 = vpack.c.bf16 %v6662_v5, %v6658_v8 }
0x181d   :  { %9897 = vmatpush1.bf16.msra.mxu0 %v9896_v20  ;;  %v6635_v20 = vld [vmem:[#allocation25 + $0xa48] sm:$0xff]  ;;  %v10188_v7 = vpack.c.bf16 %v6664_v11, %v6660_v9  ;;  %v6692_v5 = vld [vmem:[#allocation25 + $0xc10] sm:$0xff] }
0x181e   :  { %10153 = vmatpush1.bf16.msra.mxu1 %v10152_v21  ;;  %9899 = vmatprep.subr.bf16.mxu0 %v9898_v22  ;;  %v6639_v21 = vld [vmem:[#allocation25 + $0xa68] sm:$0xff]  ;;  %v6637_v22 = vld [vmem:[#allocation25 + $0xa58] sm:$0xff]  ;;  %v6696_v9 = vld [vmem:[#allocation25 + $0xc30] sm:$0xff] }
0x181f   :  { %10155 = vmatprep.subr.bf16.mxu1 %v10154_v4  ;;  %v9918_v4 = vpack.c.bf16 %v6639_v21, %v6635_v20  ;;  %v10174_v28 = vpack.c.bf16 %v6641_v23, %v6637_v22  ;;  %v6670_v20 = vld [vmem:[#allocation25 + $0xb60] sm:$0xff]  ;;  %v6668_v21 = vld [vmem:[#allocation25 + $0xb50] sm:$0xff]  ;;  %v6699_v11 = vld [vmem:[#allocation25 + $0xc48] sm:$0xff] }
0x1820   :  { %v6672_v23 = vld [vmem:[#allocation25 + $0xb70] sm:$0xff]  ;;  %v9936_v39 = vpack.c.bf16 %v6670_v20, %v6666_v34 }
0x1821   :  { %9901 = vmatpush1.bf16.msra.mxu0 %v9900_v30  ;;  %v6643_v30 = vld [vmem:[#allocation25 + $0xa88] sm:$0xff]  ;;  %v6700_v34 = vld [vmem:[#allocation25 + $0xc50] sm:$0xff] }
0x1822   :  { %10157 = vmatpush1.bf16.msra.mxu1 %v10156_v32  ;;  %9903 = vmatprep.subr.bf16.mxu0 %v9902_v18  ;;  %v6647_v32 = vld [vmem:[#allocation25 + $0xaa8] sm:$0xff]  ;;  %v6645_v18 = vld [vmem:[#allocation25 + $0xa98] sm:$0xff] }
0x1823   :  { %10159 = vmatprep.subr.bf16.mxu1 %v10158_v36  ;;  %v9922_v36 = vpack.c.bf16 %v6647_v32, %v6643_v30  ;;  %v10178_v43 = vpack.c.bf16 %v6649_v33, %v6645_v18  ;;  %v6674_v30 = vld [vmem:[#allocation25 + $0xb80] sm:$0xff]  ;;  %v6676_v18 = vld [vmem:[#allocation25 + $0xb90] sm:$0xff] }
0x1824   :  { %v6678_v32 = vld [vmem:[#allocation25 + $0xba0] sm:$0xff] }
0x1825   :  { %9905 = vmatpush1.bf16.msra.mxu0 %v9904_v48  ;;  %v6651_v48 = vld [vmem:[#allocation25 + $0xac8] sm:$0xff] }
0x1826   :  { %10161 = vmatpush1.bf16.msra.mxu1 %v10160_v49  ;;  %9907 = vmatprep.subr.bf16.mxu0 %v9906_v50  ;;  %v6655_v49 = vld [vmem:[#allocation25 + $0xae8] sm:$0xff]  ;;  %v6653_v50 = vld [vmem:[#allocation25 + $0xad8] sm:$0xff] }
0x1827   :  { %10163 = vmatprep.subr.bf16.mxu1 %v10162_v53  ;;  %v9926_v53 = vpack.c.bf16 %v6655_v49, %v6651_v48  ;;  %v10182_v58 = vpack.c.bf16 %v6657_v46, %v6653_v50  ;;  %v4964_v48 = vrot.slane %v11775_v44, %v4963_v27  ;;  %v6682_v46 = vld [vmem:[#allocation25 + $0xbc0] sm:$0xff] }
0x1829   :  { %9909 = vmatpush1.bf16.msra.mxu0 %v9908_v60  ;;  %v6659_v60 = vld [vmem:[#allocation25 + $0xb08] sm:$0xff] }
0x182a   :  { %10165 = vmatpush1.bf16.msra.mxu1 %v10164_v62  ;;  %9911 = vmatprep.subr.bf16.mxu0 %v9910_v63  ;;  %v6663_v62 = vld [vmem:[#allocation25 + $0xb28] sm:$0xff]  ;;  %v6661_v63 = vld [vmem:[#allocation25 + $0xb18] sm:$0xff] }
0x182b   :  { %10167 = vmatprep.subr.bf16.mxu1 %v10166_v6  ;;  %v9930_v6 = vpack.c.bf16 %v6663_v62, %v6659_v60  ;;  %v10186_v10 = vpack.c.bf16 %v6665_v0, %v6661_v63  ;;  %v6697_v60 = vld [vmem:[#allocation25 + $0xc38] sm:$0xff]  ;;  %v10351_v63 = vadd.f32 %v11757_v37, %v4964_v48  ;;  %v10204_v37 = vpack.c.bf16 %v6696_v9, %v6692_v5  ;;  %v6718_v48 = vld [vmem:[#allocation25 + $0xce0] sm:$0xff] }
0x182c   :  { %v10202_v8 = vpack.c.bf16 %v6697_v60, %v6693_v12  ;;  %v6722_v12 = vld [vmem:[#allocation25 + $0xd00] sm:$0xff] }
0x182d   :  { %9913 = vmatpush1.bf16.msra.mxu0 %v9912_v13  ;;  %v6667_v13 = vld [vmem:[#allocation25 + $0xb48] sm:$0xff]  ;;  %v6726_v60 = vld [vmem:[#allocation25 + $0xd20] sm:$0xff] }
0x182e   :  { %10169 = vmatpush1.bf16.msra.mxu1 %v10168_v14  ;;  %9915 = vmatprep.subr.bf16.mxu0 %v9914_v15  ;;  %v6671_v14 = vld [vmem:[#allocation25 + $0xb68] sm:$0xff]  ;;  %v6669_v15 = vld [vmem:[#allocation25 + $0xb58] sm:$0xff]  ;;  %v9964_v5 = vpack.c.bf16 %v6726_v60, %v6722_v12 }
0x182f   :  { %10171 = vmatprep.subr.bf16.mxu1 %v10170_v31  ;;  %v9934_v31 = vpack.c.bf16 %v6671_v14, %v6667_v13  ;;  %v10190_v22 = vpack.c.bf16 %v6673_v16, %v6669_v15  ;;  %v6703_v13 = vld [vmem:[#allocation25 + $0xc68] sm:$0xff]  ;;  %v6701_v15 = vld [vmem:[#allocation25 + $0xc58] sm:$0xff] }
0x1830   :  { %v6705_v16 = vld [vmem:[#allocation25 + $0xc78] sm:$0xff]  ;;  %v9950_v20 = vpack.c.bf16 %v6703_v13, %v6699_v11  ;;  %v6730_v11 = vld [vmem:[#allocation25 + $0xd40] sm:$0xff] }
0x1831   :  { %9917 = vmatpush1.bf16.msra.mxu0 %v9916_v24  ;;  %v6675_v24 = vld [vmem:[#allocation25 + $0xb88] sm:$0xff]  ;;  %v6734_v13 = vld [vmem:[#allocation25 + $0xd60] sm:$0xff] }
0x1832   :  { %10173 = vmatpush1.bf16.msra.mxu1 %v10172_v25  ;;  %9919 = vmatprep.subr.bf16.mxu0 %v9918_v4  ;;  %v6679_v25 = vld [vmem:[#allocation25 + $0xba8] sm:$0xff]  ;;  %v6677_v4 = vld [vmem:[#allocation25 + $0xb98] sm:$0xff] }
0x1833   :  { %10175 = vmatprep.subr.bf16.mxu1 %v10174_v28  ;;  %v10192_v28 = vpack.c.bf16 %v6672_v23, %v6668_v21  ;;  %v9938_v29 = vpack.c.bf16 %v6679_v25, %v6675_v24  ;;  %v10194_v33 = vpack.c.bf16 %v6681_v26, %v6677_v4  ;;  %v6704_v21 = vld [vmem:[#allocation25 + $0xc70] sm:$0xff]  ;;  %v6711_v23 = vld [vmem:[#allocation25 + $0xca8] sm:$0xff]  ;;  %v6709_v25 = vld [vmem:[#allocation25 + $0xc98] sm:$0xff] }
0x1834   :  { %v6713_v4 = vld [vmem:[#allocation25 + $0xcb8] sm:$0xff] }
0x1835   :  { %9921 = vmatpush1.bf16.msra.mxu0 %v9920_v35  ;;  %v6680_v35 = vld [vmem:[#allocation25 + $0xbb0] sm:$0xff] }
0x1836   :  { %10177 = vmatpush1.bf16.msra.mxu1 %v10176_v59  ;;  %9923 = vmatprep.subr.bf16.mxu0 %v9922_v36  ;;  %v6683_v59 = vld [vmem:[#allocation25 + $0xbc8] sm:$0xff]  ;;  %v10196_v49 = vpack.c.bf16 %v6680_v35, %v6676_v18  ;;  %v6712_v18 = vld [vmem:[#allocation25 + $0xcb0] sm:$0xff] }
0x1837   :  { %10179 = vmatprep.subr.bf16.mxu1 %v10178_v43  ;;  %v6687_v36 = vld [vmem:[#allocation25 + $0xbe8] sm:$0xff]  ;;  %v9940_v43 = vpack.c.bf16 %v6678_v32, %v6674_v30  ;;  %v6708_v30 = vld [vmem:[#allocation25 + $0xc90] sm:$0xff]  ;;  %v10210_v32 = vpack.c.bf16 %v6713_v4, %v6709_v25 }
0x1838   :  { %v9942_v50 = vpack.c.bf16 %v6687_v36, %v6683_v59  ;;  %v6719_v35 = vld [vmem:[#allocation25 + $0xce8] sm:$0xff]  ;;  %v6717_v59 = vld [vmem:[#allocation25 + $0xcd8] sm:$0xff]  ;;  %v6744_v25 = vld [vmem:[#allocation25 + $0xdb0] sm:$0xff] }
0x1839   :  { %9925 = vmatpush1.bf16.msra.mxu0 %v9924_v52  ;;  %v6686_v52 = vld [vmem:[#allocation25 + $0xbe0] sm:$0xff]  ;;  %v6721_v36 = vld [vmem:[#allocation25 + $0xcf8] sm:$0xff]  ;;  %v6747_v4 = vld [vmem:[#allocation25 + $0xdc8] sm:$0xff] }
0x183a   :  { %10181 = vmatpush1.bf16.msra.mxu1 %v10180_v3  ;;  %9927 = vmatprep.subr.bf16.mxu0 %v9926_v53  ;;  %v6684_v3 = vld [vmem:[#allocation25 + $0xbd0] sm:$0xff]  ;;  %v10198_v53 = vpack.c.bf16 %v6689_v42, %v6685_v45  ;;  %v9944_v62 = vpack.c.bf16 %v6686_v52, %v6682_v46  ;;  %v10212_v45 = vpack.c.bf16 %v6712_v18, %v6708_v30  ;;  %v6723_v52 = vld [vmem:[#allocation25 + $0xd08] sm:$0xff]  ;;  %v6750_v18 = vld [vmem:[#allocation25 + $0xde0] sm:$0xff] }
0x183b   :  { %10183 = vmatprep.subr.bf16.mxu1 %v10182_v58  ;;  %v4976_v58 = vrot.slane %v11775_v44, %v4975_v41  ;;  %v10200_v0 = vpack.c.bf16 %v6688_v55, %v6684_v3  ;;  %v6720_v46 = vld [vmem:[#allocation25 + $0xcf0] sm:$0xff]  ;;  %v6727_v3 = vld [vmem:[#allocation25 + $0xd28] sm:$0xff]  ;;  %v6729_v55 = vld [vmem:[#allocation25 + $0xd38] sm:$0xff] }
0x183d   :  { %9929 = vmatpush1.bf16.msra.mxu0 %v9928_v1  ;;  %v9946_v1 = vpack.c.bf16 %v6695_v57, %v6691_v56 }
0x183e   :  { %10185 = vmatpush1.bf16.msra.mxu1 %v10184_v2  ;;  %9931 = vmatprep.subr.bf16.mxu0 %v9930_v6  ;;  %v6690_v2 = vld [vmem:[#allocation25 + $0xc00] sm:$0xff] }
0x183f   :  { %10187 = vmatprep.subr.bf16.mxu1 %v10186_v10  ;;  %v6694_v6 = vld [vmem:[#allocation25 + $0xc20] sm:$0xff]  ;;  %v10354_v10 = vadd.f32 %v11763_v47, %v4976_v58  ;;  %v10206_v47 = vpack.c.bf16 %v6705_v16, %v6701_v15  ;;  %v9962_v58 = vpack.c.bf16 %v6727_v3, %v6723_v52  ;;  %v6736_v16 = vld [vmem:[#allocation25 + $0xd70] sm:$0xff] }
0x1840   :  { %v9948_v14 = vpack.c.bf16 %v6694_v6, %v6690_v2  ;;  %v6735_v2 = vld [vmem:[#allocation25 + $0xd68] sm:$0xff]  ;;  %v6733_v6 = vld [vmem:[#allocation25 + $0xd58] sm:$0xff]  ;;  %v6756_v52 = vld [vmem:[#allocation25 + $0xe10] sm:$0xff] }
0x1841   :  { %9933 = vmatpush1.bf16.msra.mxu0 %v9932_v19  ;;  %v6302_v19 = vmax.f32 %v10351_v63, 0.0  ;;  %v6305_v24 = vmax.f32 %v10354_v10, 0.0 }
0x1842   :  { %10189 = vmatpush1.bf16.msra.mxu1 %v10188_v7  ;;  %9935 = vmatprep.subr.bf16.mxu0 %v9934_v31  ;;  %v6698_v7 = vld [vmem:[#allocation25 + $0xc40] sm:$0xff] }
0x1843   :  { %10191 = vmatprep.subr.bf16.mxu1 %v10190_v22  ;;  %v6702_v31 = vld [vmem:[#allocation25 + $0xc60] sm:$0xff]  ;;  %v6707_v22 = vld [vmem:[#allocation25 + $0xc88] sm:$0xff] }
0x1844   :  { %v9952_v26 = vpack.c.bf16 %v6702_v31, %v6698_v7  ;;  %v9954_v27 = vpack.c.bf16 %v6711_v23, %v6707_v22  ;;  %v6741_v7 = vld [vmem:[#allocation25 + $0xd98] sm:$0xff]  ;;  %v6738_v22 = vld [vmem:[#allocation25 + $0xd80] sm:$0xff] }
0x1845   :  { %9937 = vmatpush1.bf16.msra.mxu0 %v9936_v39  ;;  %v10208_v39 = vpack.c.bf16 %v6704_v21, %v6700_v34  ;;  %v6745_v31 = vld [vmem:[#allocation25 + $0xdb8] sm:$0xff]  ;;  %v9968_v34 = vpack.c.bf16 %v6734_v13, %v6730_v11  ;;  %v6742_v23 = vld [vmem:[#allocation25 + $0xda0] sm:$0xff] }
0x1846   :  { %10193 = vmatpush1.bf16.msra.mxu1 %v10192_v28  ;;  %9939 = vmatprep.subr.bf16.mxu0 %v9938_v29  ;;  %v6706_v28 = vld [vmem:[#allocation25 + $0xc80] sm:$0xff] }
0x1847   :  { %10195 = vmatprep.subr.bf16.mxu1 %v10194_v33  ;;  %v6710_v29 = vld [vmem:[#allocation25 + $0xca0] sm:$0xff]  ;;  %v6715_v33 = vld [vmem:[#allocation25 + $0xcc8] sm:$0xff] }
0x1848   :  { %v9956_v41 = vpack.c.bf16 %v6710_v29, %v6706_v28  ;;  %v9958_v42 = vpack.c.bf16 %v6719_v35, %v6715_v33  ;;  %v9972_v28 = vpack.c.bf16 %v6742_v23, %v6738_v22  ;;  %v6748_v33 = vld [vmem:[#allocation25 + $0xdd0] sm:$0xff] }
0x1849   :  { %9941 = vmatpush1.bf16.msra.mxu0 %v9940_v43  ;;  %v6714_v43 = vld [vmem:[#allocation25 + $0xcc0] sm:$0xff] }
0x184a   :  { %10197 = vmatpush1.bf16.msra.mxu1 %v10196_v49  ;;  %9943 = vmatprep.subr.bf16.mxu0 %v9942_v50  ;;  %v6716_v49 = vld [vmem:[#allocation25 + $0xcd0] sm:$0xff]  ;;  %v10214_v50 = vpack.c.bf16 %v6721_v36, %v6717_v59  ;;  %v9960_v56 = vpack.c.bf16 %v6718_v48, %v6714_v43  ;;  %v6755_v36 = vld [vmem:[#allocation25 + $0xe08] sm:$0xff] }
0x184b   :  { %10199 = vmatprep.subr.bf16.mxu1 %v10198_v53  ;;  %v6725_v53 = vld [vmem:[#allocation25 + $0xd18] sm:$0xff]  ;;  %v10216_v57 = vpack.c.bf16 %v6720_v46, %v6716_v49  ;;  %v6752_v59 = vld [vmem:[#allocation25 + $0xdf0] sm:$0xff]  ;;  %v6758_v46 = vld [vmem:[#allocation25 + $0xe20] sm:$0xff] }
0x184c   :  { %v10218_v63 = vpack.c.bf16 %v6729_v55, %v6725_v53  ;;  %v10232_v48 = vpack.c.bf16 %v6752_v59, %v6748_v33  ;;  %v6760_v53 = vld [vmem:[#allocation25 + $0xe30] sm:$0xff]  ;;  %v6763_v55 = vld [vmem:[#allocation25 + $0xe48] sm:$0xff]  ;;  %v6790_v59 = vld [vmem:[#allocation25 + $0xf20] sm:$0xff] }
0x184d   :  { %9945 = vmatpush1.bf16.msra.mxu0 %v9944_v62  ;;  %v6724_v62 = vld [vmem:[#allocation25 + $0xd10] sm:$0xff]  ;;  %v10236_v60 = vpack.c.bf16 %v6760_v53, %v6756_v52  ;;  %v6798_v53 = vld [vmem:[#allocation25 + $0xf60] sm:$0xff] }
0x184e   :  { %10201 = vmatpush1.bf16.msra.mxu1 %v10200_v0  ;;  %9947 = vmatprep.subr.bf16.mxu0 %v9946_v1  ;;  %v6728_v0 = vld [vmem:[#allocation25 + $0xd30] sm:$0xff]  ;;  %v6731_v1 = vld [vmem:[#allocation25 + $0xd48] sm:$0xff] }
0x184f   :  { %10203 = vmatprep.subr.bf16.mxu1 %v10202_v8  ;;  %v6737_v8 = vld [vmem:[#allocation25 + $0xd78] sm:$0xff]  ;;  %v10220_v9 = vpack.c.bf16 %v6728_v0, %v6724_v62  ;;  %v9966_v10 = vpack.c.bf16 %v6735_v2, %v6731_v1  ;;  %v6766_v0 = vld [vmem:[#allocation25 + $0xe60] sm:$0xff]  ;;  %v6764_v1 = vld [vmem:[#allocation25 + $0xe50] sm:$0xff] }
0x1850   :  { %7047 = vmatmul.mubr.f32.vlgmr.msra.gmra.mrb[46].mxu0 %v6302_v19  ;;  %v10222_v15 = vpack.c.bf16 %v6737_v8, %v6733_v6  ;;  %v6768_v6 = vld [vmem:[#allocation25 + $0xe70] sm:$0xff]  ;;  %v6771_v8 = vld [vmem:[#allocation25 + $0xe88] sm:$0xff] }
0x1851   :  { %7331 = vmatmul.mubr.f32.vlgmr.msra.gmra.mrb[40].mxu1 %v6302_v19  ;;  %9949 = vmatpush1.bf16.msra.mxu0 %v9948_v14  ;;  %v6732_v14 = vld [vmem:[#allocation25 + $0xd50] sm:$0xff]  ;;  %v6739_v19 = vld [vmem:[#allocation25 + $0xd88] sm:$0xff]  ;;  %v10240_v13 = vpack.c.bf16 %v6768_v6, %v6764_v1  ;;  %v6802_v6 = vld [vmem:[#allocation25 + $0xf80] sm:$0xff] }
0x1852   :  { %7117 = vmatprep.mubr.f32.mxu0 %v6305_v24  ;;  %10205 = vmatpush1.bf16.msra.mxu1 %v10204_v37  ;;  %v6743_v37 = vld [vmem:[#allocation25 + $0xda8] sm:$0xff] }
0x1853   :  { %7401 = vmatprep.mubr.f32.mxu1 %v6305_v24  ;;  %9951 = vmatprep.subr.bf16.mxu0 %v9950_v20  ;;  %v10224_v20 = vpack.c.bf16 %v6736_v16, %v6732_v14  ;;  %v9970_v21 = vpack.c.bf16 %v6743_v37, %v6739_v19  ;;  %v6740_v24 = vld [vmem:[#allocation25 + $0xd90] sm:$0xff]  ;;  %v6774_v16 = vld [vmem:[#allocation25 + $0xea0] sm:$0xff] }
0x1854   :  { %10207 = vmatprep.subr.bf16.mxu1 %v10206_v47  ;;  %v10226_v47 = vpack.c.bf16 %v6745_v31, %v6741_v7  ;;  %v10228_v29 = vpack.c.bf16 %v6744_v25, %v6740_v24  ;;  %v6772_v19 = vld [vmem:[#allocation25 + $0xe90] sm:$0xff]  ;;  %v6779_v31 = vld [vmem:[#allocation25 + $0xec8] sm:$0xff]  ;;  %v6782_v25 = vld [vmem:[#allocation25 + $0xee0] sm:$0xff] }
0x1855   :  { %9953 = vmatpush1.bf16.msra.mxu0 %v9952_v26  ;;  %v6751_v26 = vld [vmem:[#allocation25 + $0xde8] sm:$0xff]  ;;  %v6776_v7 = vld [vmem:[#allocation25 + $0xeb0] sm:$0xff] }
0x1856   :  { %10209 = vmatpush1.bf16.msra.mxu1 %v10208_v39  ;;  %9955 = vmatprep.subr.bf16.mxu0 %v9954_v27  ;;  %v6749_v39 = vld [vmem:[#allocation25 + $0xdd8] sm:$0xff]  ;;  %v9974_v30 = vpack.c.bf16 %v6751_v26, %v6747_v4  ;;  %v10244_v23 = vpack.c.bf16 %v6776_v7, %v6772_v19  ;;  %v6780_v4 = vld [vmem:[#allocation25 + $0xed0] sm:$0xff] }
0x1857   :  { %10211 = vmatprep.subr.bf16.mxu1 %v10210_v32  ;;  %v6753_v27 = vld [vmem:[#allocation25 + $0xdf8] sm:$0xff]  ;;  %v6746_v32 = vld [vmem:[#allocation25 + $0xdc0] sm:$0xff] }
0x1858   :  { %v10230_v35 = vpack.c.bf16 %v6753_v27, %v6749_v39  ;;  %v9976_v43 = vpack.c.bf16 %v6750_v18, %v6746_v32  ;;  %v6784_v39 = vld [vmem:[#allocation25 + $0xef0] sm:$0xff]  ;;  %v6787_v27 = vld [vmem:[#allocation25 + $0xf08] sm:$0xff] }
0x1859   :  { %9957 = vmatpush1.bf16.msra.mxu0 %v9956_v41  ;;  %v6759_v41 = vld [vmem:[#allocation25 + $0xe28] sm:$0xff]  ;;  %v10248_v18 = vpack.c.bf16 %v6784_v39, %v6780_v4 }
0x185a   :  { %10213 = vmatpush1.bf16.msra.mxu1 %v10212_v45  ;;  %9959 = vmatprep.subr.bf16.mxu0 %v9958_v42  ;;  %v6757_v45 = vld [vmem:[#allocation25 + $0xe18] sm:$0xff]  ;;  %v9978_v49 = vpack.c.bf16 %v6759_v41, %v6755_v36  ;;  %v6788_v36 = vld [vmem:[#allocation25 + $0xf10] sm:$0xff] }
0x185b   :  { %10215 = vmatprep.subr.bf16.mxu1 %v10214_v50  ;;  %v6761_v42 = vld [vmem:[#allocation25 + $0xe38] sm:$0xff]  ;;  %v6754_v50 = vld [vmem:[#allocation25 + $0xe00] sm:$0xff] }
0x185c   :  { %v10234_v3 = vpack.c.bf16 %v6761_v42, %v6757_v45  ;;  %v9980_v12 = vpack.c.bf16 %v6758_v46, %v6754_v50  ;;  %v6792_v45 = vld [vmem:[#allocation25 + $0xf30] sm:$0xff]  ;;  %v6795_v42 = vld [vmem:[#allocation25 + $0xf48] sm:$0xff] }
0x185d   :  { %9961 = vmatpush1.bf16.msra.mxu0 %v9960_v56  ;;  %v6767_v56 = vld [vmem:[#allocation25 + $0xe68] sm:$0xff]  ;;  %v10252_v46 = vpack.c.bf16 %v6792_v45, %v6788_v36 }
0x185e   :  { %10217 = vmatpush1.bf16.msra.mxu1 %v10216_v57  ;;  %9963 = vmatprep.subr.bf16.mxu0 %v9962_v58  ;;  %v6765_v57 = vld [vmem:[#allocation25 + $0xe58] sm:$0xff]  ;;  %v9982_v62 = vpack.c.bf16 %v6767_v56, %v6763_v55  ;;  %v6796_v55 = vld [vmem:[#allocation25 + $0xf50] sm:$0xff] }
0x185f   :  { %10219 = vmatprep.subr.bf16.mxu1 %v10218_v63  ;;  %v6769_v58 = vld [vmem:[#allocation25 + $0xe78] sm:$0xff]  ;;  %v6762_v63 = vld [vmem:[#allocation25 + $0xe40] sm:$0xff] }
0x1860   :  { %v10238_v2 = vpack.c.bf16 %v6769_v58, %v6765_v57  ;;  %v9984_v11 = vpack.c.bf16 %v6766_v0, %v6762_v63  ;;  %v6800_v57 = vld [vmem:[#allocation25 + $0xf70] sm:$0xff]  ;;  %v6803_v58 = vld [vmem:[#allocation25 + $0xf88] sm:$0xff]  ;;  %v4971_v0 = vsub.s32 6, %v11739_v38  ;;  %v7793_v38 = vld [vmem:[#allocation28] ss:$0 sm:$0xff] }
0x1861   :  { %9965 = vmatpush1.bf16.msra.mxu0 %v9964_v5  ;;  %v6775_v5 = vld [vmem:[#allocation25 + $0xea8] sm:$0xff]  ;;  %v10256_v1 = vpack.c.bf16 %v6800_v57, %v6796_v55 }
0x1862   :  { %10221 = vmatpush1.bf16.msra.mxu1 %v10220_v9  ;;  %9967 = vmatprep.subr.bf16.mxu0 %v9966_v10  ;;  %v6773_v9 = vld [vmem:[#allocation25 + $0xe98] sm:$0xff]  ;;  %v9986_v14 = vpack.c.bf16 %v6775_v5, %v6771_v8  ;;  %v6806_v8 = vld [vmem:[#allocation25 + $0xfa0] sm:$0xff]  ;;  %v6804_v5 = vld [vmem:[#allocation25 + $0xf90] sm:$0xff]  ;;  %v4972_v19 = vrot.slane %v11775_v44, %v4971_v0 }
0x1863   :  { %10223 = vmatprep.subr.bf16.mxu1 %v10222_v15  ;;  %v6777_v10 = vld [vmem:[#allocation25 + $0xeb8] sm:$0xff]  ;;  %v6770_v15 = vld [vmem:[#allocation25 + $0xe80] sm:$0xff] }
0x1864   :  { %v10242_v37 = vpack.c.bf16 %v6777_v10, %v6773_v9  ;;  %v9988_v22 = vpack.c.bf16 %v6774_v16, %v6770_v15  ;;  %v6808_v10 = vld [vmem:[#allocation25 + $0xfb0] sm:$0xff]  ;;  %v6817_v15 = vld [vmem:[#allocation25 + $0xff8] sm:$0xff]  ;;  %v10004_v16 = vpack.c.bf16 %v6806_v8, %v6802_v6  ;;  %v7460_v44 = vld [vmem:[%s12040_s9 + $0x180] sm:$0xff]  ;;  %v10353_v4 = vadd.f32 %v11759_v17, %v4972_v19 }
0x1865   :  { %9969 = vmatpush1.bf16.msra.mxu0 %v9968_v34  ;;  %v6783_v34 = vld [vmem:[#allocation25 + $0xee8] sm:$0xff]  ;;  %v7434_v0 = vld [vmem:[%s12040_s9 + $0xb0] sm:$0xff]  ;;  %v7467_v6 = vld [vmem:[%s12040_s9 + $0x1b8] sm:$0xff] }
0x1866   :  { %10225 = vmatpush1.bf16.msra.mxu1 %v10224_v20  ;;  %9971 = vmatprep.subr.bf16.mxu0 %v9970_v21  ;;  %v6781_v20 = vld [vmem:[#allocation25 + $0xed8] sm:$0xff]  ;;  %v9990_v24 = vpack.c.bf16 %v6783_v34, %v6779_v31  ;;  %v6810_v31 = vld [vmem:[#allocation25 + $0xfc0] sm:$0xff]  ;;  %v7445_v17 = vld [vmem:[%s12040_s9 + $0x108] sm:$0xff]  ;;  %v6304_v36 = vmax.f32 %v10353_v4, 0.0 }
0x1867   :  { %10227 = vmatprep.subr.bf16.mxu1 %v10226_v47  ;;  %v6785_v21 = vld [vmem:[#allocation25 + $0xef8] sm:$0xff]  ;;  %v6778_v47 = vld [vmem:[#allocation25 + $0xec0] sm:$0xff]  ;;  %v7437_v19 = vld [vmem:[%s12040_s9 + $0xc8] sm:$0xff] }
0x1868   :  { %v10246_v26 = vpack.c.bf16 %v6785_v21, %v6781_v20  ;;  %v9992_v32 = vpack.c.bf16 %v6782_v25, %v6778_v47  ;;  %v6814_v34 = vld [vmem:[#allocation25 + $0xfe0] sm:$0xff]  ;;  %v6812_v20 = vld [vmem:[#allocation25 + $0xfd0] sm:$0xff] }
0x1869   :  { %9973 = vmatpush1.bf16.msra.mxu0 %v9972_v28  ;;  %v6791_v28 = vld [vmem:[#allocation25 + $0xf28] sm:$0xff]  ;;  %v10008_v25 = vpack.c.bf16 %v6814_v34, %v6810_v31  ;;  %v7470_v4 = vld [vmem:[%s12040_s9 + $0x1d0] sm:$0xff] }
0x186a   :  { %10229 = vmatpush1.bf16.msra.mxu1 %v10228_v29  ;;  %9975 = vmatprep.subr.bf16.mxu0 %v9974_v30  ;;  %v6789_v29 = vld [vmem:[#allocation25 + $0xf18] sm:$0xff]  ;;  %v9994_v33 = vpack.c.bf16 %v6791_v28, %v6787_v27  ;;  %v7461_v47 = vld [vmem:[%s12040_s9 + $0x188] sm:$0xff]  ;;  %v7412_v27 = vld [vmem:[%s12040_s9] sm:$0xff] }
0x186b   :  { %10231 = vmatprep.subr.bf16.mxu1 %v10230_v35  ;;  %v6793_v30 = vld [vmem:[#allocation25 + $0xf38] sm:$0xff]  ;;  %v6786_v35 = vld [vmem:[#allocation25 + $0xf00] sm:$0xff]  ;;  %v7413_v28 = vld [vmem:[%s12040_s9 + $0x8] sm:$0xff] }
0x186c   :  { %v10250_v41 = vpack.c.bf16 %v6793_v30, %v6789_v29  ;;  %v9996_v50 = vpack.c.bf16 %v6790_v59, %v6786_v35  ;;  %v7444_v29 = vld [vmem:[%s12040_s9 + $0x100] sm:$0xff]  ;;  %v10298_v30 = vpack.c.bf16 %v7461_v47, %v7460_v44  ;;  %v7463_v35 = vld [vmem:[%s12040_s9 + $0x198] sm:$0xff]  ;;  %v10268_v59 = vpack.c.bf16 %v7413_v28, %v7412_v27  ;;  %v7453_v44 = vld [vmem:[%s12040_s9 + $0x148] sm:$0xff] }
0x186d   :  { %9977 = vmatpush1.bf16.msra.mxu0 %v9976_v43  ;;  %v6799_v43 = vld [vmem:[#allocation25 + $0xf68] sm:$0xff]  ;;  %v7438_v47 = vld [vmem:[%s12040_s9 + $0xd0] sm:$0xff] }
0x186e   :  { %10233 = vmatpush1.bf16.msra.mxu1 %v10232_v48  ;;  %9979 = vmatprep.subr.bf16.mxu0 %v9978_v49  ;;  %v6797_v48 = vld [vmem:[#allocation25 + $0xf58] sm:$0xff]  ;;  %v9998_v52 = vpack.c.bf16 %v6799_v43, %v6795_v42 }
0x186f   :  { %10235 = vmatprep.subr.bf16.mxu1 %v10234_v3  ;;  %v6801_v49 = vld [vmem:[#allocation25 + $0xf78] sm:$0xff]  ;;  %v6794_v3 = vld [vmem:[#allocation25 + $0xf40] sm:$0xff] }
0x1870   :  { %v10254_v56 = vpack.c.bf16 %v6801_v49, %v6797_v48  ;;  %v10000_v63 = vpack.c.bf16 %v6798_v53, %v6794_v3  ;;  %v7414_v42 = vld [vmem:[%s12040_s9 + $0x10] sm:$0xff]  ;;  %v7415_v43 = vld [vmem:[%s12040_s9 + $0x18] sm:$0xff]  ;;  %v7464_v3 = vld [vmem:[%s12040_s9 + $0x1a0] sm:$0xff] }
0x1871   :  { %9981 = vmatpush1.bf16.msra.mxu0 %v9980_v12  ;;  %v6807_v12 = vld [vmem:[#allocation25 + $0xfa8] sm:$0xff]  ;;  %v7446_v48 = vld [vmem:[%s12040_s9 + $0x110] sm:$0xff]  ;;  %v10272_v55 = vpack.c.bf16 %v7415_v43, %v7414_v42 }
0x1872   :  { %10237 = vmatpush1.bf16.msra.mxu1 %v10236_v60  ;;  %9983 = vmatprep.subr.bf16.mxu0 %v9982_v62  ;;  %v6805_v60 = vld [vmem:[#allocation25 + $0xf98] sm:$0xff]  ;;  %v7465_v53 = vld [vmem:[%s12040_s9 + $0x1a8] sm:$0xff] }
0x1873   :  { %10239 = vmatprep.subr.bf16.mxu1 %v10238_v2  ;;  %v6809_v62 = vld [vmem:[#allocation25 + $0xfb8] sm:$0xff]  ;;  %v10002_v2 = vpack.c.bf16 %v6807_v12, %v6803_v58  ;;  %v7416_v58 = vld [vmem:[%s12040_s9 + $0x20] sm:$0xff]  ;;  %v7417_v12 = vld [vmem:[%s12040_s9 + $0x28] sm:$0xff] }
0x1874   :  { %v10258_v9 = vpack.c.bf16 %v6809_v62, %v6805_v60  ;;  %v7448_v60 = vld [vmem:[%s12040_s9 + $0x120] sm:$0xff]  ;;  %v10306_v62 = vpack.c.bf16 %v7465_v53, %v7464_v3  ;;  %v10276_v8 = vpack.c.bf16 %v7417_v12, %v7416_v58  ;;  %v7442_v53 = vld [vmem:[%s12040_s9 + $0xf0] sm:$0xff]  ;;  %v7475_v58 = vld [vmem:[%s12040_s9 + $0x1f8] sm:$0xff] }
0x1875   :  { %9985 = vmatpush1.bf16.msra.mxu0 %v9984_v11  ;;  %v6811_v11 = vld [vmem:[#allocation25 + $0xfc8] sm:$0xff]  ;;  %v7426_v12 = vld [vmem:[%s12040_s9 + $0x70] sm:$0xff] }
0x1876   :  { %10241 = vmatpush1.bf16.msra.mxu1 %v10240_v13  ;;  %9987 = vmatprep.subr.bf16.mxu0 %v9986_v14  ;;  %v6815_v13 = vld [vmem:[#allocation25 + $0xfe8] sm:$0xff]  ;;  %v6813_v14 = vld [vmem:[#allocation25 + $0xfd8] sm:$0xff] }
0x1877   :  { %10243 = vmatprep.subr.bf16.mxu1 %v10242_v37  ;;  %v10260_v37 = vpack.c.bf16 %v6808_v10, %v6804_v5  ;;  %v10006_v7 = vpack.c.bf16 %v6815_v13, %v6811_v11  ;;  %v10262_v21 = vpack.c.bf16 %v6817_v15, %v6813_v14  ;;  %v7418_v10 = vld [vmem:[%s12040_s9 + $0x30] sm:$0xff]  ;;  %v7419_v11 = vld [vmem:[%s12040_s9 + $0x38] sm:$0xff] }
0x1878   :  { %v7450_v13 = vld [vmem:[%s12040_s9 + $0x130] sm:$0xff]  ;;  %v7451_v15 = vld [vmem:[%s12040_s9 + $0x138] sm:$0xff]  ;;  %v10280_v31 = vpack.c.bf16 %v7419_v11, %v7418_v10 }
0x1879   :  { %9989 = vmatpush1.bf16.msra.mxu0 %v9988_v22  ;;  %v6816_v22 = vld [vmem:[#allocation25 + $0xff0] sm:$0xff]  ;;  %v10312_v34 = vpack.c.bf16 %v7451_v15, %v7450_v13 }
0x187a   :  { %10245 = vmatpush1.bf16.msra.mxu1 %v10244_v23  ;;  %9991 = vmatprep.subr.bf16.mxu0 %v9990_v24  ;;  %v7428_v23 = vld [vmem:[%s12040_s9 + $0x80] sm:$0xff]  ;;  %v7429_v24 = vld [vmem:[%s12040_s9 + $0x88] sm:$0xff] }
0x187b   :  { %10247 = vmatprep.subr.bf16.mxu1 %v10246_v26  ;;  %v10264_v26 = vpack.c.bf16 %v6816_v22, %v6812_v20  ;;  %v10266_v39 = vpack.c.bf16 %v7429_v24, %v7428_v23  ;;  %v7421_v22 = vld [vmem:[%s12040_s9 + $0x48] sm:$0xff]  ;;  %v7452_v23 = vld [vmem:[%s12040_s9 + $0x140] sm:$0xff] }
0x187c   :  { %v10316_v27 = vpack.c.bf16 %v7453_v44, %v7452_v23 }
0x187d   :  { %9993 = vmatpush1.bf16.msra.mxu0 %v9992_v32  ;;  %v7430_v32 = vld [vmem:[%s12040_s9 + $0x90] sm:$0xff] }
0x187e   :  { %10249 = vmatpush1.bf16.msra.mxu1 %v10248_v18  ;;  %9995 = vmatprep.subr.bf16.mxu0 %v9994_v33  ;;  %v7431_v18 = vld [vmem:[%s12040_s9 + $0x98] sm:$0xff]  ;;  %v7462_v33 = vld [vmem:[%s12040_s9 + $0x190] sm:$0xff] }
0x187f   :  { %10251 = vmatprep.subr.bf16.mxu1 %v10250_v41  ;;  %v10300_v41 = vpack.c.bf16 %v7445_v17, %v7444_v29  ;;  %v10270_v45 = vpack.c.bf16 %v7431_v18, %v7430_v32  ;;  %v10302_v49 = vpack.c.bf16 %v7463_v35, %v7462_v33  ;;  %v7422_v29 = vld [vmem:[%s12040_s9 + $0x50] sm:$0xff]  ;;  %v7455_v18 = vld [vmem:[%s12040_s9 + $0x158] sm:$0xff]  ;;  %v7440_v33 = vld [vmem:[%s12040_s9 + $0xe0] sm:$0xff] }
0x1880   :  { %v7454_v17 = vld [vmem:[%s12040_s9 + $0x150] sm:$0xff]  ;;  %v7441_v35 = vld [vmem:[%s12040_s9 + $0xe8] sm:$0xff] }
0x1881   :  { %9997 = vmatpush1.bf16.msra.mxu0 %v9996_v50  ;;  %v7447_v50 = vld [vmem:[%s12040_s9 + $0x118] sm:$0xff]  ;;  %v10290_v42 = vpack.c.bf16 %v7441_v35, %v7440_v33 }
0x1882   :  { %10253 = vmatpush1.bf16.msra.mxu1 %v10252_v46  ;;  %9999 = vmatprep.subr.bf16.mxu0 %v9998_v52  ;;  %v7432_v46 = vld [vmem:[%s12040_s9 + $0xa0] sm:$0xff]  ;;  %v7433_v52 = vld [vmem:[%s12040_s9 + $0xa8] sm:$0xff] }
0x1883   :  { %10255 = vmatprep.subr.bf16.mxu1 %v10254_v56  ;;  %v10304_v56 = vpack.c.bf16 %v7447_v50, %v7446_v48  ;;  %v10274_v57 = vpack.c.bf16 %v7433_v52, %v7432_v46  ;;  %v7424_v48 = vld [vmem:[%s12040_s9 + $0x60] sm:$0xff]  ;;  %v7457_v52 = vld [vmem:[%s12040_s9 + $0x168] sm:$0xff] }
0x1884   :  { %v7456_v50 = vld [vmem:[%s12040_s9 + $0x160] sm:$0xff] }
0x1885   :  { %10001 = vmatpush1.bf16.msra.mxu0 %v10000_v63  ;;  %v7449_v63 = vld [vmem:[%s12040_s9 + $0x128] sm:$0xff]  ;;  %v10324_v3 = vpack.c.bf16 %v7457_v52, %v7456_v50 }
0x1886   :  { %10257 = vmatpush1.bf16.msra.mxu1 %v10256_v1  ;;  %10003 = vmatprep.subr.bf16.mxu0 %v10002_v2  ;;  %v7435_v1 = vld [vmem:[%s12040_s9 + $0xb8] sm:$0xff]  ;;  %v7466_v2 = vld [vmem:[%s12040_s9 + $0x1b0] sm:$0xff]  ;;  %v10308_v5 = vpack.c.bf16 %v7449_v63, %v7448_v60 }
0x1887   :  { %10259 = vmatprep.subr.bf16.mxu1 %v10258_v9  ;;  %v10278_v9 = vpack.c.bf16 %v7435_v1, %v7434_v0  ;;  %v10310_v14 = vpack.c.bf16 %v7467_v6, %v7466_v2  ;;  %v7427_v60 = vld [vmem:[%s12040_s9 + $0x78] sm:$0xff]  ;;  %v7458_v0 = vld [vmem:[%s12040_s9 + $0x170] sm:$0xff] }
0x1888   :  { %v10296_v63 = vpack.c.bf16 %v7427_v60, %v7426_v12  ;;  %v7459_v1 = vld [vmem:[%s12040_s9 + $0x178] sm:$0xff] }
0x1889   :  { %10005 = vmatpush1.bf16.msra.mxu0 %v10004_v16  ;;  %v7436_v16 = vld [vmem:[%s12040_s9 + $0xc0] sm:$0xff]  ;;  %v10328_v2 = vpack.c.bf16 %v7459_v1, %v7458_v0  ;;  %v6818_v6 = vld [vmem:[#allocation26] sm:$0xf] }
0x188a   :  { %10261 = vmatpush1.bf16.msra.mxu1 %v10260_v37  ;;  %10007 = vmatprep.subr.bf16.mxu0 %v10006_v7  ;;  %v7468_v37 = vld [vmem:[%s12040_s9 + $0x1c0] sm:$0xff]  ;;  %v7469_v7 = vld [vmem:[%s12040_s9 + $0x1c8] sm:$0xff]  ;;  %v10282_v20 = vpack.c.bf16 %v7437_v19, %v7436_v16  ;;  %v6835_v10 = vrot.slane %v6818_v6, %v4959_v40 }
0x188b   :  { %10263 = vmatprep.subr.bf16.mxu1 %v10262_v21  ;;  %v7420_v21 = vld [vmem:[%s12040_s9 + $0x40] sm:$0xff]  ;;  %v10314_v24 = vpack.c.bf16 %v7469_v7, %v7468_v37 }
0x188d   :  { %10009 = vmatpush1.bf16.msra.mxu0 %v10008_v25  ;;  %v7439_v25 = vld [vmem:[%s12040_s9 + $0xd8] sm:$0xff] }
0x188e   :  { %10265 = vmatpush1.bf16.msra.mxu1 %v10264_v26  ;;  %10267 = vmatprep.subr.bf16.mxu0 %v10266_v39  ;;  %v7471_v26 = vld [vmem:[%s12040_s9 + $0x1d8] sm:$0xff]  ;;  %v10284_v39 = vpack.c.bf16 %v7421_v22, %v7420_v21  ;;  %v10286_v28 = vpack.c.bf16 %v7439_v25, %v7438_v47 }
0x188f   :  { %10299 = vmatprep.subr.bf16.mxu1 %v10298_v30  ;;  %v7423_v30 = vld [vmem:[%s12040_s9 + $0x58] sm:$0xff]  ;;  %v10318_v32 = vpack.c.bf16 %v7471_v26, %v7470_v4 }
0x1890   :  { %7118 = vmatmul.mubr.f32.vlgmr.msra.gmra.mrb[46].mxu0 %v6304_v36 }
0x1891   :  { %7402 = vmatmul.mubr.f32.vlgmr.msra.gmra.mrb[40].mxu1 %v6304_v36  ;;  %10269 = vmatpush3.bf16.msra.mxu0 %v10268_v59  ;;  %v7472_v59 = vld [vmem:[%s12040_s9 + $0x1e0] sm:$0xff]  ;;  %v7473_v36 = vld [vmem:[%s12040_s9 + $0x1e8] sm:$0xff] }
0x1892   :  { %10301 = vmatpush3.bf16.msra.mxu1 %v10300_v41  ;;  %10271 = vmatprep.subr.bf16.mxu0 %v10270_v45  ;;  %v10288_v41 = vpack.c.bf16 %v7423_v30, %v7422_v29  ;;  %v10320_v45 = vpack.c.bf16 %v7455_v18, %v7454_v17  ;;  %v10322_v43 = vpack.c.bf16 %v7473_v36, %v7472_v59 }
0x1893   :  { %10303 = vmatprep.subr.bf16.mxu1 %v10302_v49  ;;  %v7425_v49 = vld [vmem:[%s12040_s9 + $0x68] sm:$0xff] }
0x1894   :  { %v10292_v46 = vpack.c.bf16 %v7425_v49, %v7424_v48 }
0x1895   :  { %10273 = vmatpush3.bf16.msra.mxu0 %v10272_v55  ;;  %v7443_v55 = vld [vmem:[%s12040_s9 + $0xf8] sm:$0xff] }
0x1896   :  { %10305 = vmatpush3.bf16.msra.mxu1 %v10304_v56  ;;  %10275 = vmatprep.subr.bf16.mxu0 %v10274_v57  ;;  %v7474_v56 = vld [vmem:[%s12040_s9 + $0x1f0] sm:$0xff]  ;;  %v10294_v57 = vpack.c.bf16 %v7443_v55, %v7442_v53  ;;  %s10907_s9 = smov [#allocation29]  }
0x1897   :  { %10307 = vmatprep.subr.bf16.mxu1 %v10306_v62  ;;  %v10326_v62 = vpack.c.bf16 %v7475_v58, %v7474_v56  ;;  %s7631_s25 = sshll.u32 %s10907_s9, 4  ;;  %s7632_s25 = int_to_ptr.vmem [resolvable:$true] %s7631_s25 }
0x1898   :  { %s10836_s14 = scalar_lea.vmem %s7632_s25, 32  ;;  %p10841_p11 = scmp.lt.s32.totalorder %s7632_s25, %s7632_s25 }
0x1899   :  { %10277 = vmatpush3.bf16.msra.mxu0 %v10276_v8  ;;  %v6823_v8 = vrot.slane %v6818_v6, %v4947_v51  ;;  %p10837_p10 = scmp.ne.s32.totalorder %s7632_s25, %s10836_s14  ;;  %p10842_p12 = scmp.lt.s32.totalorder %s10836_s14, %s10836_s14 }
0x189a   :  { %10309 = vmatpush3.bf16.msra.mxu1 %v10308_v5  ;;  %10279 = vmatprep.subr.bf16.mxu0 %v10278_v9  ;;  %v6831_v5 = vrot.slane %v6818_v6, %v4955_v61  ;;  %v6827_v9 = vrot.slane %v6818_v6, %v4951_v54 }
0x189b   :  { %10311 = vmatprep.subr.bf16.mxu1 %v10310_v14  ;;  %p10843_p13 = por %p10842_p12, %p10841_p11 }
0x189d   :  { %10281 = vmatpush3.bf16.msra.mxu0 %v10280_v31  ;;  %p10844_p0 = pnand %p10843_p13, %p10837_p10 }
0x189e   :  { %10313 = vmatpush3.bf16.msra.mxu1 %v10312_v34  ;;  %10283 = vmatprep.subr.bf16.mxu0 %v10282_v20 }
0x189f   :  { %10315 = vmatprep.subr.bf16.mxu1 %v10314_v24 }
0x18a1   :  { %10285 = vmatpush3.bf16.msra.mxu0 %v10284_v39 }
0x18a2   :  { %10317 = vmatpush3.bf16.msra.mxu1 %v10316_v27  ;;  %10287 = vmatprep.subr.bf16.mxu0 %v10286_v28 }
0x18a3   :  { %10319 = vmatprep.subr.bf16.mxu1 %v10318_v32 }
0x18a5   :  { %10289 = vmatpush3.bf16.msra.mxu0 %v10288_v41 }
0x18a6   :  { %10321 = vmatpush3.bf16.msra.mxu1 %v10320_v45  ;;  %10291 = vmatprep.subr.bf16.mxu0 %v10290_v42 }
0x18a7   :  { %10323 = vmatprep.subr.bf16.mxu1 %v10322_v43 }
0x18a9   :  { %10293 = vmatpush3.bf16.msra.mxu0 %v10292_v46 }
0x18aa   :  { %10325 = vmatpush3.bf16.msra.mxu1 %v10324_v3  ;;  %10295 = vmatprep.subr.bf16.mxu0 %v10294_v57 }
0x18ab   :  { %10327 = vmatprep.subr.bf16.mxu1 %v10326_v62 }
0x18ad   :  { %10297 = vmatpush3.bf16.msra.mxu0 %v10296_v63 }
0x18ae   :  { %10329 = vmatpush3.bf16.msra.mxu1 %v10328_v2 }
0x1963   :  { %v7119_v11 = vpop.f32.mrb[46].mxu0 }
0x1964   :  { %v10355_v13 = vadd.f32 %v7119_v11, %v6823_v8  ;;  %v7403_v14 = vpop.f32.mrb[40].mxu1  ;;  %v7121_v15 = vpop.f32.mrb[47].mxu0 }
0x1965   :  { %v10357_v16 = vadd.f32 %v7403_v14, %v6831_v5  ;;  %v10356_v19 = vadd.f32 %v7121_v15, %v6827_v9  ;;  %v7405_v37 = vpop.f32.mrb[41].mxu1 }
0x1966   :  { %v10358_v7 = vadd.f32 %v7405_v37, %v6835_v10  ;;  %v7408_v34 = vmax.f32 %v10355_v13, 0.0 }
0x1967   :  { %v7409_v31 = vmax.f32 %v10356_v19, 0.0  ;;  %v7410_v20 = vmax.f32 %v10357_v16, 0.0 }
0x1968   :  { %v7411_v51 = vmax.f32 %v10358_v7, 0.0 }
0x1969   :  { %7547 = vmatprep.mubr.f32.mxu0 %v7409_v31 }
0x196a   :  { %7617 = vmatprep.mubr.f32.mxu1 %v7411_v51  ;;  %7548 = vmatmul.mubr.f32.vlgmr.msra.gmra.mrb[48].mxu0 %v7408_v34 }
0x196b   :  { %7618 = vmatmul.mubr.f32.vlgmr.msra.gmra.mrb[42].mxu1 %v7410_v20 }
0x1a3d   :  { %v8205_v54 = vpop.f32.mrb[48].mxu0 }
0x1a3e   :  { %v8240_v61 = vpop.f32.mrb[42].mxu1  ;;  %v8206_v40 = vpop.f32.mrb[49].mxu0 }
0x1a3f   :  { %v8207_v21 = vadd.f32 %v8206_v40, %v8205_v54  ;;  %v8241_v22 = vpop.f32.mrb[43].mxu1 }
0x1a40   :  { %v8242_v23 = vadd.f32 %v8241_v22, %v8240_v61 }
0x1a41   :  { %v7550_v24 = vadd.f32 %v8207_v21, %v7793_v38 }
0x1a43   :  { %v7620_v44 = vadd.f32 %v8242_v23, %v7550_v24 }
0x1a45   :  { %7624 = vst.msk [vmem:[#allocation29] sm:$0x3] %vm7623_vm5, %v7620_v44 }
0x1a46   :  { %10847 = shalt.err (!%p10844_p0)
}
0x1a47   :  { %s12041_s13 = sld [smem:[#allocation47_spill]] }
0x1a4d   :  { %s10848_s20 = scalar_lea.hbm %s12041_s13, 32 }
0x1a4e   :  { %p10849_p1 = scmp.ne.s32.totalorder %s12041_s13, %s10848_s20  ;;  %p10852_p2 = scmp.lt.u32.totalorder %s10848_s20, %s12041_s13 }
0x1a50   :  { %p10854_p3 = pnand %p10852_p2, %p10849_p1 }
0x1a52   :  { %10857 = shalt.err (!%p10854_p3)
}
0x1a53   :  { %7634 = dma.vmem_to_hbm [thread:$0]  %s7632_s25, 32, %s12041_s13, [#allocation4]  }
0x1a54   :  { %10876 = dma.done.wait [#allocation4], 32  }
0x1a55   :  { %10877 = vsyncadd [#allocation4], 4294967264 }
0x1a56   :  { %7638 = vsyncpa [#allocation3], 1 }
0x1a57   :  { %7639 = vsyncpa [#allocation6], 1 }
0x1a58   :  { %7640 = vsyncpa [#allocation9], 1 }
0x1a59   :  { %7641 = vsyncpa [#allocation12], 1 }
0x1a5a   :  { %7642 = vsyncpa [#allocation15], 1 }
0x1a5b   :  { %7643 = vsyncpa [#allocation18], 1 }
0x1a5c   :  { %7644 = vsyncpa [#allocation21], 1 }
0x1a5d   :  { %7645 = vsyncpa [#allocation24], 1 }
0x1a5e   :  { %7646 = vsyncpa [#allocation27], 1 }
0x1a5f   :  { %7647 = vsyncpa [#allocation4], 1 }

</bundles_post_ra>
